<compile_context>
chip_gen: v7x
topology: tpu7x:2x2x1
jax: 0.10.0
libtpu: 0.0.40
codegen_flags: <defaults>
</compile_context>

<pallas_src>
import functools

import jax
import jax.numpy as jnp
from jax import lax
from jax.experimental import pallas as pl
from jax.experimental.pallas import tpu as pltpu

# ---- static LeNet config (channel=3, res=32 => conv1 padding=0, stride=1) --
C_IN = 3
H0 = W0 = 32            # input spatial size
KSZ = 5                 # conv kernel size
OC1, OC2 = 6, 16        # conv output channels
G1W = 16                # pool1 grid width/height (valid 14x14)
G1 = G1W * G1W          # rows per sample on the pool1 / conv2 grid
HP2 = 5                 # pool2 output size
G2 = HP2 * HP2          # rows per sample on the compact pool2 grid
N_FC1, N_FC2, N_CLS = 120, 84, 10

LANES = 128             # GEMM N padding -> lane-dense MXU outputs
C1P = 8                 # conv1-output channel padding (a1 / p1 lane width)
K1 = KSZ * KSZ * C_IN   # 75: conv1 im2col depth (patches built in wrapper)
K1P = 80                # K1 rounded up to a multiple of 8
K2 = KSZ * KSZ * C1P    # 200: conv2 im2col depth

CHUNK1 = 256            # conv1 GEMM row chunk (bf16 lhs keeps vregs low)
CHUNK2 = 128            # conv2 GEMM row chunk (200-lane f32 patches + f32 acc
                        # must stay inside the 64-vreg file)
POOL_CHUNK = 64         # slab-max row chunk (narrow-lane f32 slabs)

# Trailing pad rows so shifted slab reads never touch unallocated VMEM.
A1_PAD = 40             # >= W0 + 1   (pool1 slab-max shifted reads)
P1_PAD = 72             # >= 4*G1W + 4 (conv2 shifted im2col reads)
A2_PAD = 24             # >= G1W + 1  (pool2 slab-max shifted reads)


def _pick_bt(batch):
    """Largest batch tile in {16, 8} dividing batch; small batches untiled."""
    for bt in (16, 8):
        if batch % bt == 0:
            return bt
    return batch


# ---------------------------------------------------------------------------
# The fused kernel (one grid step == BT samples)
# ---------------------------------------------------------------------------
def _lenet_kernel(x1_ref, w1_ref, w2_ref, wf1_ref, wf2_ref, wf3_ref, b_ref,
                  out_ref, a1_ref, p1_ref, a2_ref, p2_ref, *, bt):
    rows0 = bt * H0 * W0      # conv1 row domain (32x32 grid per sample)
    rows1 = bt * G1           # conv2 row domain (16x16 grid per sample)

    # Zero only the trailing pad rows touched by shifted slab reads, so the
    # kernel never reads uninitialized VMEM.  The in-grid "junk" bands
    # (conv1 h/w>=28, pool1 i/j>=14, conv2 i/j>=10) are always overwritten
    # with finite values and are only ever read into other junk rows, never
    # into valid outputs.
    a1_ref[pl.ds(rows0, A1_PAD), :] = jnp.zeros((A1_PAD, C1P), jnp.float32)
    p1_ref[pl.ds(rows1, P1_PAD), :] = jnp.zeros((P1_PAD, C1P), jnp.float32)
    a2_ref[pl.ds(rows1, A2_PAD), :] = jnp.zeros((A2_PAD, OC2), jnp.float32)

    # ---------------- conv1 (5x5 valid) + ReLU: im2col GEMM ----------------
    # Patches arrive pre-built (lane-dense bf16) from the wrapper: each chunk
    # is one aligned load + one MXU dot; no in-kernel lane concatenation.
    b1 = b_ref[pl.ds(0, 1), :][:, :C1P]                          # (1, 8)

    def conv1_body(ci, carry):
        base = pl.multiple_of(ci * CHUNK1, CHUNK1)
        lhs = x1_ref[pl.ds(base, CHUNK1), :]                     # (256,80) bf16
        acc = jnp.dot(lhs, w1_ref[...],
                      preferred_element_type=jnp.float32)        # (256,128) f32
        a1_ref[pl.ds(base, CHUNK1), :] = jnp.maximum(acc[:, :C1P] + b1, 0.0)
        return carry

    lax.fori_loop(0, rows0 // CHUNK1, conv1_body, 0)

    # ---------------- 2x2 / stride-2 max pools ------------------------------
    def pool_slab_max(ref, n_rows, row_w):
        """In place: ref[r] = max(ref[r], ref[r+1], ref[r+row_w], ref[r+row_w+1])."""
        def body(ci, carry):
            base = ci * POOL_CHUNK
            m = jnp.maximum(ref[pl.ds(base, POOL_CHUNK), :],
                            ref[pl.ds(base + 1, POOL_CHUNK), :])
            m = jnp.maximum(m, ref[pl.ds(base + row_w, POOL_CHUNK), :])
            m = jnp.maximum(m, ref[pl.ds(base + row_w + 1, POOL_CHUNK), :])
            ref[pl.ds(base, POOL_CHUNK), :] = m
            return carry
        lax.fori_loop(0, n_rows // POOL_CHUNK, body, 0)

    # pool1: 32x32 grid -> 16x16 grid (valid 14x14), 8 lanes.
    pool_slab_max(a1_ref, rows0, W0)
    for b in range(bt):                       # stride-2 decimation, one row
        for i in range(G1W):                  # band per (sample, output row)
            src = b * (H0 * W0) + i * (2 * W0)
            dst = b * G1 + i * G1W
            p1_ref[pl.ds(dst, G1W), :] = a1_ref[pl.ds(src, G1W, stride=2), :]

    # ---------------- conv2 (5x5 valid) + ReLU: im2col GEMM ----------------
    b2 = b_ref[pl.ds(1, 1), :][:, :OC2]                          # (1, 16)
    offs2 = [kh * G1W + kw for kh in range(KSZ) for kw in range(KSZ)]

    def conv2_body(ci, carry):
        base = pl.multiple_of(ci * CHUNK2, CHUNK2)
        pieces = [p1_ref[pl.ds(base + off, CHUNK2), :] for off in offs2]
        patches = jnp.concatenate(pieces, axis=1)                # (128,200) f32
        acc = jnp.dot(patches.astype(jnp.bfloat16), w2_ref[...],
                      preferred_element_type=jnp.float32)        # (128,128) f32
        a2_ref[pl.ds(base, CHUNK2), :] = jnp.maximum(acc[:, :OC2] + b2, 0.0)
        return carry

    lax.fori_loop(0, rows1 // CHUNK2, conv2_body, 0)

    # pool2: 16x16 grid (valid 10x10) -> compact 5x5 grid, 16 lanes.
    pool_slab_max(a2_ref, rows1, G1W)
    for b in range(bt):
        for i in range(HP2):
            src = b * G1 + i * (2 * G1W)
            dst = b * G2 + i * HP2
            p2_ref[pl.ds(dst, HP2), :] = a2_ref[pl.ds(src, HP2, stride=2), :]

    # ---------------- classifier: fc row domain == batch tile --------------
    # Stride-25 gathers pull exactly one row per (sample, pooled position),
    # so fc1/fc2/fc3 run on `bt` rows only (no junk rows, no per-sample loop).
    pieces = [p2_ref[pl.ds(p, bt, stride=G2), :] for p in range(G2)]
    feat = jnp.concatenate(pieces, axis=1)                       # (bt, 400) f32
    h = jnp.dot(feat.astype(jnp.bfloat16), wf1_ref[...],
                preferred_element_type=jnp.float32)
    h = jnp.maximum(h + b_ref[pl.ds(2, 1), :], 0.0)              # fc1 + ReLU
    h = jnp.dot(h.astype(jnp.bfloat16), wf2_ref[...],
                preferred_element_type=jnp.float32)
    h = jnp.maximum(h + b_ref[pl.ds(3, 1), :], 0.0)              # fc2 + ReLU
    h = jnp.dot(h.astype(jnp.bfloat16), wf3_ref[...],
                preferred_element_type=jnp.float32)
    out_ref[...] = h + b_ref[pl.ds(4, 1), :]                     # fc3 logits


# ---------------------------------------------------------------------------
# Wrapper
# ---------------------------------------------------------------------------
@jax.jit
def lenet_forward(x, params):
    """x: (B, 3, 32, 32) NCHW float32; params: output of prepare_params()."""
    batch, cin, hin, win = x.shape
    assert (cin, hin, win) == (C_IN, H0, W0), "kernel is built for channel=3, res=32"
    bt = _pick_bt(batch)
    rows0 = batch * H0 * W0

    # One-time XLA layout op: conv1 im2col patches, rows = (b,h,w) positions
    # (junk at h/w>=28 computed from zero padding), lanes = (kh,kw,c), bf16.
    xp = jnp.transpose(x, (0, 2, 3, 1))                          # (B,32,32,3)
    xp = jnp.pad(xp, ((0, 0), (0, KSZ - 1), (0, KSZ - 1), (0, 0)))
    taps = [xp[:, kh:kh + H0, kw:kw + W0, :]
            for kh in range(KSZ) for kw in range(KSZ)]
    x1 = jnp.concatenate(taps, axis=-1).reshape(rows0, K1)       # (B*1024,75)
    x1 = jnp.pad(x1, ((0, 0), (0, K1P - K1))).astype(jnp.bfloat16)

    kernel = functools.partial(_lenet_kernel, bt=bt)
    out = pl.pallas_call(
        kernel,
        out_shape=jax.ShapeDtypeStruct((batch, LANES), jnp.float32),
        grid=(batch // bt,),
        in_specs=[
            pl.BlockSpec((bt * H0 * W0, K1P), lambda i: (i, 0)),   # conv1 patches
            pl.BlockSpec((K1P, LANES), lambda i: (0, 0)),          # w1
            pl.BlockSpec((K2, LANES), lambda i: (0, 0)),           # w2
            pl.BlockSpec((G2 * OC2, LANES), lambda i: (0, 0)),     # wf1
            pl.BlockSpec((LANES, LANES), lambda i: (0, 0)),        # wf2
            pl.BlockSpec((LANES, LANES), lambda i: (0, 0)),        # wf3
            pl.BlockSpec((8, LANES), lambda i: (0, 0)),            # biases
        ],
        out_specs=pl.BlockSpec((bt, LANES), lambda i: (i, 0)),
        scratch_shapes=[
            pltpu.VMEM((bt * H0 * W0 + A1_PAD, C1P), jnp.float32),  # conv1 out
            pltpu.VMEM((bt * G1 + P1_PAD, C1P), jnp.float32),       # pool1 out
            pltpu.VMEM((bt * G1 + A2_PAD, OC2), jnp.float32),       # conv2 out
            pltpu.VMEM((bt * G2, OC2), jnp.float32),                # pool2 out
        ],
        compiler_params=pltpu.CompilerParams(
            dimension_semantics=("parallel",)),
    )(x1, params["w1"], params["w2"], params["wf1"], params["wf2"],
      params["wf3"], params["bias"])
    return out[:, :N_CLS]


# ---------------------------------------------------------------------------
# Parameter construction (PyTorch layout) + one-time repacking for the kernel
# ---------------------------------------------------------------------------
def init_params(key, channel=3, num_classes=10):
    """Deterministic synthetic init with PyTorch parameter shapes."""
    ks = jax.random.split(key, 10)

    def unif(k, shape, fan_in):
        bound = 1.0 / jnp.sqrt(float(fan_in))
        return jax.random.uniform(k, shape, jnp.float32, -bound, bound)

    return {
        "conv1_w": unif(ks[0], (6, channel, 5, 5), channel * 25),
        "conv1_b": unif(ks[1], (6,), channel * 25),
        "conv2_w": unif(ks[2], (16, 6, 5, 5), 6 * 25),
        "conv2_b": unif(ks[3], (16,), 6 * 25),
        "fc1_w": unif(ks[4], (120, 16 * 5 * 5), 400),
        "fc1_b": unif(ks[5], (120,), 400),
        "fc2_w": unif(ks[6], (84, 120), 120),
        "fc2_b": unif(ks[7], (84,), 120),
        "fc3_w": unif(ks[8], (num_classes, 84), 84),
        "fc3_b": unif(ks[9], (num_classes,), 84),
    }


def prepare_params(p):
    """Repack PyTorch-layout params into (K, 128) bf16 GEMM layout, once."""
    # conv1: rows (kh*5+kw)*3 + c (matches wrapper patch lanes), cols oc.
    w1 = jnp.transpose(p["conv1_w"], (2, 3, 1, 0)).reshape(K1, OC1)
    w1 = jnp.pad(w1, ((0, K1P - K1), (0, LANES - OC1))).astype(jnp.bfloat16)
    # conv2: rows (kh*5+kw)*8 + c (matches in-kernel concat order), cols oc.
    w2 = jnp.transpose(p["conv2_w"], (2, 3, 1, 0))               # (5,5,6,16)
    w2 = jnp.pad(w2, ((0, 0), (0, 0), (0, C1P - OC1), (0, LANES - OC2)))
    w2 = w2.reshape(K2, LANES).astype(jnp.bfloat16)
    # fc1: PyTorch flatten order is c*25 + p; kernel patch lanes are p*16 + c.
    f1 = p["fc1_w"].reshape(N_FC1, OC2, G2)                      # (n, c, p)
    f1 = jnp.transpose(f1, (2, 1, 0))                            # (p, c, n)
    f1 = jnp.pad(f1, ((0, 0), (0, 0), (0, LANES - N_FC1)))
    f1 = f1.reshape(G2 * OC2, LANES).astype(jnp.bfloat16)        # (400,128)
    f2 = jnp.pad(p["fc2_w"].T,
                 ((0, LANES - N_FC1), (0, LANES - N_FC2))).astype(jnp.bfloat16)
    f3 = jnp.pad(p["fc3_w"].T,
                 ((0, LANES - N_FC2), (0, LANES - N_CLS))).astype(jnp.bfloat16)
    bias = jnp.zeros((8, LANES), jnp.float32)
    bias = bias.at[0, :OC1].set(p["conv1_b"])
    bias = bias.at[1, :OC2].set(p["conv2_b"])
    bias = bias.at[2, :N_FC1].set(p["fc1_b"])
    bias = bias.at[3, :N_FC2].set(p["fc2_b"])
    bias = bias.at[4, :N_CLS].set(p["fc3_b"])
    return {"w1": w1, "w2": w2, "wf1": f1, "wf2": f2, "wf3": f3, "bias": bias}


# ---------------------------------------------------------------------------
# Pure-JAX reference (mirrors the PyTorch module) for a correctness check
# ---------------------------------------------------------------------------
def lenet_reference(x, raw):
    dn = ("NCHW", "OIHW", "NCHW")
    hp = lax.Precision.HIGHEST
    y = lax.conv_general_dilated(x, raw["conv1_w"], (1, 1), "VALID",
                                 dimension_numbers=dn, precision=hp)
    y = jax.nn.relu(y + raw["conv1_b"][None, :, None, None])
    y = lax.reduce_window(y, -jnp.inf, lax.max, (1, 1, 2, 2), (1, 1, 2, 2),
                          "VALID")
    y = lax.conv_general_dilated(y, raw["conv2_w"], (1, 1), "VALID",
                                 dimension_numbers=dn, precision=hp)
    y = jax.nn.relu(y + raw["conv2_b"][None, :, None, None])
    y = lax.reduce_window(y, -jnp.inf, lax.max, (1, 1, 2, 2), (1, 1, 2, 2),
                          "VALID")
    y = y.reshape(y.shape[0], -1)
    y = jax.nn.relu(jnp.dot(y, raw["fc1_w"].T, precision=hp) + raw["fc1_b"])
    y = jax.nn.relu(jnp.dot(y, raw["fc2_w"].T, precision=hp) + raw["fc2_b"])
    return jnp.dot(y, raw["fc3_w"].T, precision=hp) + raw["fc3_b"]


if __name__ == "__main__":
    key = jax.random.PRNGKey(0)
    k_x, k_p = jax.random.split(key)

    # channel=3, res=32 (so the 16*5*5 flatten feeding fc_1 is consistent).
    batch, channel, res, num_classes = 2, 3, 32, 10
    x = jax.random.normal(k_x, (batch, channel, res, res), dtype=jnp.float32)
    raw = init_params(k_p, channel=channel, num_classes=num_classes)
    params = prepare_params(raw)

    out = jax.block_until_ready(lenet_forward(x, params))
    assert out.shape == (batch, num_classes), out.shape

    ref = jax.block_until_ready(jax.jit(lenet_reference)(x, raw))
    err = float(jnp.max(jnp.abs(out - ref)))
    # Tolerance covers bf16 MXU operands (f32 accumulation) vs. the f32
    # HIGHEST-precision reference.
    assert err < 5e-2, f"Pallas LeNet mismatch vs reference: max|diff|={err}"
    print("KERNEL_OK")
</pallas_src>

<mosaic_0001>
module attributes {stable_mosaic.version = 11 : i64} {
  func.func @_lenet_kernel(%arg0: i32, %arg1: memref<2048x80xbf16, #tpu.memory_space<vmem>>, %arg2: memref<80x128xbf16, #tpu.memory_space<vmem>>, %arg3: memref<200x128xbf16, #tpu.memory_space<vmem>>, %arg4: memref<400x128xbf16, #tpu.memory_space<vmem>>, %arg5: memref<128x128xbf16, #tpu.memory_space<vmem>>, %arg6: memref<128x128xbf16, #tpu.memory_space<vmem>>, %arg7: memref<8x128xf32, #tpu.memory_space<vmem>>, %arg8: memref<2x128xf32, #tpu.memory_space<vmem>>, %arg9: memref<2088x8xf32, #tpu.memory_space<vmem>>, %arg10: memref<584x8xf32, #tpu.memory_space<vmem>>, %arg11: memref<536x16xf32, #tpu.memory_space<vmem>>, %arg12: memref<50x16xf32, #tpu.memory_space<vmem>>) attributes {dimension_semantics = [#tpu.dimension_semantics<parallel>], iteration_bounds = array<i64: 1>, scalar_prefetch = 0 : i64, scratch_operands = 4 : i64, tpu.core_type = #tpu.core_type<tc>, window_params = [{transform_indices = @transform_0, window_bounds = array<i64: 2048, 80>}, {pipeline_mode = #tpu.pipeline_mode<synchronous>, transform_indices = @transform_1, window_bounds = array<i64: 80, 128>}, {pipeline_mode = #tpu.pipeline_mode<synchronous>, transform_indices = @transform_2, window_bounds = array<i64: 200, 128>}, {pipeline_mode = #tpu.pipeline_mode<synchronous>, transform_indices = @transform_3, window_bounds = array<i64: 400, 128>}, {pipeline_mode = #tpu.pipeline_mode<synchronous>, transform_indices = @transform_4, window_bounds = array<i64: 128, 128>}, {pipeline_mode = #tpu.pipeline_mode<synchronous>, transform_indices = @transform_5, window_bounds = array<i64: 128, 128>}, {pipeline_mode = #tpu.pipeline_mode<synchronous>, transform_indices = @transform_6, window_bounds = array<i64: 8, 128>}, {transform_indices = @transform_7, window_bounds = array<i64: 2, 128>}]} {
    %cst = arith.constant 0.000000e+00 : f32
    %0 = vector.broadcast %cst : f32 to vector<40x8xf32>
    %c2048 = arith.constant 2048 : index
    %c0 = arith.constant 0 : index
    %1 = vector.load %arg9[%c2048, %c0] : memref<2088x8xf32, #tpu.memory_space<vmem>>, vector<40x8xf32>
    tpu.vector_store %arg9[%c2048, %c0], %0 {strides = array<i32>} : memref<2088x8xf32, #tpu.memory_space<vmem>>, vector<40x8xf32>,
    %cst_0 = arith.constant 0.000000e+00 : f32
    %2 = vector.broadcast %cst_0 : f32 to vector<72x8xf32>
    %c512 = arith.constant 512 : index
    %c0_1 = arith.constant 0 : index
    %3 = vector.load %arg10[%c512, %c0_1] : memref<584x8xf32, #tpu.memory_space<vmem>>, vector<72x8xf32>
    tpu.vector_store %arg10[%c512, %c0_1], %2 {strides = array<i32>} : memref<584x8xf32, #tpu.memory_space<vmem>>, vector<72x8xf32>,
    %cst_2 = arith.constant 0.000000e+00 : f32
    %4 = vector.broadcast %cst_2 : f32 to vector<24x16xf32>
    %c512_3 = arith.constant 512 : index
    %c0_4 = arith.constant 0 : index
    %5 = vector.load %arg11[%c512_3, %c0_4] : memref<536x16xf32, #tpu.memory_space<vmem>>, vector<24x16xf32>
    tpu.vector_store %arg11[%c512_3, %c0_4], %4 {strides = array<i32>} : memref<536x16xf32, #tpu.memory_space<vmem>>, vector<24x16xf32>,
    %c0_5 = arith.constant 0 : index
    %c0_6 = arith.constant 0 : index
    %6 = vector.load %arg7[%c0_5, %c0_6] : memref<8x128xf32, #tpu.memory_space<vmem>>, vector<1x128xf32>
    %7 = vector.extract_strided_slice %6 {offsets = [0, 0], sizes = [1, 8], strides = [1, 1]} : vector<1x128xf32> to vector<1x8xf32>
    %c0_i32 = arith.constant 0 : i32
    %c8_i32 = arith.constant 8 : i32
    %8 = arith.addi %c0_i32, %c8_i32 : i32
    %c1_i32 = arith.constant 1 : i32
    scf.for %arg13 = %c0_i32 to %8 step %c1_i32  : i32 {
      %c256_i32 = arith.constant 256 : i32
      %149 = arith.muli %arg13, %c256_i32 : i32
      %150 = tpu.assume_multiple %149, 256 : i32
      %151 = arith.index_cast %150 : i32 to index
      %c0_175 = arith.constant 0 : index
      %152 = vector.load %arg1[%151, %c0_175] : memref<2048x80xbf16, #tpu.memory_space<vmem>>, vector<256x80xbf16>
      %c0_176 = arith.constant 0 : index
      %c0_177 = arith.constant 0 : index
      %153 = vector.load %arg2[%c0_176, %c0_177] : memref<80x128xbf16, #tpu.memory_space<vmem>>, vector<80x128xbf16>
      %cst_178 = arith.constant dense<0.000000e+00> : vector<256x128xf32>
      %154 = tpu.matmul %152, %153, %cst_178 {dimension_numbers = #tpu.dot_dimension_numbers<[1], [0], [0], [1], [0, 0, 1, 1], [], []>} : vector<256x80xbf16>, vector<80x128xbf16>, vector<256x128xf32> -> vector<256x128xf32>
      %155 = vector.extract_strided_slice %154 {offsets = [0, 0], sizes = [256, 8], strides = [1, 1]} : vector<256x128xf32> to vector<256x8xf32>
      %156 = vector.broadcast %7 : vector<1x8xf32> to vector<256x8xf32>
      %157 = arith.addf %155, %156 : vector<256x8xf32>
      %cst_179 = arith.constant 0.000000e+00 : f32
      %158 = vector.broadcast %cst_179 : f32 to vector<256x8xf32>
      %159 = arith.maximumf %157, %158 : vector<256x8xf32>
      %160 = arith.index_cast %150 : i32 to index
      %c0_180 = arith.constant 0 : index
      %161 = vector.load %arg9[%160, %c0_180] : memref<2088x8xf32, #tpu.memory_space<vmem>>, vector<256x8xf32>
      tpu.vector_store %arg9[%160, %c0_180], %159 {strides = array<i32>} : memref<2088x8xf32, #tpu.memory_space<vmem>>, vector<256x8xf32>,
    }
    %c8_i32_7 = arith.constant 8 : i32
    %c0_i32_8 = arith.constant 0 : i32
    %c32_i32 = arith.constant 32 : i32
    %9 = arith.addi %c0_i32_8, %c32_i32 : i32
    %c1_i32_9 = arith.constant 1 : i32
    scf.for %arg13 = %c0_i32_8 to %9 step %c1_i32_9  : i32 {
      %c64_i32 = arith.constant 64 : i32
      %149 = arith.muli %arg13, %c64_i32 : i32
      %150 = arith.index_cast %149 : i32 to index
      %c0_175 = arith.constant 0 : index
      %151 = vector.load %arg9[%150, %c0_175] : memref<2088x8xf32, #tpu.memory_space<vmem>>, vector<64x8xf32>
      %c1_i32_176 = arith.constant 1 : i32
      %152 = arith.addi %149, %c1_i32_176 : i32
      %153 = arith.index_cast %152 : i32 to index
      %c0_177 = arith.constant 0 : index
      %154 = vector.load %arg9[%153, %c0_177] : memref<2088x8xf32, #tpu.memory_space<vmem>>, vector<64x8xf32>
      %155 = arith.maximumf %151, %154 : vector<64x8xf32>
      %c32_i32_178 = arith.constant 32 : i32
      %156 = arith.addi %149, %c32_i32_178 : i32
      %157 = arith.index_cast %156 : i32 to index
      %c0_179 = arith.constant 0 : index
      %158 = vector.load %arg9[%157, %c0_179] : memref<2088x8xf32, #tpu.memory_space<vmem>>, vector<64x8xf32>
      %159 = arith.maximumf %155, %158 : vector<64x8xf32>
      %c32_i32_180 = arith.constant 32 : i32
      %160 = arith.addi %149, %c32_i32_180 : i32
      %c1_i32_181 = arith.constant 1 : i32
      %161 = arith.addi %160, %c1_i32_181 : i32
      %162 = arith.index_cast %161 : i32 to index
      %c0_182 = arith.constant 0 : index
      %163 = vector.load %arg9[%162, %c0_182] : memref<2088x8xf32, #tpu.memory_space<vmem>>, vector<64x8xf32>
      %164 = arith.maximumf %159, %163 : vector<64x8xf32>
      %165 = arith.index_cast %149 : i32 to index
      %c0_183 = arith.constant 0 : index
      %166 = vector.load %arg9[%165, %c0_183] : memref<2088x8xf32, #tpu.memory_space<vmem>>, vector<64x8xf32>
      tpu.vector_store %arg9[%165, %c0_183], %164 {strides = array<i32>} : memref<2088x8xf32, #tpu.memory_space<vmem>>, vector<64x8xf32>,
    }
    %c32_i32_10 = arith.constant 32 : i32
    %c0_11 = arith.constant 0 : index
    %c0_12 = arith.constant 0 : index
    %10 = tpu.strided_load %arg9[%c0_11, %c0_12] {strides = array<i32: 2, 1>} : memref<2088x8xf32, #tpu.memory_space<vmem>>, vector<16x8xf32>
    %c0_13 = arith.constant 0 : index
    %c0_14 = arith.constant 0 : index
    %11 = vector.load %arg10[%c0_13, %c0_14] : memref<584x8xf32, #tpu.memory_space<vmem>>, vector<16x8xf32>
    tpu.vector_store %arg10[%c0_13, %c0_14], %10 {strides = array<i32>} : memref<584x8xf32, #tpu.memory_space<vmem>>, vector<16x8xf32>,
    %c64 = arith.constant 64 : index
    %c0_15 = arith.constant 0 : index
    %12 = tpu.strided_load %arg9[%c64, %c0_15] {strides = array<i32: 2, 1>} : memref<2088x8xf32, #tpu.memory_space<vmem>>, vector<16x8xf32>
    %c16 = arith.constant 16 : index
    %c0_16 = arith.constant 0 : index
    %13 = vector.load %arg10[%c16, %c0_16] : memref<584x8xf32, #tpu.memory_space<vmem>>, vector<16x8xf32>
    tpu.vector_store %arg10[%c16, %c0_16], %12 {strides = array<i32>} : memref<584x8xf32, #tpu.memory_space<vmem>>, vector<16x8xf32>,
    %c128 = arith.constant 128 : index
    %c0_17 = arith.constant 0 : index
    %14 = tpu.strided_load %arg9[%c128, %c0_17] {strides = array<i32: 2, 1>} : memref<2088x8xf32, #tpu.memory_space<vmem>>, vector<16x8xf32>
    %c32 = arith.constant 32 : index
    %c0_18 = arith.constant 0 : index
    %15 = vector.load %arg10[%c32, %c0_18] : memref<584x8xf32, #tpu.memory_space<vmem>>, vector<16x8xf32>
    tpu.vector_store %arg10[%c32, %c0_18], %14 {strides = array<i32>} : memref<584x8xf32, #tpu.memory_space<vmem>>, vector<16x8xf32>,
    %c192 = arith.constant 192 : index
    %c0_19 = arith.constant 0 : index
    %16 = tpu.strided_load %arg9[%c192, %c0_19] {strides = array<i32: 2, 1>} : memref<2088x8xf32, #tpu.memory_space<vmem>>, vector<16x8xf32>
    %c48 = arith.constant 48 : index
    %c0_20 = arith.constant 0 : index
    %17 = vector.load %arg10[%c48, %c0_20] : memref<584x8xf32, #tpu.memory_space<vmem>>, vector<16x8xf32>
    tpu.vector_store %arg10[%c48, %c0_20], %16 {strides = array<i32>} : memref<584x8xf32, #tpu.memory_space<vmem>>, vector<16x8xf32>,
    %c256 = arith.constant 256 : index
    %c0_21 = arith.constant 0 : index
    %18 = tpu.strided_load %arg9[%c256, %c0_21] {strides = array<i32: 2, 1>} : memref<2088x8xf32, #tpu.memory_space<vmem>>, vector<16x8xf32>
    %c64_22 = arith.constant 64 : index
    %c0_23 = arith.constant 0 : index
    %19 = vector.load %arg10[%c64_22, %c0_23] : memref<584x8xf32, #tpu.memory_space<vmem>>, vector<16x8xf32>
    tpu.vector_store %arg10[%c64_22, %c0_23], %18 {strides = array<i32>} : memref<584x8xf32, #tpu.memory_space<vmem>>, vector<16x8xf32>,
    %c320 = arith.constant 320 : index
    %c0_24 = arith.constant 0 : index
    %20 = tpu.strided_load %arg9[%c320, %c0_24] {strides = array<i32: 2, 1>} : memref<2088x8xf32, #tpu.memory_space<vmem>>, vector<16x8xf32>
    %c80 = arith.constant 80 : index
    %c0_25 = arith.constant 0 : index
    %21 = vector.load %arg10[%c80, %c0_25] : memref<584x8xf32, #tpu.memory_space<vmem>>, vector<16x8xf32>
    tpu.vector_store %arg10[%c80, %c0_25], %20 {strides = array<i32>} : memref<584x8xf32, #tpu.memory_space<vmem>>, vector<16x8xf32>,
    %c384 = arith.constant 384 : index
    %c0_26 = arith.constant 0 : index
    %22 = tpu.strided_load %arg9[%c384, %c0_26] {strides = array<i32: 2, 1>} : memref<2088x8xf32, #tpu.memory_space<vmem>>, vector<16x8xf32>
    %c96 = arith.constant 96 : index
    %c0_27 = arith.constant 0 : index
    %23 = vector.load %arg10[%c96, %c0_27] : memref<584x8xf32, #tpu.memory_space<vmem>>, vector<16x8xf32>
    tpu.vector_store %arg10[%c96, %c0_27], %22 {strides = array<i32>} : memref<584x8xf32, #tpu.memory_space<vmem>>, vector<16x8xf32>,
    %c448 = arith.constant 448 : index
    %c0_28 = arith.constant 0 : index
    %24 = tpu.strided_load %arg9[%c448, %c0_28] {strides = array<i32: 2, 1>} : memref<2088x8xf32, #tpu.memory_space<vmem>>, vector<16x8xf32>
    %c112 = arith.constant 112 : index
    %c0_29 = arith.constant 0 : index
    %25 = vector.load %arg10[%c112, %c0_29] : memref<584x8xf32, #tpu.memory_space<vmem>>, vector<16x8xf32>
    tpu.vector_store %arg10[%c112, %c0_29], %24 {strides = array<i32>} : memref<584x8xf32, #tpu.memory_space<vmem>>, vector<16x8xf32>,
    %c512_30 = arith.constant 512 : index
    %c0_31 = arith.constant 0 : index
    %26 = tpu.strided_load %arg9[%c512_30, %c0_31] {strides = array<i32: 2, 1>} : memref<2088x8xf32, #tpu.memory_space<vmem>>, vector<16x8xf32>
    %c128_32 = arith.constant 128 : index
    %c0_33 = arith.constant 0 : index
    %27 = vector.load %arg10[%c128_32, %c0_33] : memref<584x8xf32, #tpu.memory_space<vmem>>, vector<16x8xf32>
    tpu.vector_store %arg10[%c128_32, %c0_33], %26 {strides = array<i32>} : memref<584x8xf32, #tpu.memory_space<vmem>>, vector<16x8xf32>,
    %c576 = arith.constant 576 : index
    %c0_34 = arith.constant 0 : index
    %28 = tpu.strided_load %arg9[%c576, %c0_34] {strides = array<i32: 2, 1>} : memref<2088x8xf32, #tpu.memory_space<vmem>>, vector<16x8xf32>
    %c144 = arith.constant 144 : index
    %c0_35 = arith.constant 0 : index
    %29 = vector.load %arg10[%c144, %c0_35] : memref<584x8xf32, #tpu.memory_space<vmem>>, vector<16x8xf32>
    tpu.vector_store %arg10[%c144, %c0_35], %28 {strides = array<i32>} : memref<584x8xf32, #tpu.memory_space<vmem>>, vector<16x8xf32>,
    %c640 = arith.constant 640 : index
    %c0_36 = arith.constant 0 : index
    %30 = tpu.strided_load %arg9[%c640, %c0_36] {strides = array<i32: 2, 1>} : memref<2088x8xf32, #tpu.memory_space<vmem>>, vector<16x8xf32>
    %c160 = arith.constant 160 : index
    %c0_37 = arith.constant 0 : index
    %31 = vector.load %arg10[%c160, %c0_37] : memref<584x8xf32, #tpu.memory_space<vmem>>, vector<16x8xf32>
    tpu.vector_store %arg10[%c160, %c0_37], %30 {strides = array<i32>} : memref<584x8xf32, #tpu.memory_space<vmem>>, vector<16x8xf32>,
    %c704 = arith.constant 704 : index
    %c0_38 = arith.constant 0 : index
    %32 = tpu.strided_load %arg9[%c704, %c0_38] {strides = array<i32: 2, 1>} : memref<2088x8xf32, #tpu.memory_space<vmem>>, vector<16x8xf32>
    %c176 = arith.constant 176 : index
    %c0_39 = arith.constant 0 : index
    %33 = vector.load %arg10[%c176, %c0_39] : memref<584x8xf32, #tpu.memory_space<vmem>>, vector<16x8xf32>
    tpu.vector_store %arg10[%c176, %c0_39], %32 {strides = array<i32>} : memref<584x8xf32, #tpu.memory_space<vmem>>, vector<16x8xf32>,
    %c768 = arith.constant 768 : index
    %c0_40 = arith.constant 0 : index
    %34 = tpu.strided_load %arg9[%c768, %c0_40] {strides = array<i32: 2, 1>} : memref<2088x8xf32, #tpu.memory_space<vmem>>, vector<16x8xf32>
    %c192_41 = arith.constant 192 : index
    %c0_42 = arith.constant 0 : index
    %35 = vector.load %arg10[%c192_41, %c0_42] : memref<584x8xf32, #tpu.memory_space<vmem>>, vector<16x8xf32>
    tpu.vector_store %arg10[%c192_41, %c0_42], %34 {strides = array<i32>} : memref<584x8xf32, #tpu.memory_space<vmem>>, vector<16x8xf32>,
    %c832 = arith.constant 832 : index
    %c0_43 = arith.constant 0 : index
    %36 = tpu.strided_load %arg9[%c832, %c0_43] {strides = array<i32: 2, 1>} : memref<2088x8xf32, #tpu.memory_space<vmem>>, vector<16x8xf32>
    %c208 = arith.constant 208 : index
    %c0_44 = arith.constant 0 : index
    %37 = vector.load %arg10[%c208, %c0_44] : memref<584x8xf32, #tpu.memory_space<vmem>>, vector<16x8xf32>
    tpu.vector_store %arg10[%c208, %c0_44], %36 {strides = array<i32>} : memref<584x8xf32, #tpu.memory_space<vmem>>, vector<16x8xf32>,
    %c896 = arith.constant 896 : index
    %c0_45 = arith.constant 0 : index
    %38 = tpu.strided_load %arg9[%c896, %c0_45] {strides = array<i32: 2, 1>} : memref<2088x8xf32, #tpu.memory_space<vmem>>, vector<16x8xf32>
    %c224 = arith.constant 224 : index
    %c0_46 = arith.constant 0 : index
    %39 = vector.load %arg10[%c224, %c0_46] : memref<584x8xf32, #tpu.memory_space<vmem>>, vector<16x8xf32>
    tpu.vector_store %arg10[%c224, %c0_46], %38 {strides = array<i32>} : memref<584x8xf32, #tpu.memory_space<vmem>>, vector<16x8xf32>,
    %c960 = arith.constant 960 : index
    %c0_47 = arith.constant 0 : index
    %40 = tpu.strided_load %arg9[%c960, %c0_47] {strides = array<i32: 2, 1>} : memref<2088x8xf32, #tpu.memory_space<vmem>>, vector<16x8xf32>
    %c240 = arith.constant 240 : index
    %c0_48 = arith.constant 0 : index
    %41 = vector.load %arg10[%c240, %c0_48] : memref<584x8xf32, #tpu.memory_space<vmem>>, vector<16x8xf32>
    tpu.vector_store %arg10[%c240, %c0_48], %40 {strides = array<i32>} : memref<584x8xf32, #tpu.memory_space<vmem>>, vector<16x8xf32>,
    %c1024 = arith.constant 1024 : index
    %c0_49 = arith.constant 0 : index
    %42 = tpu.strided_load %arg9[%c1024, %c0_49] {strides = array<i32: 2, 1>} : memref<2088x8xf32, #tpu.memory_space<vmem>>, vector<16x8xf32>
    %c256_50 = arith.constant 256 : index
    %c0_51 = arith.constant 0 : index
    %43 = vector.load %arg10[%c256_50, %c0_51] : memref<584x8xf32, #tpu.memory_space<vmem>>, vector<16x8xf32>
    tpu.vector_store %arg10[%c256_50, %c0_51], %42 {strides = array<i32>} : memref<584x8xf32, #tpu.memory_space<vmem>>, vector<16x8xf32>,
    %c1088 = arith.constant 1088 : index
    %c0_52 = arith.constant 0 : index
    %44 = tpu.strided_load %arg9[%c1088, %c0_52] {strides = array<i32: 2, 1>} : memref<2088x8xf32, #tpu.memory_space<vmem>>, vector<16x8xf32>
    %c272 = arith.constant 272 : index
    %c0_53 = arith.constant 0 : index
    %45 = vector.load %arg10[%c272, %c0_53] : memref<584x8xf32, #tpu.memory_space<vmem>>, vector<16x8xf32>
    tpu.vector_store %arg10[%c272, %c0_53], %44 {strides = array<i32>} : memref<584x8xf32, #tpu.memory_space<vmem>>, vector<16x8xf32>,
    %c1152 = arith.constant 1152 : index
    %c0_54 = arith.constant 0 : index
    %46 = tpu.strided_load %arg9[%c1152, %c0_54] {strides = array<i32: 2, 1>} : memref<2088x8xf32, #tpu.memory_space<vmem>>, vector<16x8xf32>
    %c288 = arith.constant 288 : index
    %c0_55 = arith.constant 0 : index
    %47 = vector.load %arg10[%c288, %c0_55] : memref<584x8xf32, #tpu.memory_space<vmem>>, vector<16x8xf32>
    tpu.vector_store %arg10[%c288, %c0_55], %46 {strides = array<i32>} : memref<584x8xf32, #tpu.memory_space<vmem>>, vector<16x8xf32>,
    %c1216 = arith.constant 1216 : index
    %c0_56 = arith.constant 0 : index
    %48 = tpu.strided_load %arg9[%c1216, %c0_56] {strides = array<i32: 2, 1>} : memref<2088x8xf32, #tpu.memory_space<vmem>>, vector<16x8xf32>
    %c304 = arith.constant 304 : index
    %c0_57 = arith.constant 0 : index
    %49 = vector.load %arg10[%c304, %c0_57] : memref<584x8xf32, #tpu.memory_space<vmem>>, vector<16x8xf32>
    tpu.vector_store %arg10[%c304, %c0_57], %48 {strides = array<i32>} : memref<584x8xf32, #tpu.memory_space<vmem>>, vector<16x8xf32>,
    %c1280 = arith.constant 1280 : index
    %c0_58 = arith.constant 0 : index
    %50 = tpu.strided_load %arg9[%c1280, %c0_58] {strides = array<i32: 2, 1>} : memref<2088x8xf32, #tpu.memory_space<vmem>>, vector<16x8xf32>
    %c320_59 = arith.constant 320 : index
    %c0_60 = arith.constant 0 : index
    %51 = vector.load %arg10[%c320_59, %c0_60] : memref<584x8xf32, #tpu.memory_space<vmem>>, vector<16x8xf32>
    tpu.vector_store %arg10[%c320_59, %c0_60], %50 {strides = array<i32>} : memref<584x8xf32, #tpu.memory_space<vmem>>, vector<16x8xf32>,
    %c1344 = arith.constant 1344 : index
    %c0_61 = arith.constant 0 : index
    %52 = tpu.strided_load %arg9[%c1344, %c0_61] {strides = array<i32: 2, 1>} : memref<2088x8xf32, #tpu.memory_space<vmem>>, vector<16x8xf32>
    %c336 = arith.constant 336 : index
    %c0_62 = arith.constant 0 : index
    %53 = vector.load %arg10[%c336, %c0_62] : memref<584x8xf32, #tpu.memory_space<vmem>>, vector<16x8xf32>
    tpu.vector_store %arg10[%c336, %c0_62], %52 {strides = array<i32>} : memref<584x8xf32, #tpu.memory_space<vmem>>, vector<16x8xf32>,
    %c1408 = arith.constant 1408 : index
    %c0_63 = arith.constant 0 : index
    %54 = tpu.strided_load %arg9[%c1408, %c0_63] {strides = array<i32: 2, 1>} : memref<2088x8xf32, #tpu.memory_space<vmem>>, vector<16x8xf32>
    %c352 = arith.constant 352 : index
    %c0_64 = arith.constant 0 : index
    %55 = vector.load %arg10[%c352, %c0_64] : memref<584x8xf32, #tpu.memory_space<vmem>>, vector<16x8xf32>
    tpu.vector_store %arg10[%c352, %c0_64], %54 {strides = array<i32>} : memref<584x8xf32, #tpu.memory_space<vmem>>, vector<16x8xf32>,
    %c1472 = arith.constant 1472 : index
    %c0_65 = arith.constant 0 : index
    %56 = tpu.strided_load %arg9[%c1472, %c0_65] {strides = array<i32: 2, 1>} : memref<2088x8xf32, #tpu.memory_space<vmem>>, vector<16x8xf32>
    %c368 = arith.constant 368 : index
    %c0_66 = arith.constant 0 : index
    %57 = vector.load %arg10[%c368, %c0_66] : memref<584x8xf32, #tpu.memory_space<vmem>>, vector<16x8xf32>
    tpu.vector_store %arg10[%c368, %c0_66], %56 {strides = array<i32>} : memref<584x8xf32, #tpu.memory_space<vmem>>, vector<16x8xf32>,
    %c1536 = arith.constant 1536 : index
    %c0_67 = arith.constant 0 : index
    %58 = tpu.strided_load %arg9[%c1536, %c0_67] {strides = array<i32: 2, 1>} : memref<2088x8xf32, #tpu.memory_space<vmem>>, vector<16x8xf32>
    %c384_68 = arith.constant 384 : index
    %c0_69 = arith.constant 0 : index
    %59 = vector.load %arg10[%c384_68, %c0_69] : memref<584x8xf32, #tpu.memory_space<vmem>>, vector<16x8xf32>
    tpu.vector_store %arg10[%c384_68, %c0_69], %58 {strides = array<i32>} : memref<584x8xf32, #tpu.memory_space<vmem>>, vector<16x8xf32>,
    %c1600 = arith.constant 1600 : index
    %c0_70 = arith.constant 0 : index
    %60 = tpu.strided_load %arg9[%c1600, %c0_70] {strides = array<i32: 2, 1>} : memref<2088x8xf32, #tpu.memory_space<vmem>>, vector<16x8xf32>
    %c400 = arith.constant 400 : index
    %c0_71 = arith.constant 0 : index
    %61 = vector.load %arg10[%c400, %c0_71] : memref<584x8xf32, #tpu.memory_space<vmem>>, vector<16x8xf32>
    tpu.vector_store %arg10[%c400, %c0_71], %60 {strides = array<i32>} : memref<584x8xf32, #tpu.memory_space<vmem>>, vector<16x8xf32>,
    %c1664 = arith.constant 1664 : index
    %c0_72 = arith.constant 0 : index
    %62 = tpu.strided_load %arg9[%c1664, %c0_72] {strides = array<i32: 2, 1>} : memref<2088x8xf32, #tpu.memory_space<vmem>>, vector<16x8xf32>
    %c416 = arith.constant 416 : index
    %c0_73 = arith.constant 0 : index
    %63 = vector.load %arg10[%c416, %c0_73] : memref<584x8xf32, #tpu.memory_space<vmem>>, vector<16x8xf32>
    tpu.vector_store %arg10[%c416, %c0_73], %62 {strides = array<i32>} : memref<584x8xf32, #tpu.memory_space<vmem>>, vector<16x8xf32>,
    %c1728 = arith.constant 1728 : index
    %c0_74 = arith.constant 0 : index
    %64 = tpu.strided_load %arg9[%c1728, %c0_74] {strides = array<i32: 2, 1>} : memref<2088x8xf32, #tpu.memory_space<vmem>>, vector<16x8xf32>
    %c432 = arith.constant 432 : index
    %c0_75 = arith.constant 0 : index
    %65 = vector.load %arg10[%c432, %c0_75] : memref<584x8xf32, #tpu.memory_space<vmem>>, vector<16x8xf32>
    tpu.vector_store %arg10[%c432, %c0_75], %64 {strides = array<i32>} : memref<584x8xf32, #tpu.memory_space<vmem>>, vector<16x8xf32>,
    %c1792 = arith.constant 1792 : index
    %c0_76 = arith.constant 0 : index
    %66 = tpu.strided_load %arg9[%c1792, %c0_76] {strides = array<i32: 2, 1>} : memref<2088x8xf32, #tpu.memory_space<vmem>>, vector<16x8xf32>
    %c448_77 = arith.constant 448 : index
    %c0_78 = arith.constant 0 : index
    %67 = vector.load %arg10[%c448_77, %c0_78] : memref<584x8xf32, #tpu.memory_space<vmem>>, vector<16x8xf32>
    tpu.vector_store %arg10[%c448_77, %c0_78], %66 {strides = array<i32>} : memref<584x8xf32, #tpu.memory_space<vmem>>, vector<16x8xf32>,
    %c1856 = arith.constant 1856 : index
    %c0_79 = arith.constant 0 : index
    %68 = tpu.strided_load %arg9[%c1856, %c0_79] {strides = array<i32: 2, 1>} : memref<2088x8xf32, #tpu.memory_space<vmem>>, vector<16x8xf32>
    %c464 = arith.constant 464 : index
    %c0_80 = arith.constant 0 : index
    %69 = vector.load %arg10[%c464, %c0_80] : memref<584x8xf32, #tpu.memory_space<vmem>>, vector<16x8xf32>
    tpu.vector_store %arg10[%c464, %c0_80], %68 {strides = array<i32>} : memref<584x8xf32, #tpu.memory_space<vmem>>, vector<16x8xf32>,
    %c1920 = arith.constant 1920 : index
    %c0_81 = arith.constant 0 : index
    %70 = tpu.strided_load %arg9[%c1920, %c0_81] {strides = array<i32: 2, 1>} : memref<2088x8xf32, #tpu.memory_space<vmem>>, vector<16x8xf32>
    %c480 = arith.constant 480 : index
    %c0_82 = arith.constant 0 : index
    %71 = vector.load %arg10[%c480, %c0_82] : memref<584x8xf32, #tpu.memory_space<vmem>>, vector<16x8xf32>
    tpu.vector_store %arg10[%c480, %c0_82], %70 {strides = array<i32>} : memref<584x8xf32, #tpu.memory_space<vmem>>, vector<16x8xf32>,
    %c1984 = arith.constant 1984 : index
    %c0_83 = arith.constant 0 : index
    %72 = tpu.strided_load %arg9[%c1984, %c0_83] {strides = array<i32: 2, 1>} : memref<2088x8xf32, #tpu.memory_space<vmem>>, vector<16x8xf32>
    %c496 = arith.constant 496 : index
    %c0_84 = arith.constant 0 : index
    %73 = vector.load %arg10[%c496, %c0_84] : memref<584x8xf32, #tpu.memory_space<vmem>>, vector<16x8xf32>
    tpu.vector_store %arg10[%c496, %c0_84], %72 {strides = array<i32>} : memref<584x8xf32, #tpu.memory_space<vmem>>, vector<16x8xf32>,
    %c1 = arith.constant 1 : index
    %c0_85 = arith.constant 0 : index
    %74 = vector.load %arg7[%c1, %c0_85] : memref<8x128xf32, #tpu.memory_space<vmem>>, vector<1x128xf32>
    %75 = vector.extract_strided_slice %74 {offsets = [0, 0], sizes = [1, 16], strides = [1, 1]} : vector<1x128xf32> to vector<1x16xf32>
    %c0_i32_86 = arith.constant 0 : i32
    %c4_i32 = arith.constant 4 : i32
    %76 = arith.addi %c0_i32_86, %c4_i32 : i32
    %c1_i32_87 = arith.constant 1 : i32
    scf.for %arg13 = %c0_i32_86 to %76 step %c1_i32_87  : i32 {
      %c128_i32 = arith.constant 128 : i32
      %149 = arith.muli %arg13, %c128_i32 : i32
      %150 = tpu.assume_multiple %149, 128 : i32
      %c0_i32_175 = arith.constant 0 : i32
      %151 = arith.addi %150, %c0_i32_175 : i32
      %152 = arith.index_cast %151 : i32 to index
      %c0_176 = arith.constant 0 : index
      %153 = vector.load %arg10[%152, %c0_176] : memref<584x8xf32, #tpu.memory_space<vmem>>, vector<128x8xf32>
      %c1_i32_177 = arith.constant 1 : i32
      %154 = arith.addi %150, %c1_i32_177 : i32
      %155 = arith.index_cast %154 : i32 to index
      %c0_178 = arith.constant 0 : index
      %156 = vector.load %arg10[%155, %c0_178] : memref<584x8xf32, #tpu.memory_space<vmem>>, vector<128x8xf32>
      %c2_i32 = arith.constant 2 : i32
      %157 = arith.addi %150, %c2_i32 : i32
      %158 = arith.index_cast %157 : i32 to index
      %c0_179 = arith.constant 0 : index
      %159 = vector.load %arg10[%158, %c0_179] : memref<584x8xf32, #tpu.memory_space<vmem>>, vector<128x8xf32>
      %c3_i32 = arith.constant 3 : i32
      %160 = arith.addi %150, %c3_i32 : i32
      %161 = arith.index_cast %160 : i32 to index
      %c0_180 = arith.constant 0 : index
      %162 = vector.load %arg10[%161, %c0_180] : memref<584x8xf32, #tpu.memory_space<vmem>>, vector<128x8xf32>
      %c4_i32_181 = arith.constant 4 : i32
      %163 = arith.addi %150, %c4_i32_181 : i32
      %164 = arith.index_cast %163 : i32 to index
      %c0_182 = arith.constant 0 : index
      %165 = vector.load %arg10[%164, %c0_182] : memref<584x8xf32, #tpu.memory_space<vmem>>, vector<128x8xf32>
      %c16_i32 = arith.constant 16 : i32
      %166 = arith.addi %150, %c16_i32 : i32
      %167 = arith.index_cast %166 : i32 to index
      %c0_183 = arith.constant 0 : index
      %168 = vector.load %arg10[%167, %c0_183] : memref<584x8xf32, #tpu.memory_space<vmem>>, vector<128x8xf32>
      %c17_i32 = arith.constant 17 : i32
      %169 = arith.addi %150, %c17_i32 : i32
      %170 = arith.index_cast %169 : i32 to index
      %c0_184 = arith.constant 0 : index
      %171 = vector.load %arg10[%170, %c0_184] : memref<584x8xf32, #tpu.memory_space<vmem>>, vector<128x8xf32>
      %c18_i32 = arith.constant 18 : i32
      %172 = arith.addi %150, %c18_i32 : i32
      %173 = arith.index_cast %172 : i32 to index
      %c0_185 = arith.constant 0 : index
      %174 = vector.load %arg10[%173, %c0_185] : memref<584x8xf32, #tpu.memory_space<vmem>>, vector<128x8xf32>
      %c19_i32 = arith.constant 19 : i32
      %175 = arith.addi %150, %c19_i32 : i32
      %176 = arith.index_cast %175 : i32 to index
      %c0_186 = arith.constant 0 : index
      %177 = vector.load %arg10[%176, %c0_186] : memref<584x8xf32, #tpu.memory_space<vmem>>, vector<128x8xf32>
      %c20_i32 = arith.constant 20 : i32
      %178 = arith.addi %150, %c20_i32 : i32
      %179 = arith.index_cast %178 : i32 to index
      %c0_187 = arith.constant 0 : index
      %180 = vector.load %arg10[%179, %c0_187] : memref<584x8xf32, #tpu.memory_space<vmem>>, vector<128x8xf32>
      %c32_i32_188 = arith.constant 32 : i32
      %181 = arith.addi %150, %c32_i32_188 : i32
      %182 = arith.index_cast %181 : i32 to index
      %c0_189 = arith.constant 0 : index
      %183 = vector.load %arg10[%182, %c0_189] : memref<584x8xf32, #tpu.memory_space<vmem>>, vector<128x8xf32>
      %c33_i32 = arith.constant 33 : i32
      %184 = arith.addi %150, %c33_i32 : i32
      %185 = arith.index_cast %184 : i32 to index
      %c0_190 = arith.constant 0 : index
      %186 = vector.load %arg10[%185, %c0_190] : memref<584x8xf32, #tpu.memory_space<vmem>>, vector<128x8xf32>
      %c34_i32 = arith.constant 34 : i32
      %187 = arith.addi %150, %c34_i32 : i32
      %188 = arith.index_cast %187 : i32 to index
      %c0_191 = arith.constant 0 : index
      %189 = vector.load %arg10[%188, %c0_191] : memref<584x8xf32, #tpu.memory_space<vmem>>, vector<128x8xf32>
      %c35_i32 = arith.constant 35 : i32
      %190 = arith.addi %150, %c35_i32 : i32
      %191 = arith.index_cast %190 : i32 to index
      %c0_192 = arith.constant 0 : index
      %192 = vector.load %arg10[%191, %c0_192] : memref<584x8xf32, #tpu.memory_space<vmem>>, vector<128x8xf32>
      %c36_i32 = arith.constant 36 : i32
      %193 = arith.addi %150, %c36_i32 : i32
      %194 = arith.index_cast %193 : i32 to index
      %c0_193 = arith.constant 0 : index
      %195 = vector.load %arg10[%194, %c0_193] : memref<584x8xf32, #tpu.memory_space<vmem>>, vector<128x8xf32>
      %c48_i32 = arith.constant 48 : i32
      %196 = arith.addi %150, %c48_i32 : i32
      %197 = arith.index_cast %196 : i32 to index
      %c0_194 = arith.constant 0 : index
      %198 = vector.load %arg10[%197, %c0_194] : memref<584x8xf32, #tpu.memory_space<vmem>>, vector<128x8xf32>
      %c49_i32 = arith.constant 49 : i32
      %199 = arith.addi %150, %c49_i32 : i32
      %200 = arith.index_cast %199 : i32 to index
      %c0_195 = arith.constant 0 : index
      %201 = vector.load %arg10[%200, %c0_195] : memref<584x8xf32, #tpu.memory_space<vmem>>, vector<128x8xf32>
      %c50_i32 = arith.constant 50 : i32
      %202 = arith.addi %150, %c50_i32 : i32
      %203 = arith.index_cast %202 : i32 to index
      %c0_196 = arith.constant 0 : index
      %204 = vector.load %arg10[%203, %c0_196] : memref<584x8xf32, #tpu.memory_space<vmem>>, vector<128x8xf32>
      %c51_i32 = arith.constant 51 : i32
      %205 = arith.addi %150, %c51_i32 : i32
      %206 = arith.index_cast %205 : i32 to index
      %c0_197 = arith.constant 0 : index
      %207 = vector.load %arg10[%206, %c0_197] : memref<584x8xf32, #tpu.memory_space<vmem>>, vector<128x8xf32>
      %c52_i32 = arith.constant 52 : i32
      %208 = arith.addi %150, %c52_i32 : i32
      %209 = arith.index_cast %208 : i32 to index
      %c0_198 = arith.constant 0 : index
      %210 = vector.load %arg10[%209, %c0_198] : memref<584x8xf32, #tpu.memory_space<vmem>>, vector<128x8xf32>
      %c64_i32 = arith.constant 64 : i32
      %211 = arith.addi %150, %c64_i32 : i32
      %212 = arith.index_cast %211 : i32 to index
      %c0_199 = arith.constant 0 : index
      %213 = vector.load %arg10[%212, %c0_199] : memref<584x8xf32, #tpu.memory_space<vmem>>, vector<128x8xf32>
      %c65_i32 = arith.constant 65 : i32
      %214 = arith.addi %150, %c65_i32 : i32
      %215 = arith.index_cast %214 : i32 to index
      %c0_200 = arith.constant 0 : index
      %216 = vector.load %arg10[%215, %c0_200] : memref<584x8xf32, #tpu.memory_space<vmem>>, vector<128x8xf32>
      %c66_i32 = arith.constant 66 : i32
      %217 = arith.addi %150, %c66_i32 : i32
      %218 = arith.index_cast %217 : i32 to index
      %c0_201 = arith.constant 0 : index
      %219 = vector.load %arg10[%218, %c0_201] : memref<584x8xf32, #tpu.memory_space<vmem>>, vector<128x8xf32>
      %c67_i32 = arith.constant 67 : i32
      %220 = arith.addi %150, %c67_i32 : i32
      %221 = arith.index_cast %220 : i32 to index
      %c0_202 = arith.constant 0 : index
      %222 = vector.load %arg10[%221, %c0_202] : memref<584x8xf32, #tpu.memory_space<vmem>>, vector<128x8xf32>
      %c68_i32 = arith.constant 68 : i32
      %223 = arith.addi %150, %c68_i32 : i32
      %224 = arith.index_cast %223 : i32 to index
      %c0_203 = arith.constant 0 : index
      %225 = vector.load %arg10[%224, %c0_203] : memref<584x8xf32, #tpu.memory_space<vmem>>, vector<128x8xf32>
      %226 = tpu.concatenate %153, %156, %159, %162, %165, %168, %171, %174, %177, %180, %183, %186, %189, %192, %195, %198 in 1 : vector<128x8xf32>, vector<128x8xf32>, vector<128x8xf32>, vector<128x8xf32>, vector<128x8xf32>, vector<128x8xf32>, vector<128x8xf32>, vector<128x8xf32>, vector<128x8xf32>, vector<128x8xf32>, vector<128x8xf32>, vector<128x8xf32>, vector<128x8xf32>, vector<128x8xf32>, vector<128x8xf32>, vector<128x8xf32> -> vector<128x128xf32>
      %227 = tpu.concatenate %201, %204, %207, %210, %213, %216, %219, %222, %225 in 1 : vector<128x8xf32>, vector<128x8xf32>, vector<128x8xf32>, vector<128x8xf32>, vector<128x8xf32>, vector<128x8xf32>, vector<128x8xf32>, vector<128x8xf32>, vector<128x8xf32> -> vector<128x72xf32>
      %228 = tpu.concatenate %226, %227 in 1 : vector<128x128xf32>, vector<128x72xf32> -> vector<128x200xf32>
      %229 = arith.truncf %228 : vector<128x200xf32> to vector<128x200xbf16>
      %c0_204 = arith.constant 0 : index
      %c0_205 = arith.constant 0 : index
      %230 = vector.load %arg3[%c0_204, %c0_205] : memref<200x128xbf16, #tpu.memory_space<vmem>>, vector<200x128xbf16>
      %cst_206 = arith.constant dense<0.000000e+00> : vector<128x128xf32>
      %231 = tpu.matmul %229, %230, %cst_206 {dimension_numbers = #tpu.dot_dimension_numbers<[1], [0], [0], [1], [0, 0, 1, 1], [], []>} : vector<128x200xbf16>, vector<200x128xbf16>, vector<128x128xf32> -> vector<128x128xf32>
      %232 = vector.extract_strided_slice %231 {offsets = [0, 0], sizes = [128, 16], strides = [1, 1]} : vector<128x128xf32> to vector<128x16xf32>
      %233 = vector.broadcast %75 : vector<1x16xf32> to vector<128x16xf32>
      %234 = arith.addf %232, %233 : vector<128x16xf32>
      %cst_207 = arith.constant 0.000000e+00 : f32
      %235 = vector.broadcast %cst_207 : f32 to vector<128x16xf32>
      %236 = arith.maximumf %234, %235 : vector<128x16xf32>
      %237 = arith.index_cast %150 : i32 to index
      %c0_208 = arith.constant 0 : index
      %238 = vector.load %arg11[%237, %c0_208] : memref<536x16xf32, #tpu.memory_space<vmem>>, vector<128x16xf32>
      tpu.vector_store %arg11[%237, %c0_208], %236 {strides = array<i32>} : memref<536x16xf32, #tpu.memory_space<vmem>>, vector<128x16xf32>,
    }
    %c4_i32_88 = arith.constant 4 : i32
    %c0_i32_89 = arith.constant 0 : i32
    %c8_i32_90 = arith.constant 8 : i32
    %77 = arith.addi %c0_i32_89, %c8_i32_90 : i32
    %c1_i32_91 = arith.constant 1 : i32
    scf.for %arg13 = %c0_i32_89 to %77 step %c1_i32_91  : i32 {
      %c64_i32 = arith.constant 64 : i32
      %149 = arith.muli %arg13, %c64_i32 : i32
      %150 = arith.index_cast %149 : i32 to index
      %c0_175 = arith.constant 0 : index
      %151 = vector.load %arg11[%150, %c0_175] : memref<536x16xf32, #tpu.memory_space<vmem>>, vector<64x16xf32>
      %c1_i32_176 = arith.constant 1 : i32
      %152 = arith.addi %149, %c1_i32_176 : i32
      %153 = arith.index_cast %152 : i32 to index
      %c0_177 = arith.constant 0 : index
      %154 = vector.load %arg11[%153, %c0_177] : memref<536x16xf32, #tpu.memory_space<vmem>>, vector<64x16xf32>
      %155 = arith.maximumf %151, %154 : vector<64x16xf32>
      %c16_i32 = arith.constant 16 : i32
      %156 = arith.addi %149, %c16_i32 : i32
      %157 = arith.index_cast %156 : i32 to index
      %c0_178 = arith.constant 0 : index
      %158 = vector.load %arg11[%157, %c0_178] : memref<536x16xf32, #tpu.memory_space<vmem>>, vector<64x16xf32>
      %159 = arith.maximumf %155, %158 : vector<64x16xf32>
      %c16_i32_179 = arith.constant 16 : i32
      %160 = arith.addi %149, %c16_i32_179 : i32
      %c1_i32_180 = arith.constant 1 : i32
      %161 = arith.addi %160, %c1_i32_180 : i32
      %162 = arith.index_cast %161 : i32 to index
      %c0_181 = arith.constant 0 : index
      %163 = vector.load %arg11[%162, %c0_181] : memref<536x16xf32, #tpu.memory_space<vmem>>, vector<64x16xf32>
      %164 = arith.maximumf %159, %163 : vector<64x16xf32>
      %165 = arith.index_cast %149 : i32 to index
      %c0_182 = arith.constant 0 : index
      %166 = vector.load %arg11[%165, %c0_182] : memref<536x16xf32, #tpu.memory_space<vmem>>, vector<64x16xf32>
      tpu.vector_store %arg11[%165, %c0_182], %164 {strides = array<i32>} : memref<536x16xf32, #tpu.memory_space<vmem>>, vector<64x16xf32>,
    }
    %c8_i32_92 = arith.constant 8 : i32
    %c0_93 = arith.constant 0 : index
    %c0_94 = arith.constant 0 : index
    %78 = tpu.strided_load %arg11[%c0_93, %c0_94] {strides = array<i32: 2, 1>} : memref<536x16xf32, #tpu.memory_space<vmem>>, vector<5x16xf32>
    %c0_95 = arith.constant 0 : index
    %c0_96 = arith.constant 0 : index
    %79 = vector.load %arg12[%c0_95, %c0_96] : memref<50x16xf32, #tpu.memory_space<vmem>>, vector<5x16xf32>
    tpu.vector_store %arg12[%c0_95, %c0_96], %78 {strides = array<i32>} : memref<50x16xf32, #tpu.memory_space<vmem>>, vector<5x16xf32>,
    %c32_97 = arith.constant 32 : index
    %c0_98 = arith.constant 0 : index
    %80 = tpu.strided_load %arg11[%c32_97, %c0_98] {strides = array<i32: 2, 1>} : memref<536x16xf32, #tpu.memory_space<vmem>>, vector<5x16xf32>
    %c5 = arith.constant 5 : index
    %c0_99 = arith.constant 0 : index
    %81 = vector.load %arg12[%c5, %c0_99] : memref<50x16xf32, #tpu.memory_space<vmem>>, vector<5x16xf32>
    tpu.vector_store %arg12[%c5, %c0_99], %80 {strides = array<i32>} : memref<50x16xf32, #tpu.memory_space<vmem>>, vector<5x16xf32>,
    %c64_100 = arith.constant 64 : index
    %c0_101 = arith.constant 0 : index
    %82 = tpu.strided_load %arg11[%c64_100, %c0_101] {strides = array<i32: 2, 1>} : memref<536x16xf32, #tpu.memory_space<vmem>>, vector<5x16xf32>
    %c10 = arith.constant 10 : index
    %c0_102 = arith.constant 0 : index
    %83 = vector.load %arg12[%c10, %c0_102] : memref<50x16xf32, #tpu.memory_space<vmem>>, vector<5x16xf32>
    tpu.vector_store %arg12[%c10, %c0_102], %82 {strides = array<i32>} : memref<50x16xf32, #tpu.memory_space<vmem>>, vector<5x16xf32>,
    %c96_103 = arith.constant 96 : index
    %c0_104 = arith.constant 0 : index
    %84 = tpu.strided_load %arg11[%c96_103, %c0_104] {strides = array<i32: 2, 1>} : memref<536x16xf32, #tpu.memory_space<vmem>>, vector<5x16xf32>
    %c15 = arith.constant 15 : index
    %c0_105 = arith.constant 0 : index
    %85 = vector.load %arg12[%c15, %c0_105] : memref<50x16xf32, #tpu.memory_space<vmem>>, vector<5x16xf32>
    tpu.vector_store %arg12[%c15, %c0_105], %84 {strides = array<i32>} : memref<50x16xf32, #tpu.memory_space<vmem>>, vector<5x16xf32>,
    %c128_106 = arith.constant 128 : index
    %c0_107 = arith.constant 0 : index
    %86 = tpu.strided_load %arg11[%c128_106, %c0_107] {strides = array<i32: 2, 1>} : memref<536x16xf32, #tpu.memory_space<vmem>>, vector<5x16xf32>
    %c20 = arith.constant 20 : index
    %c0_108 = arith.constant 0 : index
    %87 = vector.load %arg12[%c20, %c0_108] : memref<50x16xf32, #tpu.memory_space<vmem>>, vector<5x16xf32>
    tpu.vector_store %arg12[%c20, %c0_108], %86 {strides = array<i32>} : memref<50x16xf32, #tpu.memory_space<vmem>>, vector<5x16xf32>,
    %c256_109 = arith.constant 256 : index
    %c0_110 = arith.constant 0 : index
    %88 = tpu.strided_load %arg11[%c256_109, %c0_110] {strides = array<i32: 2, 1>} : memref<536x16xf32, #tpu.memory_space<vmem>>, vector<5x16xf32>
    %c25 = arith.constant 25 : index
    %c0_111 = arith.constant 0 : index
    %89 = vector.load %arg12[%c25, %c0_111] : memref<50x16xf32, #tpu.memory_space<vmem>>, vector<5x16xf32>
    tpu.vector_store %arg12[%c25, %c0_111], %88 {strides = array<i32>} : memref<50x16xf32, #tpu.memory_space<vmem>>, vector<5x16xf32>,
    %c288_112 = arith.constant 288 : index
    %c0_113 = arith.constant 0 : index
    %90 = tpu.strided_load %arg11[%c288_112, %c0_113] {strides = array<i32: 2, 1>} : memref<536x16xf32, #tpu.memory_space<vmem>>, vector<5x16xf32>
    %c30 = arith.constant 30 : index
    %c0_114 = arith.constant 0 : index
    %91 = vector.load %arg12[%c30, %c0_114] : memref<50x16xf32, #tpu.memory_space<vmem>>, vector<5x16xf32>
    tpu.vector_store %arg12[%c30, %c0_114], %90 {strides = array<i32>} : memref<50x16xf32, #tpu.memory_space<vmem>>, vector<5x16xf32>,
    %c320_115 = arith.constant 320 : index
    %c0_116 = arith.constant 0 : index
    %92 = tpu.strided_load %arg11[%c320_115, %c0_116] {strides = array<i32: 2, 1>} : memref<536x16xf32, #tpu.memory_space<vmem>>, vector<5x16xf32>
    %c35 = arith.constant 35 : index
    %c0_117 = arith.constant 0 : index
    %93 = vector.load %arg12[%c35, %c0_117] : memref<50x16xf32, #tpu.memory_space<vmem>>, vector<5x16xf32>
    tpu.vector_store %arg12[%c35, %c0_117], %92 {strides = array<i32>} : memref<50x16xf32, #tpu.memory_space<vmem>>, vector<5x16xf32>,
    %c352_118 = arith.constant 352 : index
    %c0_119 = arith.constant 0 : index
    %94 = tpu.strided_load %arg11[%c352_118, %c0_119] {strides = array<i32: 2, 1>} : memref<536x16xf32, #tpu.memory_space<vmem>>, vector<5x16xf32>
    %c40 = arith.constant 40 : index
    %c0_120 = arith.constant 0 : index
    %95 = vector.load %arg12[%c40, %c0_120] : memref<50x16xf32, #tpu.memory_space<vmem>>, vector<5x16xf32>
    tpu.vector_store %arg12[%c40, %c0_120], %94 {strides = array<i32>} : memref<50x16xf32, #tpu.memory_space<vmem>>, vector<5x16xf32>,
    %c384_121 = arith.constant 384 : index
    %c0_122 = arith.constant 0 : index
    %96 = tpu.strided_load %arg11[%c384_121, %c0_122] {strides = array<i32: 2, 1>} : memref<536x16xf32, #tpu.memory_space<vmem>>, vector<5x16xf32>
    %c45 = arith.constant 45 : index
    %c0_123 = arith.constant 0 : index
    %97 = vector.load %arg12[%c45, %c0_123] : memref<50x16xf32, #tpu.memory_space<vmem>>, vector<5x16xf32>
    tpu.vector_store %arg12[%c45, %c0_123], %96 {strides = array<i32>} : memref<50x16xf32, #tpu.memory_space<vmem>>, vector<5x16xf32>,
    %c0_124 = arith.constant 0 : index
    %c0_125 = arith.constant 0 : index
    %98 = tpu.strided_load %arg12[%c0_124, %c0_125] {strides = array<i32: 25, 1>} : memref<50x16xf32, #tpu.memory_space<vmem>>, vector<2x16xf32>
    %c1_126 = arith.constant 1 : index
    %c0_127 = arith.constant 0 : index
    %99 = tpu.strided_load %arg12[%c1_126, %c0_127] {strides = array<i32: 25, 1>} : memref<50x16xf32, #tpu.memory_space<vmem>>, vector<2x16xf32>
    %c2 = arith.constant 2 : index
    %c0_128 = arith.constant 0 : index
    %100 = tpu.strided_load %arg12[%c2, %c0_128] {strides = array<i32: 25, 1>} : memref<50x16xf32, #tpu.memory_space<vmem>>, vector<2x16xf32>
    %c3 = arith.constant 3 : index
    %c0_129 = arith.constant 0 : index
    %101 = tpu.strided_load %arg12[%c3, %c0_129] {strides = array<i32: 25, 1>} : memref<50x16xf32, #tpu.memory_space<vmem>>, vector<2x16xf32>
    %c4 = arith.constant 4 : index
    %c0_130 = arith.constant 0 : index
    %102 = tpu.strided_load %arg12[%c4, %c0_130] {strides = array<i32: 25, 1>} : memref<50x16xf32, #tpu.memory_space<vmem>>, vector<2x16xf32>
    %c5_131 = arith.constant 5 : index
    %c0_132 = arith.constant 0 : index
    %103 = tpu.strided_load %arg12[%c5_131, %c0_132] {strides = array<i32: 25, 1>} : memref<50x16xf32, #tpu.memory_space<vmem>>, vector<2x16xf32>
    %c6 = arith.constant 6 : index
    %c0_133 = arith.constant 0 : index
    %104 = tpu.strided_load %arg12[%c6, %c0_133] {strides = array<i32: 25, 1>} : memref<50x16xf32, #tpu.memory_space<vmem>>, vector<2x16xf32>
    %c7 = arith.constant 7 : index
    %c0_134 = arith.constant 0 : index
    %105 = tpu.strided_load %arg12[%c7, %c0_134] {strides = array<i32: 25, 1>} : memref<50x16xf32, #tpu.memory_space<vmem>>, vector<2x16xf32>
    %c8 = arith.constant 8 : index
    %c0_135 = arith.constant 0 : index
    %106 = tpu.strided_load %arg12[%c8, %c0_135] {strides = array<i32: 25, 1>} : memref<50x16xf32, #tpu.memory_space<vmem>>, vector<2x16xf32>
    %c9 = arith.constant 9 : index
    %c0_136 = arith.constant 0 : index
    %107 = tpu.strided_load %arg12[%c9, %c0_136] {strides = array<i32: 25, 1>} : memref<50x16xf32, #tpu.memory_space<vmem>>, vector<2x16xf32>
    %c10_137 = arith.constant 10 : index
    %c0_138 = arith.constant 0 : index
    %108 = tpu.strided_load %arg12[%c10_137, %c0_138] {strides = array<i32: 25, 1>} : memref<50x16xf32, #tpu.memory_space<vmem>>, vector<2x16xf32>
    %c11 = arith.constant 11 : index
    %c0_139 = arith.constant 0 : index
    %109 = tpu.strided_load %arg12[%c11, %c0_139] {strides = array<i32: 25, 1>} : memref<50x16xf32, #tpu.memory_space<vmem>>, vector<2x16xf32>
    %c12 = arith.constant 12 : index
    %c0_140 = arith.constant 0 : index
    %110 = tpu.strided_load %arg12[%c12, %c0_140] {strides = array<i32: 25, 1>} : memref<50x16xf32, #tpu.memory_space<vmem>>, vector<2x16xf32>
    %c13 = arith.constant 13 : index
    %c0_141 = arith.constant 0 : index
    %111 = tpu.strided_load %arg12[%c13, %c0_141] {strides = array<i32: 25, 1>} : memref<50x16xf32, #tpu.memory_space<vmem>>, vector<2x16xf32>
    %c14 = arith.constant 14 : index
    %c0_142 = arith.constant 0 : index
    %112 = tpu.strided_load %arg12[%c14, %c0_142] {strides = array<i32: 25, 1>} : memref<50x16xf32, #tpu.memory_space<vmem>>, vector<2x16xf32>
    %c15_143 = arith.constant 15 : index
    %c0_144 = arith.constant 0 : index
    %113 = tpu.strided_load %arg12[%c15_143, %c0_144] {strides = array<i32: 25, 1>} : memref<50x16xf32, #tpu.memory_space<vmem>>, vector<2x16xf32>
    %c16_145 = arith.constant 16 : index
    %c0_146 = arith.constant 0 : index
    %114 = tpu.strided_load %arg12[%c16_145, %c0_146] {strides = array<i32: 25, 1>} : memref<50x16xf32, #tpu.memory_space<vmem>>, vector<2x16xf32>
    %c17 = arith.constant 17 : index
    %c0_147 = arith.constant 0 : index
    %115 = tpu.strided_load %arg12[%c17, %c0_147] {strides = array<i32: 25, 1>} : memref<50x16xf32, #tpu.memory_space<vmem>>, vector<2x16xf32>
    %c18 = arith.constant 18 : index
    %c0_148 = arith.constant 0 : index
    %116 = tpu.strided_load %arg12[%c18, %c0_148] {strides = array<i32: 25, 1>} : memref<50x16xf32, #tpu.memory_space<vmem>>, vector<2x16xf32>
    %c19 = arith.constant 19 : index
    %c0_149 = arith.constant 0 : index
    %117 = tpu.strided_load %arg12[%c19, %c0_149] {strides = array<i32: 25, 1>} : memref<50x16xf32, #tpu.memory_space<vmem>>, vector<2x16xf32>
    %c20_150 = arith.constant 20 : index
    %c0_151 = arith.constant 0 : index
    %118 = tpu.strided_load %arg12[%c20_150, %c0_151] {strides = array<i32: 25, 1>} : memref<50x16xf32, #tpu.memory_space<vmem>>, vector<2x16xf32>
    %c21 = arith.constant 21 : index
    %c0_152 = arith.constant 0 : index
    %119 = tpu.strided_load %arg12[%c21, %c0_152] {strides = array<i32: 25, 1>} : memref<50x16xf32, #tpu.memory_space<vmem>>, vector<2x16xf32>
    %c22 = arith.constant 22 : index
    %c0_153 = arith.constant 0 : index
    %120 = tpu.strided_load %arg12[%c22, %c0_153] {strides = array<i32: 25, 1>} : memref<50x16xf32, #tpu.memory_space<vmem>>, vector<2x16xf32>
    %c23 = arith.constant 23 : index
    %c0_154 = arith.constant 0 : index
    %121 = tpu.strided_load %arg12[%c23, %c0_154] {strides = array<i32: 25, 1>} : memref<50x16xf32, #tpu.memory_space<vmem>>, vector<2x16xf32>
    %c24 = arith.constant 24 : index
    %c0_155 = arith.constant 0 : index
    %122 = tpu.strided_load %arg12[%c24, %c0_155] {strides = array<i32: 25, 1>} : memref<50x16xf32, #tpu.memory_space<vmem>>, vector<2x16xf32>
    %123 = tpu.concatenate %98, %99, %100, %101, %102, %103, %104, %105, %106, %107, %108, %109, %110, %111, %112, %113 in 1 : vector<2x16xf32>, vector<2x16xf32>, vector<2x16xf32>, vector<2x16xf32>, vector<2x16xf32>, vector<2x16xf32>, vector<2x16xf32>, vector<2x16xf32>, vector<2x16xf32>, vector<2x16xf32>, vector<2x16xf32>, vector<2x16xf32>, vector<2x16xf32>, vector<2x16xf32>, vector<2x16xf32>, vector<2x16xf32> -> vector<2x256xf32>
    %124 = tpu.concatenate %114, %115, %116, %117, %118, %119, %120, %121, %122 in 1 : vector<2x16xf32>, vector<2x16xf32>, vector<2x16xf32>, vector<2x16xf32>, vector<2x16xf32>, vector<2x16xf32>, vector<2x16xf32>, vector<2x16xf32>, vector<2x16xf32> -> vector<2x144xf32>
    %125 = tpu.concatenate %123, %124 in 1 : vector<2x256xf32>, vector<2x144xf32> -> vector<2x400xf32>
    %126 = arith.truncf %125 : vector<2x400xf32> to vector<2x400xbf16>
    %c0_156 = arith.constant 0 : index
    %c0_157 = arith.constant 0 : index
    %127 = vector.load %arg4[%c0_156, %c0_157] : memref<400x128xbf16, #tpu.memory_space<vmem>>, vector<400x128xbf16>
    %cst_158 = arith.constant dense<0.000000e+00> : vector<2x128xf32>
    %128 = tpu.matmul %126, %127, %cst_158 {dimension_numbers = #tpu.dot_dimension_numbers<[1], [0], [0], [1], [0, 0, 1, 1], [], []>} : vector<2x400xbf16>, vector<400x128xbf16>, vector<2x128xf32> -> vector<2x128xf32>
    %c2_159 = arith.constant 2 : index
    %c0_160 = arith.constant 0 : index
    %129 = vector.load %arg7[%c2_159, %c0_160] : memref<8x128xf32, #tpu.memory_space<vmem>>, vector<1x128xf32>
    %130 = vector.broadcast %129 : vector<1x128xf32> to vector<2x128xf32>
    %131 = arith.addf %128, %130 : vector<2x128xf32>
    %cst_161 = arith.constant 0.000000e+00 : f32
    %132 = vector.broadcast %cst_161 : f32 to vector<2x128xf32>
    %133 = arith.maximumf %131, %132 : vector<2x128xf32>
    %134 = arith.truncf %133 : vector<2x128xf32> to vector<2x128xbf16>
    %c0_162 = arith.constant 0 : index
    %c0_163 = arith.constant 0 : index
    %135 = vector.load %arg5[%c0_162, %c0_163] : memref<128x128xbf16, #tpu.memory_space<vmem>>, vector<128x128xbf16>
    %cst_164 = arith.constant dense<0.000000e+00> : vector<2x128xf32>
    %136 = tpu.matmul %134, %135, %cst_164 {dimension_numbers = #tpu.dot_dimension_numbers<[1], [0], [0], [1], [0, 0, 1, 1], [], []>} : vector<2x128xbf16>, vector<128x128xbf16>, vector<2x128xf32> -> vector<2x128xf32>
    %c3_165 = arith.constant 3 : index
    %c0_166 = arith.constant 0 : index
    %137 = vector.load %arg7[%c3_165, %c0_166] : memref<8x128xf32, #tpu.memory_space<vmem>>, vector<1x128xf32>
    %138 = vector.broadcast %137 : vector<1x128xf32> to vector<2x128xf32>
    %139 = arith.addf %136, %138 : vector<2x128xf32>
    %cst_167 = arith.constant 0.000000e+00 : f32
    %140 = vector.broadcast %cst_167 : f32 to vector<2x128xf32>
    %141 = arith.maximumf %139, %140 : vector<2x128xf32>
    %142 = arith.truncf %141 : vector<2x128xf32> to vector<2x128xbf16>
    %c0_168 = arith.constant 0 : index
    %c0_169 = arith.constant 0 : index
    %143 = vector.load %arg6[%c0_168, %c0_169] : memref<128x128xbf16, #tpu.memory_space<vmem>>, vector<128x128xbf16>
    %cst_170 = arith.constant dense<0.000000e+00> : vector<2x128xf32>
    %144 = tpu.matmul %142, %143, %cst_170 {dimension_numbers = #tpu.dot_dimension_numbers<[1], [0], [0], [1], [0, 0, 1, 1], [], []>} : vector<2x128xbf16>, vector<128x128xbf16>, vector<2x128xf32> -> vector<2x128xf32>
    %c4_171 = arith.constant 4 : index
    %c0_172 = arith.constant 0 : index
    %145 = vector.load %arg7[%c4_171, %c0_172] : memref<8x128xf32, #tpu.memory_space<vmem>>, vector<1x128xf32>
    %146 = vector.broadcast %145 : vector<1x128xf32> to vector<2x128xf32>
    %147 = arith.addf %144, %146 : vector<2x128xf32>
    %c0_173 = arith.constant 0 : index
    %c0_174 = arith.constant 0 : index
    %148 = vector.load %arg8[%c0_173, %c0_174] : memref<2x128xf32, #tpu.memory_space<vmem>>, vector<2x128xf32>
    tpu.vector_store %arg8[%c0_173, %c0_174], %147 {strides = array<i32>} : memref<2x128xf32, #tpu.memory_space<vmem>>, vector<2x128xf32>,
    return
  }
  func.func @transform_0(%arg0: i32) -> (i32, i32) {
    %c0_i32 = arith.constant 0 : i32
    %c0_i32_0 = arith.constant 0 : i32
    return %arg0, %c0_i32 : i32, i32
  }
  func.func @transform_1(%arg0: i32) -> (i32, i32) {
    %c0_i32 = arith.constant 0 : i32
    %c0_i32_0 = arith.constant 0 : i32
    %c0_i32_1 = arith.constant 0 : i32
    return %c0_i32, %c0_i32_0 : i32, i32
  }
  func.func @transform_2(%arg0: i32) -> (i32, i32) {
    %c0_i32 = arith.constant 0 : i32
    %c0_i32_0 = arith.constant 0 : i32
    %c0_i32_1 = arith.constant 0 : i32
    return %c0_i32, %c0_i32_0 : i32, i32
  }
  func.func @transform_3(%arg0: i32) -> (i32, i32) {
    %c0_i32 = arith.constant 0 : i32
    %c0_i32_0 = arith.constant 0 : i32
    %c0_i32_1 = arith.constant 0 : i32
    return %c0_i32, %c0_i32_0 : i32, i32
  }
  func.func @transform_4(%arg0: i32) -> (i32, i32) {
    %c0_i32 = arith.constant 0 : i32
    %c0_i32_0 = arith.constant 0 : i32
    %c0_i32_1 = arith.constant 0 : i32
    return %c0_i32, %c0_i32_0 : i32, i32
  }
  func.func @transform_5(%arg0: i32) -> (i32, i32) {
    %c0_i32 = arith.constant 0 : i32
    %c0_i32_0 = arith.constant 0 : i32
    %c0_i32_1 = arith.constant 0 : i32
    return %c0_i32, %c0_i32_0 : i32, i32
  }
  func.func @transform_6(%arg0: i32) -> (i32, i32) {
    %c0_i32 = arith.constant 0 : i32
    %c0_i32_0 = arith.constant 0 : i32
    %c0_i32_1 = arith.constant 0 : i32
    return %c0_i32, %c0_i32_0 : i32, i32
  }
  func.func @transform_7(%arg0: i32) -> (i32, i32) {
    %c0_i32 = arith.constant 0 : i32
    %c0_i32_0 = arith.constant 0 : i32
    return %arg0, %c0_i32 : i32, i32
  }
}

</mosaic_0001>

<bundles_post_ra>
// kernel: lenet_forward.1
= control target key start
LH: loop header
LB: loop body
LE: loop exit
PB: predicated region body
PF: predicated region fallthrough
CT: control target
= control target key end

     0   :  { %12 = vsyncpa [#allocation7], 0  ;;  %vm28_vm0 = vcmask 64512   ;;  %v8832_v1 = vmov 0.0   ;;  %vm43_vm1 = vcmask 130048   ;;  %s6318_s26 = smov 0   ;;  %s8824_s0 = inlined_call_operand.vmem [shape: bf16[2048,80], index: 0, kind: input, shape index: {}]   ;;  %s8825_s1 = inlined_call_operand.vmem [shape: bf16[80,128], index: 1, kind: input, shape index: {}]   ;;  %s8826_s2 = inlined_call_operand.vmem [shape: bf16[200,128], index: 2, kind: input, shape index: {}]   ;;  %s8827_s3 = inlined_call_operand.vmem [shape: bf16[400,128], index: 3, kind: input, shape index: {}]   ;;  %s8828_s4 = inlined_call_operand.vmem [shape: bf16[128,128], index: 4, kind: input, shape index: {}]   ;;  %s8829_s5 = inlined_call_operand.vmem [shape: bf16[128,128], index: 5, kind: input, shape index: {}]   ;;  %s8830_s6 = inlined_call_operand.vmem [shape: f32[8,128], index: 6, kind: input, shape index: {}]   ;;  %s8831_s7 = inlined_call_operand.hbm [shape: f32[2,128], index: 7, kind: output, shape index: {}]  }
   0x1   :  { %v6282_v0 = vld [vmem:[%s8830_s6] ss:$0 sm:$0xff]  ;;  %29 = vst.msk [vmem:[#allocation2 + $0x800] sm:$0xff] %vm28_vm0, %v8832_v1  ;;  %30 = vst.msk [vmem:[#allocation2 + $0x808] sm:$0xff] %vm28_vm0, %v8832_v1 }
   0x2   :  { %31 = vst.msk [vmem:[#allocation2 + $0x810] sm:$0xff] %vm28_vm0, %v8832_v1  ;;  %32 = vst.msk [vmem:[#allocation2 + $0x818] sm:$0xff] %vm28_vm0, %v8832_v1 }
   0x3   :  { %33 = vst.msk [vmem:[#allocation2 + $0x820] sm:$0xff] %vm28_vm0, %v8832_v1  ;;  %34 = vst.msk [vmem:[#allocation3 + $0x200] sm:$0xff] %vm28_vm0, %v8832_v1 }
   0x4   :  { %35 = vst.msk [vmem:[#allocation3 + $0x208] sm:$0xff] %vm28_vm0, %v8832_v1  ;;  %36 = vst.msk [vmem:[#allocation3 + $0x210] sm:$0xff] %vm28_vm0, %v8832_v1 }
   0x5   :  { %37 = vst.msk [vmem:[#allocation3 + $0x218] sm:$0xff] %vm28_vm0, %v8832_v1  ;;  %38 = vst.msk [vmem:[#allocation3 + $0x220] sm:$0xff] %vm28_vm0, %v8832_v1 }
   0x6   :  { %39 = vst.msk [vmem:[#allocation3 + $0x228] sm:$0xff] %vm28_vm0, %v8832_v1  ;;  %40 = vst.msk [vmem:[#allocation3 + $0x230] sm:$0xff] %vm28_vm0, %v8832_v1 }
   0x7   :  { %41 = vst.msk [vmem:[#allocation3 + $0x238] sm:$0xff] %vm28_vm0, %v8832_v1  ;;  %42 = vst.msk [vmem:[#allocation3 + $0x240] sm:$0xff] %vm28_vm0, %v8832_v1 }
   0x8   :  { %44 = vst.msk [vmem:[#allocation4 + $0x200] sm:$0xff] %vm43_vm1, %v8832_v1  ;;  %45 = vst.msk [vmem:[#allocation4 + $0x208] sm:$0xff] %vm43_vm1, %v8832_v1 }
   0x9   :  { %46 = vst.msk [vmem:[#allocation4 + $0x210] sm:$0xff] %vm43_vm1, %v8832_v1 }
   0xa LB: > { %v5124_v2 = vld [vmem:[%s8825_s1] sm:$0xff]   ;;  %v5125_v3 = vld [vmem:[%s8825_s1 + $0x8] sm:$0xff]   ;;  %s4314_s8 = sshll.u32 %s6198_s26, 8  ;;  %v5126_v4 = vld [vmem:[%s8825_s1 + $0x10] sm:$0xff]   ;;  %vm211_vm2 = vcmask 654336   ;;  %s53_s26 = sadd.s32 1, %s6198_s26   ;;  %s6198_s26 = sphi %s6318_s26, %s53_s26  }
   0xb   : > { %4947 = vmatprep.subr.bf16.mxu0 %v5124_v2  ;;  %5029 = vmatprep.subr.bf16.mxu1 %v5124_v2  ;;  %s55_s9 = sshra.s32 %s4314_s8, 3  ;;  %v5127_v7 = vld [vmem:[%s8825_s1 + $0x18] sm:$0xff]   ;;  %v5128_v8 = vld [vmem:[%s8825_s1 + $0x20] sm:$0xff]   ;;  %s6388_s20 = scalar_lea.vmem [#allocation2], %s4314_s8 }
   0xc   : > { %4948 = vmatpush3.bf16.msra.mxu0 %v5124_v2  ;;  %5034 = vmatpush3.bf16.msra.mxu1 %v5124_v2  ;;  %s4315_s12 = sshll.u32 %s55_s9, 2  ;;  %p50_p0 = scmp.ge.s32.totalorder %s53_s26, 8  }
   0xd   : > { %4949 = vmatprep.subr.bf16.mxu0 %v5125_v3  ;;  %5030 = vmatprep.subr.bf16.mxu1 %v5125_v3  ;;  %s6338_s15 = scalar_lea.vmem %s8824_s0, %s4315_s12  ;;  %s6481_s21 = smov (%p50_p0), 0  }
   0xe   : > { %v5129_v5 = vld [vmem:[%s6338_s15] sm:$0xff]   ;;  %v5131_v9 = vld [vmem:[%s6338_s15 + $0x8] sm:$0xff]   ;;  %v5133_v11 = vld [vmem:[%s6338_s15 + $0x10] sm:$0xff]  }
   0xf   : > { %v5130_v6 = vld [vmem:[%s6338_s15 + $0x40] sm:$0xff]   ;;  %4957 = vmatprep.mubr.msk.bf16.mxu0 %vm211_vm2, %v5129_v5  ;;  %v5132_v10 = vld [vmem:[%s6338_s15 + $0x48] sm:$0xff]   ;;  %v5134_v12 = vld [vmem:[%s6338_s15 + $0x50] sm:$0xff]  }
  0x10   : > { %4950 = vmatpush3.bf16.msra.mxu0 %v5125_v3  ;;  %5035 = vmatpush3.bf16.msra.mxu1 %v5125_v3  ;;  %v5135_v13 = vld [vmem:[%s6338_s15 + $0x18] sm:$0xff]   ;;  %v5137_v15 = vld [vmem:[%s6338_s15 + $0x20] sm:$0xff]   ;;  %v5139_v17 = vld [vmem:[%s6338_s15 + $0x28] sm:$0xff]  }
  0x11   : > { %4951 = vmatprep.subr.bf16.mxu0 %v5126_v4  ;;  %5031 = vmatprep.subr.bf16.mxu1 %v5126_v4  ;;  %v5136_v14 = vld [vmem:[%s6338_s15 + $0x58] sm:$0xff]   ;;  %v5138_v16 = vld [vmem:[%s6338_s15 + $0x60] sm:$0xff]   ;;  %v5140_v18 = vld [vmem:[%s6338_s15 + $0x68] sm:$0xff]  }
  0x12   : > { %4973 = vmatprep.mubr.msk.bf16.mxu1 %vm211_vm2, %v5130_v6  ;;  %v5141_v19 = vld [vmem:[%s6338_s15 + $0x30] sm:$0xff]   ;;  %v5143_v21 = vld [vmem:[%s6338_s15 + $0x38] sm:$0xff]  }
  0x13   : > { %v5142_v20 = vld [vmem:[%s6338_s15 + $0x70] sm:$0xff]   ;;  %v5144_v22 = vld [vmem:[%s6338_s15 + $0x78] sm:$0xff]  }
  0x14   : > { %4952 = vmatpush3.bf16.msra.mxu0 %v5126_v4  ;;  %5036 = vmatpush3.bf16.msra.mxu1 %v5126_v4 }
  0x15   : > { %4953 = vmatprep.subr.bf16.mxu0 %v5127_v7  ;;  %5032 = vmatprep.subr.bf16.mxu1 %v5127_v7 }
  0x18   : > { %4954 = vmatpush3.bf16.msra.mxu0 %v5127_v7  ;;  %5037 = vmatpush3.bf16.msra.mxu1 %v5127_v7 }
  0x19   : > { %4955 = vmatprep.subr.bf16.mxu0 %v5128_v8  ;;  %5033 = vmatprep.subr.bf16.mxu1 %v5128_v8 }
  0x1c   : > { %4956 = vmatpush3.bf16.msra.mxu0 %v5128_v8  ;;  %5038 = vmatpush3.bf16.msra.mxu1 %v5128_v8 }
  0x1f   : > { %4958 = vmatmul.mubr.msk.bf16.vlgmr.msra.gmra.mrb[0].mxu0 %vm211_vm2, %v5131_v9  ;;  %4974 = vmatmul.mubr.msk.bf16.vlgmr.msra.gmra.mrb[0].mxu1 %vm211_vm2, %v5132_v10 }
  0x20   : > { %4961 = vmatprep.mubr.msk.bf16.mxu0 %vm211_vm2, %v5133_v11  ;;  %4977 = vmatprep.mubr.msk.bf16.mxu1 %vm211_vm2, %v5134_v12 }
  0x27   : > { %4962 = vmatmul.mubr.msk.bf16.gmra.mrb[4].mxu0 %vm211_vm2, %v5135_v13  ;;  %4978 = vmatmul.mubr.msk.bf16.gmra.mrb[4].mxu1 %vm211_vm2, %v5136_v14 }
  0x28   : > { %4965 = vmatprep.mubr.msk.bf16.mxu0 %vm211_vm2, %v5137_v15  ;;  %4981 = vmatprep.mubr.msk.bf16.mxu1 %vm211_vm2, %v5138_v16 }
  0x2f   : > { %4966 = vmatmul.mubr.msk.bf16.gmra.mrb[8].mxu0 %vm211_vm2, %v5139_v17  ;;  %4982 = vmatmul.mubr.msk.bf16.gmra.mrb[8].mxu1 %vm211_vm2, %v5140_v18 }
  0x30   : > { %4969 = vmatprep.mubr.msk.bf16.mxu0 %vm211_vm2, %v5141_v19  ;;  %4985 = vmatprep.mubr.msk.bf16.mxu1 %vm211_vm2, %v5142_v20 }
  0x37   : > { %4970 = vmatmul.mubr.msk.bf16.gmra.mrb[12].mxu0 %vm211_vm2, %v5143_v21  ;;  %4986 = vmatmul.mubr.msk.bf16.gmra.mrb[12].mxu1 %vm211_vm2, %v5144_v22 }
  0xf2   : > { %v4959_v23 = vpop.f32.mrb[0].mxu0  ;;  %v4975_v24 = vpop.f32.mrb[0].mxu1 }
  0xf3   : > { %v427_v25 = vadd.f32 %v4959_v23, %v6282_v0  ;;  %v443_v26 = vadd.f32 %v4975_v24, %v6282_v0  ;;  %v294_v27 = vpop.f32.mrb[1].mxu0  ;;  %v358_v28 = vpop.f32.mrb[1].mxu1 }
  0xf4   : > { %v425_v29 = vadd.f32 %v6282_v0, %v294_v27  ;;  %v441_v30 = vadd.f32 %v6282_v0, %v358_v28  ;;  %v4960_v31 = vpop.f32.mrb[2].mxu0  ;;  %v4976_v32 = vpop.f32.mrb[2].mxu1 }
  0xf5   : > { %v459_v33 = vmax.f32 %v427_v25, 0.0  ;;  %v475_v34 = vmax.f32 %v443_v26, 0.0  ;;  %v428_v35 = vadd.f32 %v4960_v31, %v6282_v0  ;;  %v444_v36 = vadd.f32 %v4976_v32, %v6282_v0  ;;  %v297_v37 = vpop.f32.mrb[3].mxu0  ;;  %v361_v38 = vpop.f32.mrb[3].mxu1 }
  0xf6   : > { %v457_v39 = vmax.f32 %v425_v29, 0.0  ;;  %v473_v40 = vmax.f32 %v441_v30, 0.0  ;;  %v426_v41 = vadd.f32 %v6282_v0, %v297_v37  ;;  %v442_v42 = vadd.f32 %v6282_v0, %v361_v38 }
  0xf7   : > { %492 = vst.msk [vmem:[%s6388_s20 + $0x10] sm:$0xff] %vm28_vm0, %v459_v33  ;;  %508 = vst.msk [vmem:[%s6388_s20 + $0x90] sm:$0xff] %vm28_vm0, %v475_v34  ;;  %v460_v43 = vmax.f32 %v428_v35, 0.0  ;;  %v476_v44 = vmax.f32 %v444_v36, 0.0 }
  0xf8   : > { %490 = vst.msk [vmem:[%s6388_s20] sm:$0xff] %vm28_vm0, %v457_v39  ;;  %506 = vst.msk [vmem:[%s6388_s20 + $0x80] sm:$0xff] %vm28_vm0, %v473_v40  ;;  %v458_v45 = vmax.f32 %v426_v41, 0.0  ;;  %v474_v46 = vmax.f32 %v442_v42, 0.0 }
  0xf9   : > { %493 = vst.msk [vmem:[%s6388_s20 + $0x18] sm:$0xff] %vm28_vm0, %v460_v43  ;;  %509 = vst.msk [vmem:[%s6388_s20 + $0x98] sm:$0xff] %vm28_vm0, %v476_v44 }
  0xfa   : > { %491 = vst.msk [vmem:[%s6388_s20 + $0x8] sm:$0xff] %vm28_vm0, %v458_v45  ;;  %507 = vst.msk [vmem:[%s6388_s20 + $0x88] sm:$0xff] %vm28_vm0, %v474_v46  ;;  %v4963_v47 = vpop.f32.mrb[4].mxu0  ;;  %v4979_v48 = vpop.f32.mrb[4].mxu1 }
  0xfb   : > { %v431_v49 = vadd.f32 %v4963_v47, %v6282_v0  ;;  %v447_v50 = vadd.f32 %v4979_v48, %v6282_v0  ;;  %v310_v51 = vpop.f32.mrb[5].mxu0  ;;  %v374_v52 = vpop.f32.mrb[5].mxu1 }
  0xfc   : > { %v429_v53 = vadd.f32 %v6282_v0, %v310_v51  ;;  %v445_v54 = vadd.f32 %v6282_v0, %v374_v52  ;;  %v4964_v55 = vpop.f32.mrb[6].mxu0  ;;  %v4980_v56 = vpop.f32.mrb[6].mxu1 }
  0xfd   : > { %v463_v57 = vmax.f32 %v431_v49, 0.0  ;;  %v479_v58 = vmax.f32 %v447_v50, 0.0  ;;  %v432_v59 = vadd.f32 %v4964_v55, %v6282_v0  ;;  %v448_v60 = vadd.f32 %v4980_v56, %v6282_v0  ;;  %v313_v61 = vpop.f32.mrb[7].mxu0  ;;  %v377_v62 = vpop.f32.mrb[7].mxu1 }
  0xfe   : > { %v461_v63 = vmax.f32 %v429_v53, 0.0  ;;  %v477_v2 = vmax.f32 %v445_v54, 0.0  ;;  %v430_v3 = vadd.f32 %v6282_v0, %v313_v61  ;;  %v446_v4 = vadd.f32 %v6282_v0, %v377_v62 }
  0xff   : > { %496 = vst.msk [vmem:[%s6388_s20 + $0x30] sm:$0xff] %vm28_vm0, %v463_v57  ;;  %512 = vst.msk [vmem:[%s6388_s20 + $0xb0] sm:$0xff] %vm28_vm0, %v479_v58  ;;  %v464_v5 = vmax.f32 %v432_v59, 0.0  ;;  %v480_v6 = vmax.f32 %v448_v60, 0.0 }
 0x100   : > { %494 = vst.msk [vmem:[%s6388_s20 + $0x20] sm:$0xff] %vm28_vm0, %v461_v63  ;;  %510 = vst.msk [vmem:[%s6388_s20 + $0xa0] sm:$0xff] %vm28_vm0, %v477_v2  ;;  %v462_v7 = vmax.f32 %v430_v3, 0.0  ;;  %v478_v8 = vmax.f32 %v446_v4, 0.0 }
 0x101   : > { %497 = vst.msk [vmem:[%s6388_s20 + $0x38] sm:$0xff] %vm28_vm0, %v464_v5  ;;  %513 = vst.msk [vmem:[%s6388_s20 + $0xb8] sm:$0xff] %vm28_vm0, %v480_v6 }
 0x102   : > { %495 = vst.msk [vmem:[%s6388_s20 + $0x28] sm:$0xff] %vm28_vm0, %v462_v7  ;;  %511 = vst.msk [vmem:[%s6388_s20 + $0xa8] sm:$0xff] %vm28_vm0, %v478_v8  ;;  %v4967_v9 = vpop.f32.mrb[8].mxu0  ;;  %v4983_v10 = vpop.f32.mrb[8].mxu1 }
 0x103   : > { %v435_v11 = vadd.f32 %v4967_v9, %v6282_v0  ;;  %v451_v12 = vadd.f32 %v4983_v10, %v6282_v0  ;;  %v326_v13 = vpop.f32.mrb[9].mxu0  ;;  %v390_v14 = vpop.f32.mrb[9].mxu1 }
 0x104   : > { %v433_v15 = vadd.f32 %v6282_v0, %v326_v13  ;;  %v449_v16 = vadd.f32 %v6282_v0, %v390_v14  ;;  %v4968_v17 = vpop.f32.mrb[10].mxu0  ;;  %v4984_v18 = vpop.f32.mrb[10].mxu1 }
 0x105   : > { %v467_v19 = vmax.f32 %v435_v11, 0.0  ;;  %v483_v20 = vmax.f32 %v451_v12, 0.0  ;;  %v436_v21 = vadd.f32 %v4968_v17, %v6282_v0  ;;  %v452_v22 = vadd.f32 %v4984_v18, %v6282_v0  ;;  %v329_v23 = vpop.f32.mrb[11].mxu0  ;;  %v393_v24 = vpop.f32.mrb[11].mxu1 }
 0x106   : > { %v465_v25 = vmax.f32 %v433_v15, 0.0  ;;  %v481_v26 = vmax.f32 %v449_v16, 0.0  ;;  %v434_v27 = vadd.f32 %v6282_v0, %v329_v23  ;;  %v450_v28 = vadd.f32 %v6282_v0, %v393_v24 }
 0x107   : > { %500 = vst.msk [vmem:[%s6388_s20 + $0x50] sm:$0xff] %vm28_vm0, %v467_v19  ;;  %516 = vst.msk [vmem:[%s6388_s20 + $0xd0] sm:$0xff] %vm28_vm0, %v483_v20  ;;  %v468_v29 = vmax.f32 %v436_v21, 0.0  ;;  %v484_v30 = vmax.f32 %v452_v22, 0.0 }
 0x108   : > { %498 = vst.msk [vmem:[%s6388_s20 + $0x40] sm:$0xff] %vm28_vm0, %v465_v25  ;;  %514 = vst.msk [vmem:[%s6388_s20 + $0xc0] sm:$0xff] %vm28_vm0, %v481_v26  ;;  %v466_v31 = vmax.f32 %v434_v27, 0.0  ;;  %v482_v32 = vmax.f32 %v450_v28, 0.0 }
 0x109   : > { %501 = vst.msk [vmem:[%s6388_s20 + $0x58] sm:$0xff] %vm28_vm0, %v468_v29  ;;  %517 = vst.msk [vmem:[%s6388_s20 + $0xd8] sm:$0xff] %vm28_vm0, %v484_v30 }
 0x10a   : > { %499 = vst.msk [vmem:[%s6388_s20 + $0x48] sm:$0xff] %vm28_vm0, %v466_v31  ;;  %515 = vst.msk [vmem:[%s6388_s20 + $0xc8] sm:$0xff] %vm28_vm0, %v482_v32  ;;  %v4971_v33 = vpop.f32.mrb[12].mxu0  ;;  %v4987_v34 = vpop.f32.mrb[12].mxu1 }
 0x10b   : > { %v439_v35 = vadd.f32 %v4971_v33, %v6282_v0  ;;  %v455_v36 = vadd.f32 %v4987_v34, %v6282_v0  ;;  %v342_v37 = vpop.f32.mrb[13].mxu0  ;;  %v406_v38 = vpop.f32.mrb[13].mxu1 }
 0x10c   : > { %v437_v39 = vadd.f32 %v6282_v0, %v342_v37  ;;  %v453_v40 = vadd.f32 %v6282_v0, %v406_v38  ;;  %v4972_v41 = vpop.f32.mrb[14].mxu0  ;;  %v4988_v42 = vpop.f32.mrb[14].mxu1  ;;  %52 = sbr.rel (!%p50_p0) target bundleno = 10 (0xa), region = 208 }
 0x10d   : > { %v471_v43 = vmax.f32 %v439_v35, 0.0  ;;  %v487_v44 = vmax.f32 %v455_v36, 0.0  ;;  %v440_v45 = vadd.f32 %v4972_v41, %v6282_v0  ;;  %v456_v46 = vadd.f32 %v4988_v42, %v6282_v0  ;;  %v345_v47 = vpop.f32.mrb[15].mxu0  ;;  %v409_v48 = vpop.f32.mrb[15].mxu1 }
 0x10e   : > { %v469_v49 = vmax.f32 %v437_v39, 0.0  ;;  %v485_v50 = vmax.f32 %v453_v40, 0.0  ;;  %v438_v51 = vadd.f32 %v6282_v0, %v345_v47  ;;  %v454_v52 = vadd.f32 %v6282_v0, %v409_v48 }
 0x10f   : > { %504 = vst.msk [vmem:[%s6388_s20 + $0x70] sm:$0xff] %vm28_vm0, %v471_v43  ;;  %520 = vst.msk [vmem:[%s6388_s20 + $0xf0] sm:$0xff] %vm28_vm0, %v487_v44  ;;  %v472_v53 = vmax.f32 %v440_v45, 0.0  ;;  %v488_v54 = vmax.f32 %v456_v46, 0.0 }
 0x110   : > { %502 = vst.msk [vmem:[%s6388_s20 + $0x60] sm:$0xff] %vm28_vm0, %v469_v49  ;;  %518 = vst.msk [vmem:[%s6388_s20 + $0xe0] sm:$0xff] %vm28_vm0, %v485_v50  ;;  %v470_v55 = vmax.f32 %v438_v51, 0.0  ;;  %v486_v56 = vmax.f32 %v454_v52, 0.0 }
 0x111   : > { %505 = vst.msk [vmem:[%s6388_s20 + $0x78] sm:$0xff] %vm28_vm0, %v472_v53  ;;  %521 = vst.msk [vmem:[%s6388_s20 + $0xf8] sm:$0xff] %vm28_vm0, %v488_v54 }
 0x112   : > { %503 = vst.msk [vmem:[%s6388_s20 + $0x68] sm:$0xff] %vm28_vm0, %v470_v55  ;;  %519 = vst.msk [vmem:[%s6388_s20 + $0xe8] sm:$0xff] %vm28_vm0, %v486_v56 }
 0x113 LB: > { %s4354_s22 = sshll.u32 %s6202_s21, 6  ;;  %s527_s21 = sadd.s32 1, %s6202_s21   ;;  %s6202_s21 = sphi %s6481_s21, %s527_s21  }
 0x114   : > { %s6487_s23 = scalar_lea.vmem [#allocation2], %s4354_s22  ;;  %p524_p1 = scmp.ge.s32.totalorder %s527_s21, 32  }
 0x115   :  { %s6601_s24 = smov (%p524_p1), 0  }
 0x119   : > { %v530_v0 = vld [vmem:[%s6487_s23] sm:$0xff]  ;;  %v531_v61 = vld [vmem:[%s6487_s23 + $0x8] sm:$0xff]  ;;  %v532_v4 = vld [vmem:[%s6487_s23 + $0x10] sm:$0xff] }
 0x11a   : > { %v4356_v57 = vld [vmem:[%s6487_s23 + $0x1] sm:$0xff]  ;;  %v4357_v62 = vld [vmem:[%s6487_s23 + $0x9] sm:$0xff]  ;;  %v4358_v7 = vld [vmem:[%s6487_s23 + $0x11] sm:$0xff] }
 0x11b   : > { %v4365_v58 = vld [vmem:[%s6487_s23 + $0x20] sm:$0xff]  ;;  %v548_v59 = vmax.f32 %v530_v0, %v4356_v57  ;;  %v549_v63 = vmax.f32 %v531_v61, %v4357_v62  ;;  %v4366_v2 = vld [vmem:[%s6487_s23 + $0x28] sm:$0xff]  ;;  %v4367_v8 = vld [vmem:[%s6487_s23 + $0x30] sm:$0xff]  ;;  %v550_v12 = vmax.f32 %v532_v4, %v4358_v7 }
 0x11c   : > { %v4374_v60 = vld [vmem:[%s6487_s23 + $0x21] sm:$0xff]  ;;  %v4375_v3 = vld [vmem:[%s6487_s23 + $0x29] sm:$0xff]  ;;  %v4376_v9 = vld [vmem:[%s6487_s23 + $0x31] sm:$0xff] }
 0x11d   : > { %v552_v5 = vmax.f32 %v4365_v58, %v4374_v60  ;;  %v566_v6 = vmax.f32 %v548_v59, %v4365_v58  ;;  %v553_v10 = vmax.f32 %v4366_v2, %v4375_v3  ;;  %v567_v11 = vmax.f32 %v549_v63, %v4366_v2  ;;  %v533_v13 = vld [vmem:[%s6487_s23 + $0x18] sm:$0xff]  ;;  %v4369_v20 = vld [vmem:[%s6487_s23 + $0x40] sm:$0xff]  ;;  %v4370_v25 = vld [vmem:[%s6487_s23 + $0x48] sm:$0xff] }
 0x11e   : > { %v4359_v14 = vld [vmem:[%s6487_s23 + $0x19] sm:$0xff]  ;;  %v554_v16 = vmax.f32 %v4367_v8, %v4376_v9  ;;  %v4378_v21 = vld [vmem:[%s6487_s23 + $0x41] sm:$0xff]  ;;  %v568_v23 = vmax.f32 %v550_v12, %v4367_v8  ;;  %v4379_v26 = vld [vmem:[%s6487_s23 + $0x49] sm:$0xff] }
 0x11f   : > { %v4368_v15 = vld [vmem:[%s6487_s23 + $0x38] sm:$0xff]  ;;  %v584_v17 = vmax.f32 %v566_v6, %v4374_v60  ;;  %v551_v18 = vmax.f32 %v533_v13, %v4359_v14  ;;  %v585_v22 = vmax.f32 %v567_v11, %v4375_v3  ;;  %v570_v24 = vmax.f32 %v552_v5, %v4369_v20  ;;  %v4371_v27 = vld [vmem:[%s6487_s23 + $0x50] sm:$0xff] }
 0x120   : > { %v4377_v19 = vld [vmem:[%s6487_s23 + $0x39] sm:$0xff]  ;;  %v571_v30 = vmax.f32 %v553_v10, %v4370_v25  ;;  %v572_v31 = vmax.f32 %v554_v16, %v4371_v27  ;;  %v4380_v32 = vld [vmem:[%s6487_s23 + $0x51] sm:$0xff]  ;;  %v586_v35 = vmax.f32 %v568_v23, %v4376_v9 }
 0x121   : > { %v555_v28 = vmax.f32 %v4368_v15, %v4377_v19  ;;  %592 = vst.msk [vmem:[%s6487_s23] sm:$0xff] %vm28_vm0, %v584_v17  ;;  %v569_v29 = vmax.f32 %v551_v18, %v4368_v15  ;;  %v4372_v33 = vld [vmem:[%s6487_s23 + $0x58] sm:$0xff]  ;;  %593 = vst.msk [vmem:[%s6487_s23 + $0x8] sm:$0xff] %vm28_vm0, %v585_v22  ;;  %v588_v36 = vmax.f32 %v570_v24, %v4378_v21  ;;  %526 = sbr.rel (!%p524_p1) target bundleno = 275 (0x113), region = 219 }
 0x122   : > { %v4381_v34 = vld [vmem:[%s6487_s23 + $0x59] sm:$0xff]  ;;  %v589_v39 = vmax.f32 %v571_v30, %v4379_v26  ;;  %v590_v40 = vmax.f32 %v572_v31, %v4380_v32  ;;  %594 = vst.msk [vmem:[%s6487_s23 + $0x10] sm:$0xff] %vm28_vm0, %v586_v35 }
 0x123   : > { %v573_v37 = vmax.f32 %v555_v28, %v4372_v33  ;;  %v587_v38 = vmax.f32 %v569_v29, %v4377_v19  ;;  %596 = vst.msk [vmem:[%s6487_s23 + $0x20] sm:$0xff] %vm28_vm0, %v588_v36 }
 0x124   : > { %597 = vst.msk [vmem:[%s6487_s23 + $0x28] sm:$0xff] %vm28_vm0, %v589_v39  ;;  %598 = vst.msk [vmem:[%s6487_s23 + $0x30] sm:$0xff] %vm28_vm0, %v590_v40 }
 0x125   : > { %v591_v41 = vmax.f32 %v573_v37, %v4381_v34  ;;  %595 = vst.msk [vmem:[%s6487_s23 + $0x18] sm:$0xff] %vm28_vm0, %v587_v38 }
 0x127   : > { %599 = vst.msk [vmem:[%s6487_s23 + $0x38] sm:$0xff] %vm28_vm0, %v591_v41 }
 0x12e   :  { %v600_v42 = vld [vmem:[#allocation2] ss:$2 sm:$0xff]  ;;  %v602_v43 = vld [vmem:[#allocation2 + $0x10] ss:$2 sm:$0xff] }
 0x12f   :  { %v606_v44 = vld [vmem:[#allocation2 + $0x40] ss:$2 sm:$0xff]  ;;  %603 = vst.msk [vmem:[#allocation3] sm:$0xff] %vm28_vm0, %v600_v42  ;;  %604 = vst.msk [vmem:[#allocation3 + $0x8] sm:$0xff] %vm28_vm0, %v602_v43  ;;  %v608_v45 = vld [vmem:[#allocation2 + $0x50] ss:$2 sm:$0xff] }
 0x130   :  { %609 = vst.msk [vmem:[#allocation3 + $0x10] sm:$0xff] %vm28_vm0, %v606_v44  ;;  %v612_v46 = vld [vmem:[#allocation2 + $0x80] ss:$2 sm:$0xff]  ;;  %v614_v47 = vld [vmem:[#allocation2 + $0x90] ss:$2 sm:$0xff]  ;;  %610 = vst.msk [vmem:[#allocation3 + $0x18] sm:$0xff] %vm28_vm0, %v608_v45 }
 0x131   :  { %615 = vst.msk [vmem:[#allocation3 + $0x20] sm:$0xff] %vm28_vm0, %v612_v46  ;;  %616 = vst.msk [vmem:[#allocation3 + $0x28] sm:$0xff] %vm28_vm0, %v614_v47  ;;  %v618_v48 = vld [vmem:[#allocation2 + $0xc0] ss:$2 sm:$0xff]  ;;  %v620_v49 = vld [vmem:[#allocation2 + $0xd0] ss:$2 sm:$0xff] }
 0x132   :  { %v624_v50 = vld [vmem:[#allocation2 + $0x100] ss:$2 sm:$0xff]  ;;  %621 = vst.msk [vmem:[#allocation3 + $0x30] sm:$0xff] %vm28_vm0, %v618_v48  ;;  %622 = vst.msk [vmem:[#allocation3 + $0x38] sm:$0xff] %vm28_vm0, %v620_v49  ;;  %v626_v51 = vld [vmem:[#allocation2 + $0x110] ss:$2 sm:$0xff] }
 0x133   :  { %627 = vst.msk [vmem:[#allocation3 + $0x40] sm:$0xff] %vm28_vm0, %v624_v50  ;;  %v630_v52 = vld [vmem:[#allocation2 + $0x140] ss:$2 sm:$0xff]  ;;  %v632_v53 = vld [vmem:[#allocation2 + $0x150] ss:$2 sm:$0xff]  ;;  %628 = vst.msk [vmem:[#allocation3 + $0x48] sm:$0xff] %vm28_vm0, %v626_v51 }
 0x134   :  { %633 = vst.msk [vmem:[#allocation3 + $0x50] sm:$0xff] %vm28_vm0, %v630_v52  ;;  %634 = vst.msk [vmem:[#allocation3 + $0x58] sm:$0xff] %vm28_vm0, %v632_v53  ;;  %v636_v54 = vld [vmem:[#allocation2 + $0x180] ss:$2 sm:$0xff]  ;;  %v638_v55 = vld [vmem:[#allocation2 + $0x190] ss:$2 sm:$0xff] }
 0x135   :  { %v642_v56 = vld [vmem:[#allocation2 + $0x1c0] ss:$2 sm:$0xff]  ;;  %639 = vst.msk [vmem:[#allocation3 + $0x60] sm:$0xff] %vm28_vm0, %v636_v54  ;;  %640 = vst.msk [vmem:[#allocation3 + $0x68] sm:$0xff] %vm28_vm0, %v638_v55  ;;  %v644_v0 = vld [vmem:[#allocation2 + $0x1d0] ss:$2 sm:$0xff] }
 0x136   :  { %645 = vst.msk [vmem:[#allocation3 + $0x70] sm:$0xff] %vm28_vm0, %v642_v56  ;;  %v648_v57 = vld [vmem:[#allocation2 + $0x200] ss:$2 sm:$0xff]  ;;  %v650_v58 = vld [vmem:[#allocation2 + $0x210] ss:$2 sm:$0xff]  ;;  %646 = vst.msk [vmem:[#allocation3 + $0x78] sm:$0xff] %vm28_vm0, %v644_v0 }
 0x137   :  { %651 = vst.msk [vmem:[#allocation3 + $0x80] sm:$0xff] %vm28_vm0, %v648_v57  ;;  %652 = vst.msk [vmem:[#allocation3 + $0x88] sm:$0xff] %vm28_vm0, %v650_v58  ;;  %v654_v59 = vld [vmem:[#allocation2 + $0x240] ss:$2 sm:$0xff]  ;;  %v656_v60 = vld [vmem:[#allocation2 + $0x250] ss:$2 sm:$0xff] }
 0x138   :  { %v660_v61 = vld [vmem:[#allocation2 + $0x280] ss:$2 sm:$0xff]  ;;  %657 = vst.msk [vmem:[#allocation3 + $0x90] sm:$0xff] %vm28_vm0, %v654_v59  ;;  %658 = vst.msk [vmem:[#allocation3 + $0x98] sm:$0xff] %vm28_vm0, %v656_v60  ;;  %v662_v62 = vld [vmem:[#allocation2 + $0x290] ss:$2 sm:$0xff] }
 0x139   :  { %663 = vst.msk [vmem:[#allocation3 + $0xa0] sm:$0xff] %vm28_vm0, %v660_v61  ;;  %v666_v63 = vld [vmem:[#allocation2 + $0x2c0] ss:$2 sm:$0xff]  ;;  %v668_v2 = vld [vmem:[#allocation2 + $0x2d0] ss:$2 sm:$0xff]  ;;  %664 = vst.msk [vmem:[#allocation3 + $0xa8] sm:$0xff] %vm28_vm0, %v662_v62 }
 0x13a   :  { %669 = vst.msk [vmem:[#allocation3 + $0xb0] sm:$0xff] %vm28_vm0, %v666_v63  ;;  %670 = vst.msk [vmem:[#allocation3 + $0xb8] sm:$0xff] %vm28_vm0, %v668_v2  ;;  %v672_v3 = vld [vmem:[#allocation2 + $0x300] ss:$2 sm:$0xff]  ;;  %v674_v4 = vld [vmem:[#allocation2 + $0x310] ss:$2 sm:$0xff] }
 0x13b   :  { %v678_v5 = vld [vmem:[#allocation2 + $0x340] ss:$2 sm:$0xff]  ;;  %675 = vst.msk [vmem:[#allocation3 + $0xc0] sm:$0xff] %vm28_vm0, %v672_v3  ;;  %676 = vst.msk [vmem:[#allocation3 + $0xc8] sm:$0xff] %vm28_vm0, %v674_v4  ;;  %v680_v6 = vld [vmem:[#allocation2 + $0x350] ss:$2 sm:$0xff] }
 0x13c   :  { %681 = vst.msk [vmem:[#allocation3 + $0xd0] sm:$0xff] %vm28_vm0, %v678_v5  ;;  %v684_v7 = vld [vmem:[#allocation2 + $0x380] ss:$2 sm:$0xff]  ;;  %v686_v8 = vld [vmem:[#allocation2 + $0x390] ss:$2 sm:$0xff]  ;;  %682 = vst.msk [vmem:[#allocation3 + $0xd8] sm:$0xff] %vm28_vm0, %v680_v6 }
 0x13d   :  { %687 = vst.msk [vmem:[#allocation3 + $0xe0] sm:$0xff] %vm28_vm0, %v684_v7  ;;  %688 = vst.msk [vmem:[#allocation3 + $0xe8] sm:$0xff] %vm28_vm0, %v686_v8  ;;  %v690_v9 = vld [vmem:[#allocation2 + $0x3c0] ss:$2 sm:$0xff]  ;;  %v692_v10 = vld [vmem:[#allocation2 + $0x3d0] ss:$2 sm:$0xff] }
 0x13e   :  { %v696_v11 = vld [vmem:[#allocation2 + $0x400] ss:$2 sm:$0xff]  ;;  %693 = vst.msk [vmem:[#allocation3 + $0xf0] sm:$0xff] %vm28_vm0, %v690_v9  ;;  %694 = vst.msk [vmem:[#allocation3 + $0xf8] sm:$0xff] %vm28_vm0, %v692_v10  ;;  %v698_v12 = vld [vmem:[#allocation2 + $0x410] ss:$2 sm:$0xff] }
 0x13f   :  { %699 = vst.msk [vmem:[#allocation3 + $0x100] sm:$0xff] %vm28_vm0, %v696_v11  ;;  %v702_v13 = vld [vmem:[#allocation2 + $0x440] ss:$2 sm:$0xff]  ;;  %v704_v14 = vld [vmem:[#allocation2 + $0x450] ss:$2 sm:$0xff]  ;;  %700 = vst.msk [vmem:[#allocation3 + $0x108] sm:$0xff] %vm28_vm0, %v698_v12 }
 0x140   :  { %705 = vst.msk [vmem:[#allocation3 + $0x110] sm:$0xff] %vm28_vm0, %v702_v13  ;;  %706 = vst.msk [vmem:[#allocation3 + $0x118] sm:$0xff] %vm28_vm0, %v704_v14  ;;  %v708_v15 = vld [vmem:[#allocation2 + $0x480] ss:$2 sm:$0xff]  ;;  %v710_v16 = vld [vmem:[#allocation2 + $0x490] ss:$2 sm:$0xff] }
 0x141   :  { %v714_v17 = vld [vmem:[#allocation2 + $0x4c0] ss:$2 sm:$0xff]  ;;  %711 = vst.msk [vmem:[#allocation3 + $0x120] sm:$0xff] %vm28_vm0, %v708_v15  ;;  %712 = vst.msk [vmem:[#allocation3 + $0x128] sm:$0xff] %vm28_vm0, %v710_v16  ;;  %v716_v18 = vld [vmem:[#allocation2 + $0x4d0] ss:$2 sm:$0xff] }
 0x142   :  { %717 = vst.msk [vmem:[#allocation3 + $0x130] sm:$0xff] %vm28_vm0, %v714_v17  ;;  %v720_v19 = vld [vmem:[#allocation2 + $0x500] ss:$2 sm:$0xff]  ;;  %v722_v20 = vld [vmem:[#allocation2 + $0x510] ss:$2 sm:$0xff]  ;;  %718 = vst.msk [vmem:[#allocation3 + $0x138] sm:$0xff] %vm28_vm0, %v716_v18 }
 0x143   :  { %723 = vst.msk [vmem:[#allocation3 + $0x140] sm:$0xff] %vm28_vm0, %v720_v19  ;;  %724 = vst.msk [vmem:[#allocation3 + $0x148] sm:$0xff] %vm28_vm0, %v722_v20  ;;  %v726_v21 = vld [vmem:[#allocation2 + $0x540] ss:$2 sm:$0xff]  ;;  %v728_v22 = vld [vmem:[#allocation2 + $0x550] ss:$2 sm:$0xff] }
 0x144   :  { %v732_v23 = vld [vmem:[#allocation2 + $0x580] ss:$2 sm:$0xff]  ;;  %729 = vst.msk [vmem:[#allocation3 + $0x150] sm:$0xff] %vm28_vm0, %v726_v21  ;;  %730 = vst.msk [vmem:[#allocation3 + $0x158] sm:$0xff] %vm28_vm0, %v728_v22  ;;  %v734_v24 = vld [vmem:[#allocation2 + $0x590] ss:$2 sm:$0xff] }
 0x145   :  { %735 = vst.msk [vmem:[#allocation3 + $0x160] sm:$0xff] %vm28_vm0, %v732_v23  ;;  %v738_v25 = vld [vmem:[#allocation2 + $0x5c0] ss:$2 sm:$0xff]  ;;  %v740_v26 = vld [vmem:[#allocation2 + $0x5d0] ss:$2 sm:$0xff]  ;;  %736 = vst.msk [vmem:[#allocation3 + $0x168] sm:$0xff] %vm28_vm0, %v734_v24 }
 0x146   :  { %741 = vst.msk [vmem:[#allocation3 + $0x170] sm:$0xff] %vm28_vm0, %v738_v25  ;;  %742 = vst.msk [vmem:[#allocation3 + $0x178] sm:$0xff] %vm28_vm0, %v740_v26  ;;  %v744_v27 = vld [vmem:[#allocation2 + $0x600] ss:$2 sm:$0xff]  ;;  %v746_v28 = vld [vmem:[#allocation2 + $0x610] ss:$2 sm:$0xff] }
 0x147   :  { %v750_v29 = vld [vmem:[#allocation2 + $0x640] ss:$2 sm:$0xff]  ;;  %747 = vst.msk [vmem:[#allocation3 + $0x180] sm:$0xff] %vm28_vm0, %v744_v27  ;;  %748 = vst.msk [vmem:[#allocation3 + $0x188] sm:$0xff] %vm28_vm0, %v746_v28  ;;  %v752_v30 = vld [vmem:[#allocation2 + $0x650] ss:$2 sm:$0xff] }
 0x148   :  { %753 = vst.msk [vmem:[#allocation3 + $0x190] sm:$0xff] %vm28_vm0, %v750_v29  ;;  %v756_v31 = vld [vmem:[#allocation2 + $0x680] ss:$2 sm:$0xff]  ;;  %v758_v32 = vld [vmem:[#allocation2 + $0x690] ss:$2 sm:$0xff]  ;;  %754 = vst.msk [vmem:[#allocation3 + $0x198] sm:$0xff] %vm28_vm0, %v752_v30 }
 0x149   :  { %759 = vst.msk [vmem:[#allocation3 + $0x1a0] sm:$0xff] %vm28_vm0, %v756_v31  ;;  %760 = vst.msk [vmem:[#allocation3 + $0x1a8] sm:$0xff] %vm28_vm0, %v758_v32  ;;  %v762_v33 = vld [vmem:[#allocation2 + $0x6c0] ss:$2 sm:$0xff]  ;;  %v764_v34 = vld [vmem:[#allocation2 + $0x6d0] ss:$2 sm:$0xff] }
 0x14a   :  { %v768_v35 = vld [vmem:[#allocation2 + $0x700] ss:$2 sm:$0xff]  ;;  %765 = vst.msk [vmem:[#allocation3 + $0x1b0] sm:$0xff] %vm28_vm0, %v762_v33  ;;  %766 = vst.msk [vmem:[#allocation3 + $0x1b8] sm:$0xff] %vm28_vm0, %v764_v34  ;;  %v770_v36 = vld [vmem:[#allocation2 + $0x710] ss:$2 sm:$0xff] }
 0x14b   :  { %771 = vst.msk [vmem:[#allocation3 + $0x1c0] sm:$0xff] %vm28_vm0, %v768_v35  ;;  %v774_v37 = vld [vmem:[#allocation2 + $0x740] ss:$2 sm:$0xff]  ;;  %v776_v38 = vld [vmem:[#allocation2 + $0x750] ss:$2 sm:$0xff]  ;;  %772 = vst.msk [vmem:[#allocation3 + $0x1c8] sm:$0xff] %vm28_vm0, %v770_v36 }
 0x14c   :  { %777 = vst.msk [vmem:[#allocation3 + $0x1d0] sm:$0xff] %vm28_vm0, %v774_v37  ;;  %778 = vst.msk [vmem:[#allocation3 + $0x1d8] sm:$0xff] %vm28_vm0, %v776_v38  ;;  %v780_v39 = vld [vmem:[#allocation2 + $0x780] ss:$2 sm:$0xff]  ;;  %v782_v40 = vld [vmem:[#allocation2 + $0x790] ss:$2 sm:$0xff] }
 0x14d   :  { %v786_v41 = vld [vmem:[#allocation2 + $0x7c0] ss:$2 sm:$0xff]  ;;  %783 = vst.msk [vmem:[#allocation3 + $0x1e0] sm:$0xff] %vm28_vm0, %v780_v39  ;;  %784 = vst.msk [vmem:[#allocation3 + $0x1e8] sm:$0xff] %vm28_vm0, %v782_v40  ;;  %v788_v42 = vld [vmem:[#allocation2 + $0x7d0] ss:$2 sm:$0xff] }
 0x14e   :  { %789 = vst.msk [vmem:[#allocation3 + $0x1f0] sm:$0xff] %vm28_vm0, %v786_v41  ;;  %v6598_v43 = vld [vmem:[%s8830_s6 + $0x1] ss:$0 sm:$0xff]  ;;  %790 = vst.msk [vmem:[#allocation3 + $0x1f8] sm:$0xff] %vm28_vm0, %v788_v42 }
 0x14f   :  { %8911 = vst [vmem:[#allocation9_spill] sm:$0xff] %v6598_v43 }
 0x150 LB: > { %s4382_s25 = sshll.u32 %s6206_s24, 7  ;;  %s6213_s27 = smov 8   ;;  %vm3241_vm3 = vcmask 1043456   ;;  %vm2240_vm4 = vcmask 195584   ;;  %vm2257_vm5 = vcmask 261120   ;;  %vm2274_vm6 = vcmask 326656   ;;  %s6206_s24 = sphi %s6601_s24, %s797_s24  }
 0x151   : > { %s6609_s26 = scalar_lea.vmem [#allocation3], %s4382_s25  ;;  %s6214_s28 = smov 16   ;;  %vm2291_vm7 = vcmask 392192   ;;  %vm2308_vm8 = vcmask 457728   ;;  %vm2325_vm9 = vcmask 523264   ;;  %vm2342_vm10 = vcmask 588800  }
 0x152   : > { %s6215_s29 = smov 24   ;;  %s6216_s30 = smov 32   ;;  %vm2376_vm11 = vcmask 719872   ;;  %vm2393_vm12 = vcmask 785408   ;;  %vm2410_vm13 = vcmask 850944   ;;  %vm2427_vm14 = vcmask 916480  }
 0x153   : > { %s6217_s8 = smov 40   ;;  %s6218_s9 = smov 48   ;;  %vm2444_vm15 = vcmask 982016  }
 0x154   : > { %s6219_s10 = smov 56   ;;  %s6220_s11 = smov 64  }
 0x155   : > { %v4388_v44 = vld [vmem:[%s6609_s26 + $0x21] sm:$0xff]  ;;  %v4389_v45 = vld [vmem:[%s6609_s26 + $0x29] sm:$0xff]  ;;  %v4390_v49 = vld [vmem:[%s6609_s26 + $0x31] sm:$0xff]  ;;  %s6221_s12 = smov 72   ;;  %s6222_s13 = smov 80  }
 0x156   : > { %v4384_v46 = vld [vmem:[%s6609_s26 + $0x1] sm:$0xff]  ;;  %v6614_v47 = vpack.i.bf16 %v4389_v45, %v4388_v44  ;;  %v4385_v48 = vld [vmem:[%s6609_s26 + $0x9] sm:$0xff]  ;;  %v4391_v50 = vld [vmem:[%s6609_s26 + $0x39] sm:$0xff]  ;;  %s6223_s14 = smov 88   ;;  %s6224_s15 = smov 96  }
 0x157   : > { %v5145_v51 = vpack.i.bf16 %v4385_v48, %v4384_v46  ;;  %v4386_v52 = vld [vmem:[%s6609_s26 + $0x11] sm:$0xff]  ;;  %v4387_v53 = vld [vmem:[%s6609_s26 + $0x19] sm:$0xff]  ;;  %v6623_v54 = vpack.i.bf16 %v4391_v50, %v4390_v49  ;;  %v4392_v57 = vld [vmem:[%s6609_s26 + $0x41] sm:$0xff]  ;;  %s6226_s18 = smov 104   ;;  %s6228_s17 = smov 120  }
 0x158   : > { %5156 = vrot.lane.b32.xlu1 %v6614_v47, %s6213_s27  ;;  %v6626_v55 = vpack.i.bf16 %v4387_v53, %v4386_v52  ;;  %v4394_v56 = vld [vmem:[%s6609_s26 + $0x51] sm:$0xff]  ;;  %v4395_v0 = vld [vmem:[%s6609_s26 + $0x59] sm:$0xff]  ;;  %v4393_v58 = vld [vmem:[%s6609_s26 + $0x49] sm:$0xff]  ;;  %s797_s24 = sadd.s32 1, %s6206_s24  }
 0x159   : > { %5146 = vrot.lane.b32.xlu0 %v5145_v51, %s6213_s27  ;;  %v6634_v59 = vpack.i.bf16 %v4395_v0, %v4394_v56  ;;  %v6638_v60 = vpack.i.bf16 %v4393_v58, %v4392_v57  ;;  %v4398_v61 = vld [vmem:[%s6609_s26 + $0x71] sm:$0xff]  ;;  %v4399_v62 = vld [vmem:[%s6609_s26 + $0x79] sm:$0xff]  ;;  %v4396_v63 = vld [vmem:[%s6609_s26 + $0x61] sm:$0xff]  ;;  %p794_p2 = scmp.ge.s32.totalorder %s797_s24, 4  }
 0x15a   : > { %v4397_v2 = vld [vmem:[%s6609_s26 + $0x69] sm:$0xff]  ;;  %v6646_v3 = vpack.i.bf16 %v4399_v62, %v4398_v61  ;;  %v4403_v5 = vld [vmem:[%s6609_s26 + $0x12] sm:$0xff]  ;;  %v4404_v6 = vld [vmem:[%s6609_s26 + $0x1a] sm:$0xff] }
 0x15b   : > { %v6650_v4 = vpack.i.bf16 %v4397_v2, %v4396_v63  ;;  %v4401_v7 = vld [vmem:[%s6609_s26 + $0x2] sm:$0xff]  ;;  %v4402_v8 = vld [vmem:[%s6609_s26 + $0xa] sm:$0xff]  ;;  %v6658_v9 = vpack.i.bf16 %v4404_v6, %v4403_v5  ;;  %v4407_v11 = vld [vmem:[%s6609_s26 + $0x32] sm:$0xff] }
 0x15c   : > { %5161 = vrot.lane.b32.xlu1 %v6623_v54, %s6213_s27  ;;  %v5185_v10 = vpack.i.bf16 %v4402_v8, %v4401_v7  ;;  %v4408_v12 = vld [vmem:[%s6609_s26 + $0x3a] sm:$0xff]  ;;  %v4405_v13 = vld [vmem:[%s6609_s26 + $0x22] sm:$0xff]  ;;  %v4406_v14 = vld [vmem:[%s6609_s26 + $0x2a] sm:$0xff] }
 0x15d   : > { %5151 = vrot.lane.b32.xlu0 %v6626_v55, %s6213_s27  ;;  %v6668_v15 = vpack.i.bf16 %v4408_v12, %v4407_v11  ;;  %v6671_v16 = vpack.i.bf16 %v4406_v14, %v4405_v13  ;;  %v4411_v17 = vld [vmem:[%s6609_s26 + $0x52] sm:$0xff]  ;;  %v4412_v18 = vld [vmem:[%s6609_s26 + $0x5a] sm:$0xff]  ;;  %v4409_v19 = vld [vmem:[%s6609_s26 + $0x42] sm:$0xff] }
 0x15e   : > { %v4410_v20 = vld [vmem:[%s6609_s26 + $0x4a] sm:$0xff]  ;;  %v6679_v21 = vpack.i.bf16 %v4412_v18, %v4411_v17  ;;  %v4415_v23 = vld [vmem:[%s6609_s26 + $0x72] sm:$0xff]  ;;  %v4416_v24 = vld [vmem:[%s6609_s26 + $0x7a] sm:$0xff] }
 0x15f   : > { %v6683_v22 = vpack.i.bf16 %v4410_v20, %v4409_v19  ;;  %v4413_v25 = vld [vmem:[%s6609_s26 + $0x62] sm:$0xff]  ;;  %v4414_v26 = vld [vmem:[%s6609_s26 + $0x6a] sm:$0xff]  ;;  %v6691_v27 = vpack.i.bf16 %v4416_v24, %v4415_v23  ;;  %v4420_v29 = vld [vmem:[%s6609_s26 + $0x13] sm:$0xff] }
 0x160   : > { %5171 = vrot.lane.b32.xlu1 %v6634_v59, %s6213_s27  ;;  %v6695_v28 = vpack.i.bf16 %v4414_v26, %v4413_v25  ;;  %v4421_v30 = vld [vmem:[%s6609_s26 + $0x1b] sm:$0xff]  ;;  %v4418_v31 = vld [vmem:[%s6609_s26 + $0x3] sm:$0xff]  ;;  %v4419_v32 = vld [vmem:[%s6609_s26 + $0xb] sm:$0xff] }
 0x161   : > { %5166 = vrot.lane.b32.xlu0 %v6638_v60, %s6213_s27  ;;  %v4424_v33 = vld [vmem:[%s6609_s26 + $0x33] sm:$0xff]  ;;  %v4425_v34 = vld [vmem:[%s6609_s26 + $0x3b] sm:$0xff]  ;;  %v6705_v35 = vpack.i.bf16 %v4421_v30, %v4420_v29  ;;  %v4422_v36 = vld [vmem:[%s6609_s26 + $0x23] sm:$0xff]  ;;  %v5225_v38 = vpack.i.bf16 %v4419_v32, %v4418_v31 }
 0x162   : > { %v4423_v37 = vld [vmem:[%s6609_s26 + $0x2b] sm:$0xff]  ;;  %v6713_v39 = vpack.i.bf16 %v4425_v34, %v4424_v33  ;;  %v4428_v40 = vld [vmem:[%s6609_s26 + $0x53] sm:$0xff]  ;;  %v4429_v42 = vld [vmem:[%s6609_s26 + $0x5b] sm:$0xff] }
 0x163   : > { %v6717_v41 = vpack.i.bf16 %v4423_v37, %v4422_v36  ;;  %v4426_v44 = vld [vmem:[%s6609_s26 + $0x43] sm:$0xff]  ;;  %v4427_v45 = vld [vmem:[%s6609_s26 + $0x4b] sm:$0xff]  ;;  %v6724_v46 = vpack.i.bf16 %v4429_v42, %v4428_v40  ;;  %v4432_v49 = vld [vmem:[%s6609_s26 + $0x73] sm:$0xff] }
 0x164   : > { %5181 = vrot.lane.b32.xlu1 %v6646_v3, %s6213_s27  ;;  %v6728_v48 = vpack.i.bf16 %v4427_v45, %v4426_v44  ;;  %v4433_v50 = vld [vmem:[%s6609_s26 + $0x7b] sm:$0xff]  ;;  %v4430_v51 = vld [vmem:[%s6609_s26 + $0x63] sm:$0xff]  ;;  %v4431_v52 = vld [vmem:[%s6609_s26 + $0x6b] sm:$0xff] }
 0x165   : > { %5176 = vrot.lane.b32.xlu0 %v6650_v4, %s6213_s27  ;;  %v6736_v53 = vpack.i.bf16 %v4433_v50, %v4432_v49  ;;  %v6740_v56 = vpack.i.bf16 %v4431_v52, %v4430_v51  ;;  %v4437_v0 = vld [vmem:[%s6609_s26 + $0x14] sm:$0xff]  ;;  %v4438_v57 = vld [vmem:[%s6609_s26 + $0x1c] sm:$0xff]  ;;  %v4435_v58 = vld [vmem:[%s6609_s26 + $0x4] sm:$0xff] }
 0x166   : > { %v4436_v61 = vld [vmem:[%s6609_s26 + $0xc] sm:$0xff]  ;;  %v6748_v62 = vpack.i.bf16 %v4438_v57, %v4437_v0  ;;  %v4441_v2 = vld [vmem:[%s6609_s26 + $0x34] sm:$0xff]  ;;  %v4442_v5 = vld [vmem:[%s6609_s26 + $0x3c] sm:$0xff] }
 0x167   : > { %v5265_v63 = vpack.i.bf16 %v4436_v61, %v4435_v58  ;;  %v4439_v6 = vld [vmem:[%s6609_s26 + $0x24] sm:$0xff]  ;;  %v4440_v7 = vld [vmem:[%s6609_s26 + $0x2c] sm:$0xff]  ;;  %v6758_v8 = vpack.i.bf16 %v4442_v5, %v4441_v2  ;;  %v4445_v11 = vld [vmem:[%s6609_s26 + $0x54] sm:$0xff] }
 0x168   : > { %5191 = vrot.lane.b32.xlu1 %v6658_v9, %s6214_s28  ;;  %v4446_v12 = vld [vmem:[%s6609_s26 + $0x5c] sm:$0xff]  ;;  %v4443_v13 = vld [vmem:[%s6609_s26 + $0x44] sm:$0xff]  ;;  %v4444_v14 = vld [vmem:[%s6609_s26 + $0x4c] sm:$0xff] }
 0x169   : > { %5186 = vrot.lane.b32.xlu0 %v5185_v10, %s6214_s28  ;;  %v6761_v10 = vpack.i.bf16 %v4440_v7, %v4439_v6  ;;  %v6769_v17 = vpack.i.bf16 %v4446_v12, %v4445_v11  ;;  %v6773_v18 = vpack.i.bf16 %v4444_v14, %v4443_v13  ;;  %v4449_v19 = vld [vmem:[%s6609_s26 + $0x74] sm:$0xff]  ;;  %v4450_v20 = vld [vmem:[%s6609_s26 + $0x7c] sm:$0xff]  ;;  %v4447_v23 = vld [vmem:[%s6609_s26 + $0x64] sm:$0xff] }
 0x16a   : > { %v4448_v24 = vld [vmem:[%s6609_s26 + $0x6c] sm:$0xff]  ;;  %v6781_v25 = vpack.i.bf16 %v4450_v20, %v4449_v19  ;;  %v6788_v29 = vld [vmem:[%s6609_s26 + $0x20] sm:$0xff]  ;;  %v6797_v32 = vld [vmem:[%s6609_s26 + $0x18] sm:$0xff] }
 0x16b   : > { %v6785_v26 = vpack.i.bf16 %v4448_v24, %v4447_v23  ;;  %v6791_v30 = vld [vmem:[%s6609_s26 + $0x28] sm:$0xff]  ;;  %v6794_v31 = vld [vmem:[%s6609_s26 + $0x10] sm:$0xff]  ;;  %v6810_v36 = vld [vmem:[%s6609_s26 + $0x40] sm:$0xff] }
 0x16c   : > { %5201 = vrot.lane.b32.xlu1 %v6668_v15, %s6214_s28  ;;  %v6803_v33 = vpack.i.bf16 %v6791_v30, %v6788_v29  ;;  %v5305_v34 = vpack.i.bf16 %v6797_v32, %v6794_v31  ;;  %v6813_v37 = vld [vmem:[%s6609_s26 + $0x48] sm:$0xff]  ;;  %v6819_v40 = vld [vmem:[%s6609_s26 + $0x38] sm:$0xff]  ;;  %v6833_v45 = vld [vmem:[%s6609_s26 + $0x60] sm:$0xff] }
 0x16d   : > { %5196 = vrot.lane.b32.xlu0 %v6671_v16, %s6214_s28  ;;  %v6825_v42 = vpack.i.bf16 %v6813_v37, %v6810_v36  ;;  %v6836_v49 = vld [vmem:[%s6609_s26 + $0x68] sm:$0xff]  ;;  %v6839_v50 = vld [vmem:[%s6609_s26 + $0x50] sm:$0xff]  ;;  %v6842_v51 = vld [vmem:[%s6609_s26 + $0x58] sm:$0xff] }
 0x16e   : > { %v6848_v52 = vpack.i.bf16 %v6836_v49, %v6833_v45  ;;  %v6854_v0 = vpack.i.bf16 %v6842_v51, %v6839_v50  ;;  %v4466_v57 = vld [vmem:[%s6609_s26 + $0x80] sm:$0xff]  ;;  %v4467_v58 = vld [vmem:[%s6609_s26 + $0x88] sm:$0xff]  ;;  %v6859_v61 = vld [vmem:[%s6609_s26 + $0x70] sm:$0xff] }
 0x16f   : > { %v6866_v2 = vpack.i.bf16 %v4467_v58, %v4466_v57  ;;  %v4483_v6 = vld [vmem:[%s6609_s26 + $0x81] sm:$0xff]  ;;  %v4484_v7 = vld [vmem:[%s6609_s26 + $0x89] sm:$0xff] }
 0x170   : > { %5211 = vrot.lane.b32.xlu1 %v6679_v21, %s6214_s28  ;;  %v6890_v11 = vpack.i.bf16 %v4484_v7, %v4483_v6  ;;  %v4501_v12 = vld [vmem:[%s6609_s26 + $0x8a] sm:$0xff]  ;;  %v4552_v7 = vld [vmem:[%s6609_s26 + $0x98] sm:$0xff] }
 0x171   : > { %5206 = vrot.lane.b32.xlu0 %v6683_v22, %s6214_s28  ;;  %v4517_v14 = vld [vmem:[%s6609_s26 + $0x83] sm:$0xff]  ;;  %v4518_v19 = vld [vmem:[%s6609_s26 + $0x8b] sm:$0xff]  ;;  %v4586_v1 = vld [vmem:[%s6609_s26 + $0x9a] sm:$0xff] }
 0x172   : > { %v4534_v24 = vld [vmem:[%s6609_s26 + $0x84] sm:$0xff]  ;;  %v4551_v6 = vld [vmem:[%s6609_s26 + $0x90] sm:$0xff] }
 0x174   : > { %5221 = vrot.lane.b32.xlu1 %v6691_v27, %s6214_s28 }
 0x175   : > { %5216 = vrot.lane.b32.xlu0 %v6695_v28, %s6214_s28 }
 0x178   : > { %5231 = vrot.lane.b32.xlu1 %v6705_v35, %s6215_s29 }
 0x179   : > { %5226 = vrot.lane.b32.xlu0 %v5225_v38, %s6215_s29  ;;  %v6816_v38 = vld [vmem:[%s6609_s26 + $0x30] sm:$0xff] }
 0x17a   : > { %v6830_v44 = vpack.i.bf16 %v6819_v40, %v6816_v38 }
 0x17c   : > { %5241 = vrot.lane.b32.xlu1 %v6713_v39, %s6215_s29 }
 0x17d   : > { %5236 = vrot.lane.b32.xlu0 %v6717_v41, %s6215_s29 }
 0x180   : > { %5251 = vrot.lane.b32.xlu1 %v6724_v46, %s6215_s29 }
 0x181   : > { %5246 = vrot.lane.b32.xlu0 %v6728_v48, %s6215_s29 }
 0x184   : > { %5261 = vrot.lane.b32.xlu1 %v6736_v53, %s6215_s29 }
 0x185   : > { %5256 = vrot.lane.b32.xlu0 %v6740_v56, %s6215_s29 }
 0x188   : > { %5271 = vrot.lane.b32.xlu1 %v6748_v62, %s6216_s30 }
 0x189   : > { %5266 = vrot.lane.b32.xlu0 %v5265_v63, %s6216_s30  ;;  %v6862_v63 = vld [vmem:[%s6609_s26 + $0x78] sm:$0xff] }
 0x18a   : > { %v6872_v5 = vpack.i.bf16 %v6862_v63, %v6859_v61 }
 0x18c   : > { %5281 = vrot.lane.b32.xlu1 %v6758_v8, %s6216_s30 }
 0x18d   : > { %5276 = vrot.lane.b32.xlu0 %v6761_v10, %s6216_s30 }
 0x190   : > { %5291 = vrot.lane.b32.xlu1 %v6769_v17, %s6216_s30 }
 0x191   : > { %5286 = vrot.lane.b32.xlu0 %v6773_v18, %s6216_s30 }
 0x194   : > { %5301 = vrot.lane.b32.xlu1 %v6781_v25, %s6216_s30 }
 0x195   : > { %5296 = vrot.lane.b32.xlu0 %v6785_v26, %s6216_s30 }
 0x198   : > { %5311 = vrot.lane.b32.xlu1 %v6803_v33, %s6217_s8 }
 0x199   : > { %5306 = vrot.lane.b32.xlu0 %v5305_v34, %s6217_s8  ;;  %v4535_v34 = vld [vmem:[%s6609_s26 + $0x8c] sm:$0xff] }
 0x19c   : > { %5321 = vrot.lane.b32.xlu1 %v6825_v42, %s6217_s8 }
 0x19d   : > { %5316 = vrot.lane.b32.xlu0 %v6830_v44, %s6217_s8 }
 0x1a0   : > { %5331 = vrot.lane.b32.xlu1 %v6848_v52, %s6217_s8 }
 0x1a1   : > { %5326 = vrot.lane.b32.xlu0 %v6854_v0, %s6217_s8 }
 0x1a4   : > { %5341 = vrot.lane.b32.xlu1 %v6866_v2, %s6217_s8 }
 0x1a5   : > { %5336 = vrot.lane.b32.xlu0 %v6872_v5, %s6217_s8 }
 0x1a8   : > { %5351 = vrot.lane.b32.xlu1 %v6614_v47, %s6218_s9 }
 0x1a9   : > { %5346 = vrot.lane.b32.xlu0 %v6626_v55, %s6218_s9  ;;  %v4500_v55 = vld [vmem:[%s6609_s26 + $0x82] sm:$0xff] }
 0x1aa   : > { %v6910_v13 = vpack.i.bf16 %v4501_v12, %v4500_v55 }
 0x1ac   : > { %5361 = vrot.lane.b32.xlu1 %v6638_v60, %s6218_s9 }
 0x1ad   : > { %5356 = vrot.lane.b32.xlu0 %v6623_v54, %s6218_s9 }
 0x1b0   : > { %5371 = vrot.lane.b32.xlu1 %v6650_v4, %s6218_s9 }
 0x1b1   : > { %5366 = vrot.lane.b32.xlu0 %v6634_v59, %s6218_s9 }
 0x1b4   : > { %5381 = vrot.lane.b32.xlu1 %v6890_v11, %s6218_s9 }
 0x1b5   : > { %5376 = vrot.lane.b32.xlu0 %v6646_v3, %s6218_s9 }
 0x1b8   : > { %5391 = vrot.lane.b32.xlu1 %v6671_v16, %s6219_s10 }
 0x1b9   : > { %5386 = vrot.lane.b32.xlu0 %v6658_v9, %s6219_s10 }
 0x1bc   : > { %5401 = vrot.lane.b32.xlu1 %v6683_v22, %s6219_s10 }
 0x1bd   : > { %5396 = vrot.lane.b32.xlu0 %v6668_v15, %s6219_s10 }
 0x1c0   : > { %5411 = vrot.lane.b32.xlu1 %v6695_v28, %s6219_s10 }
 0x1c1   : > { %5406 = vrot.lane.b32.xlu0 %v6679_v21, %s6219_s10 }
 0x1c4   : > { %5421 = vrot.lane.b32.xlu1 %v6910_v13, %s6219_s10 }
 0x1c5   : > { %5416 = vrot.lane.b32.xlu0 %v6691_v27, %s6219_s10 }
 0x1c8   : > { %5431 = vrot.lane.b32.xlu1 %v6717_v41, %s6220_s11 }
 0x1c9   : > { %5426 = vrot.lane.b32.xlu0 %v6705_v35, %s6220_s11  ;;  %v6938_v35 = vpack.i.bf16 %v4518_v19, %v4517_v14  ;;  %v4568_v14 = vld [vmem:[%s6609_s26 + $0x91] sm:$0xff] }
 0x1ca   : > { %v6922_v9 = vpop.permute.xlu1 %5156 }
 0x1cb   : > { %v6924_v28 = vpop.permute.xlu0 %5146 }
 0x1cc   : > { %5441 = vrot.lane.b32.xlu1 %v6728_v48, %s6220_s11 }
 0x1cd   : > { %5436 = vrot.lane.b32.xlu0 %v6713_v39, %s6220_s11 }
 0x1ce   : > { %v6932_v27 = vpop.permute.xlu1 %5161 }
 0x1cf   : > { %v6934_v20 = vpop.permute.xlu0 %5151 }
 0x1d0   : > { %5451 = vrot.lane.b32.xlu1 %v6740_v56, %s6220_s11 }
 0x1d1   : > { %5446 = vrot.lane.b32.xlu0 %v6724_v46, %s6220_s11 }
 0x1d2   : > { %v6942_v41 = vpop.permute.xlu1 %5171 }
 0x1d3   : > { %v6944_v48 = vpop.permute.xlu0 %5166 }
 0x1d4   : > { %5461 = vrot.lane.b32.xlu1 %v6938_v35, %s6220_s11 }
 0x1d5   : > { %5456 = vrot.lane.b32.xlu0 %v6736_v53, %s6220_s11 }
 0x1d6   : > { %v6950_v39 = vpop.permute.xlu1 %5181 }
 0x1d7   : > { %v6952_v56 = vpop.permute.xlu0 %5176 }
 0x1d8   : > { %5471 = vrot.lane.b32.xlu1 %v6761_v10, %s6221_s12  ;;  %v6969_v10 = vpack.i.bf16 %v4535_v34, %v4534_v24 }
 0x1d9   : > { %5466 = vrot.lane.b32.xlu0 %v6748_v62, %s6221_s12 }
 0x1da   : > { %v6956_v46 = vpop.permute.xlu1 %5191 }
 0x1db   : > { %v6958_v23 = vpop.permute.xlu0 %5186 }
 0x1dc   : > { %5481 = vrot.lane.b32.xlu1 %v6773_v18, %s6221_s12 }
 0x1dd   : > { %5476 = vrot.lane.b32.xlu0 %v6758_v8, %s6221_s12 }
 0x1de   : > { %v6964_v53 = vpop.permute.xlu1 %5201 }
 0x1df   : > { %v6966_v57 = vpop.permute.xlu0 %5196 }
 0x1e0   : > { %5491 = vrot.lane.b32.xlu1 %v6785_v26, %s6221_s12 }
 0x1e1   : > { %5486 = vrot.lane.b32.xlu0 %v6769_v17, %s6221_s12 }
 0x1e2   : > { %v6972_v62 = vpop.permute.xlu1 %5211 }
 0x1e3   : > { %v6974_v58 = vpop.permute.xlu0 %5206 }
 0x1e4   : > { %8912 = vst [vmem:[#allocation10_spill] sm:$0xff] %v6974_v58  ;;  %5501 = vrot.lane.b32.xlu1 %v6969_v10, %s6221_s12 }
 0x1e5   : > { %5496 = vrot.lane.b32.xlu0 %v6781_v25, %s6221_s12 }
 0x1e6   : > { %v6978_v8 = vpop.permute.xlu1 %5221 }
 0x1e7   : > { %v6980_v18 = vpop.permute.xlu0 %5216 }
 0x1e8   : > { %5511 = vrot.lane.b32.xlu1 %v6830_v44, %s6222_s13  ;;  %v6997_v44 = vpack.i.bf16 %v4552_v7, %v4551_v6  ;;  %v4579_v7 = vld [vmem:[%s6609_s26 + $0x62] sm:$0xff] }
 0x1e9   : > { %5506 = vrot.lane.b32.xlu0 %v6803_v33, %s6222_s13 }
 0x1ea   : > { %v6984_v26 = vpop.permute.xlu1 %5231  ;;  %8914 = vst [vmem:[#allocation12_spill] sm:$0xff] %v6997_v44 }
 0x1eb   : > { %v6986_v17 = vpop.permute.xlu0 %5226 }
 0x1ec   : > { %8913 = vst [vmem:[#allocation11_spill] sm:$0xff] %v6986_v17  ;;  %5521 = vrot.lane.b32.xlu1 %v6854_v0, %s6222_s13 }
 0x1ed   : > { %5516 = vrot.lane.b32.xlu0 %v6825_v42, %s6222_s13 }
 0x1ee   : > { %v6992_v25 = vpop.permute.xlu1 %5241 }
 0x1ef   : > { %v6994_v55 = vpop.permute.xlu0 %5236 }
 0x1f0   : > { %5531 = vrot.lane.b32.xlu1 %v6872_v5, %s6222_s13 }
 0x1f1   : > { %5526 = vrot.lane.b32.xlu0 %v6848_v52, %s6222_s13 }
 0x1f2   : > { %v7000_v33 = vpop.permute.xlu1 %5251 }
 0x1f3   : > { %v7002_v12 = vpop.permute.xlu0 %5246 }
 0x1f4   : > { %8915 = vst [vmem:[#allocation13_spill] sm:$0xff] %v7002_v12  ;;  %5541 = vrot.lane.b32.xlu1 %v6997_v44, %s6222_s13  ;;  %v8872_v44 = vmov 0   ;;  %v7288_v12 = vld [vmem:[%s6609_s26 + $0x30] sm:$0xff] }
 0x1f5   : > { %5536 = vrot.lane.b32.xlu0 %v6866_v2, %s6222_s13  ;;  %v4569_v2 = vld [vmem:[%s6609_s26 + $0x99] sm:$0xff]  ;;  %3245 = vmatprep.subr.bf16.mxu0 %v8872_v44  ;;  %s6227_s13 = smov 112  }
 0x1f6   : > { %v7006_v42 = vpop.permute.xlu1 %5261  ;;  %5039 = vmatprep.subr.bf16.mxu1 %v8872_v44 }
 0x1f7   : > { %v7008_v0 = vpop.permute.xlu0 %5256 }
 0x1f8   : > { %8916 = vst [vmem:[#allocation14_spill] sm:$0xff] %v7008_v0  ;;  %5551 = vrot.lane.b32.xlu1 %v6623_v54, %s6223_s14  ;;  %v7291_v0 = vld [vmem:[%s6609_s26 + $0x38] sm:$0xff] }
 0x1f9   : > { %5546 = vrot.lane.b32.xlu0 %v6614_v47, %s6223_s14  ;;  %v7025_v47 = vpack.i.bf16 %v4569_v2, %v4568_v14  ;;  %v4580_v14 = vld [vmem:[%s6609_s26 + $0x6a] sm:$0xff] }
 0x1fa   : > { %v7012_v5 = vpop.permute.xlu1 %5271 }
 0x1fb   : > { %8917 = vst [vmem:[#allocation15_spill] sm:$0xff] %v7012_v5  ;;  %v7014_v52 = vpop.permute.xlu0 %5266  ;;  %8921 = vst [vmem:[#allocation19_spill] sm:$0xff] %v7025_v47 }
 0x1fc   : > { %8918 = vst [vmem:[#allocation16_spill] sm:$0xff] %v7014_v52  ;;  %5561 = vrot.lane.b32.xlu1 %v6634_v59, %s6223_s14 }
 0x1fd   : > { %5556 = vrot.lane.b32.xlu0 %v6638_v60, %s6223_s14 }
 0x1fe   : > { %v7020_v19 = vpop.permute.xlu1 %5281 }
 0x1ff   : > { %8919 = vst [vmem:[#allocation17_spill] sm:$0xff] %v7020_v19  ;;  %v7022_v24 = vpop.permute.xlu0 %5276  ;;  %v4631_v19 = vld [vmem:[%s6609_s26 + $0x78] sm:$0xff] }
 0x200   : > { %8920 = vst [vmem:[#allocation18_spill] sm:$0xff] %v7022_v24  ;;  %5571 = vrot.lane.b32.xlu1 %v6646_v3, %s6223_s14  ;;  %v4581_v3 = vld [vmem:[%s6609_s26 + $0x72] sm:$0xff] }
 0x201   : > { %5566 = vrot.lane.b32.xlu0 %v6650_v4, %s6223_s14  ;;  %v4582_v4 = vld [vmem:[%s6609_s26 + $0x7a] sm:$0xff]  ;;  %v4630_v24 = vld [vmem:[%s6609_s26 + $0x70] sm:$0xff] }
 0x202   : > { %v7028_v54 = vpop.permute.xlu1 %5291  ;;  %v7049_v2 = vpack.i.bf16 %v4582_v4, %v4581_v3  ;;  %v4589_v4 = vld [vmem:[%s6609_s26 + $0x2b] sm:$0xff] }
 0x203   : > { %8922 = vst [vmem:[#allocation20_spill] sm:$0xff] %v7028_v54  ;;  %v7030_v59 = vpop.permute.xlu0 %5286  ;;  %v7270_v54 = vld [vmem:[%s6609_s26 + $0x4c] sm:$0xff] }
 0x204   : > { %8923 = vst [vmem:[#allocation21_spill] sm:$0xff] %v7030_v59  ;;  %5581 = vrot.lane.b32.xlu1 %v7025_v47, %s6223_s14  ;;  %v4595_v47 = vld [vmem:[%s6609_s26 + $0x5b] sm:$0xff] }
 0x205   : > { %5576 = vrot.lane.b32.xlu0 %v6890_v11, %s6223_s14 }
 0x206   : > { %v7034_v60 = vpop.permute.xlu1 %5301 }
 0x207   : > { %8924 = vst [vmem:[#allocation22_spill] sm:$0xff] %v7034_v60  ;;  %v7036_v34 = vpop.permute.xlu0 %5296 }
 0x208   : > { %8925 = vst [vmem:[#allocation23_spill] sm:$0xff] %v7036_v34  ;;  %5591 = vrot.lane.b32.xlu1 %v6668_v15, %s6224_s15  ;;  %v5605_v15 = vpack.i.bf16 %v4580_v14, %v4579_v7  ;;  %v800_v34 = vld [vmem:[%s6609_s26] sm:$0xff] }
 0x209   : > { %5586 = vrot.lane.b32.xlu0 %v6671_v16, %s6224_s15  ;;  %v4585_v16 = vld [vmem:[%s6609_s26 + $0x92] sm:$0xff] }
 0x20a   : > { %v7042_v6 = vpop.permute.xlu1 %5311  ;;  %v7059_v52 = vpack.i.bf16 %v4586_v1, %v4585_v16  ;;  %v6065_v1 = vld [vmem:[%s8826_s2] sm:$0xff]   ;;  %v4594_v16 = vld [vmem:[%s6609_s26 + $0x53] sm:$0xff] }
 0x20b   : > { %8926 = vst [vmem:[#allocation24_spill] sm:$0xff] %v7042_v6  ;;  %v7046_v11 = vpop.permute.xlu0 %5306  ;;  %3246 = vmatpush1.bf16.msra.mxu0 %v6065_v1  ;;  %5052 = vmatpush1.bf16.msra.mxu1 %v6065_v1  ;;  %v4599_v1 = vld [vmem:[%s6609_s26 + $0x7b] sm:$0xff]  ;;  %v4613_v6 = vld [vmem:[%s6609_s26 + $0x64] sm:$0xff] }
 0x20c   : > { %8927 = vst [vmem:[#allocation25_spill] sm:$0xff] %v7046_v11  ;;  %5601 = vrot.lane.b32.xlu1 %v6679_v21, %s6224_s15  ;;  %8930 = vst [vmem:[#allocation28_spill] sm:$0xff] %v7059_v52  ;;  %v4590_v11 = vld [vmem:[%s6609_s26 + $0x33] sm:$0xff]  ;;  %v4591_v21 = vld [vmem:[%s6609_s26 + $0x3b] sm:$0xff]  ;;  %3247 = vmatprep.subr.bf16.mxu0 %v8872_v44 }
 0x20d   : > { %5596 = vrot.lane.b32.xlu0 %v6683_v22, %s6224_s15  ;;  %v4588_v22 = vld [vmem:[%s6609_s26 + $0x23] sm:$0xff]  ;;  %v7070_v14 = vpack.i.bf16 %v4591_v21, %v4590_v11  ;;  %5040 = vmatprep.subr.bf16.mxu1 %v8872_v44 }
 0x20e   : > { %v7054_v43 = vpop.permute.xlu1 %5321  ;;  %v6066_v21 = vld [vmem:[%s8826_s2 + $0x8] sm:$0xff]  }
 0x20f   : > { %8928 = vst [vmem:[#allocation26_spill] sm:$0xff] %v7054_v43  ;;  %v7056_v59 = vpop.permute.xlu0 %5316  ;;  %3248 = vmatpush1.bf16.msra.mxu0 %v6066_v21  ;;  %5053 = vmatpush1.bf16.msra.mxu1 %v6066_v21  ;;  %v4603_v21 = vld [vmem:[%s6609_s26 + $0x9b] sm:$0xff] }
 0x210   : > { %8929 = vst [vmem:[#allocation27_spill] sm:$0xff] %v7056_v59  ;;  %5611 = vrot.lane.b32.xlu1 %v7049_v2, %s6224_s15  ;;  %v4597_v59 = vld [vmem:[%s6609_s26 + $0x6b] sm:$0xff]  ;;  %3249 = vmatprep.subr.bf16.mxu0 %v8872_v44  ;;  %v4657_v43 = vld [vmem:[%s6609_s26 + $0x3a] sm:$0xff] }
 0x211   : > { %5606 = vrot.lane.b32.xlu0 %v5605_v15, %s6224_s15  ;;  %v5625_v15 = vpack.i.bf16 %v4589_v4, %v4588_v22  ;;  %v4598_v4 = vld [vmem:[%s6609_s26 + $0x73] sm:$0xff]  ;;  %5041 = vmatprep.subr.bf16.mxu1 %v8872_v44 }
 0x212   : > { %v7063_v3 = vpop.permute.xlu1 %5331 }
 0x213   : > { %8931 = vst [vmem:[#allocation29_spill] sm:$0xff] %v7063_v3  ;;  %v7067_v7 = vpop.permute.xlu0 %5326 }
 0x214   : > { %8932 = vst [vmem:[#allocation30_spill] sm:$0xff] %v7067_v7  ;;  %5621 = vrot.lane.b32.xlu1 %v7059_v52, %s6224_s15  ;;  %v4592_v7 = vld [vmem:[%s6609_s26 + $0x43] sm:$0xff]  ;;  %v4593_v52 = vld [vmem:[%s6609_s26 + $0x4b] sm:$0xff] }
 0x215   : > { %5616 = vrot.lane.b32.xlu0 %v6910_v13, %s6224_s15  ;;  %v7089_v13 = vpack.i.bf16 %v4595_v47, %v4594_v16  ;;  %v7096_v22 = vpack.i.bf16 %v4593_v52, %v4592_v7  ;;  %v6067_v52 = vld [vmem:[%s8826_s2 + $0x10] sm:$0xff]  }
 0x216   : > { %v7079_v3 = vpop.permute.xlu1 %5341  ;;  %v4602_v16 = vld [vmem:[%s6609_s26 + $0x93] sm:$0xff]  ;;  %3250 = vmatpush1.bf16.msra.mxu0 %v6067_v52  ;;  %5054 = vmatpush1.bf16.msra.mxu1 %v6067_v52  ;;  %v4608_v52 = vld [vmem:[%s6609_s26 + $0x3c] sm:$0xff] }
 0x217   : > { %8933 = vst [vmem:[#allocation31_spill] sm:$0xff] %v7079_v3  ;;  %v7084_v11 = vpop.permute.xlu0 %5336  ;;  %8935 = vst [vmem:[#allocation33_spill] sm:$0xff] %v7089_v13  ;;  %v4596_v3 = vld [vmem:[%s6609_s26 + $0x63] sm:$0xff]  ;;  %3251 = vmatprep.subr.bf16.mxu0 %v8872_v44  ;;  %5042 = vmatprep.subr.bf16.mxu1 %v8872_v44 }
 0x218   : > { %8934 = vst [vmem:[#allocation32_spill] sm:$0xff] %v7084_v11  ;;  %5631 = vrot.lane.b32.xlu1 %v7070_v14, %s6226_s18  ;;  %v7117_v7 = vpack.i.bf16 %v4597_v59, %v4596_v3  ;;  %v6068_v59 = vld [vmem:[%s8826_s2 + $0x18] sm:$0xff]  }
 0x219   : > { %5626 = vrot.lane.b32.xlu0 %v5625_v15, %s6226_s18  ;;  %v7109_v15 = vpack.i.bf16 %v4599_v1, %v4598_v4  ;;  %v7128_v1 = vpack.i.bf16 %v4603_v21, %v4602_v16  ;;  %v4607_v3 = vld [vmem:[%s6609_s26 + $0x34] sm:$0xff]  ;;  %v4606_v16 = vld [vmem:[%s6609_s26 + $0x2c] sm:$0xff] }
 0x21a   : > { %v7100_v11 = vpop.permute.xlu1 %5351  ;;  %8938 = vst [vmem:[#allocation36_spill] sm:$0xff] %v7117_v7  ;;  %3252 = vmatpush1.bf16.msra.mxu0 %v6068_v59  ;;  %5055 = vmatpush1.bf16.msra.mxu1 %v6068_v59  ;;  %v7158_v59 = vld [vmem:[%s6609_s26 + $0x44] sm:$0xff] }
 0x21b   : > { %8936 = vst [vmem:[#allocation34_spill] sm:$0xff] %v7100_v11  ;;  %v7104_v47 = vpop.permute.xlu0 %5346  ;;  %8941 = vst [vmem:[#allocation39_spill] sm:$0xff] %v7128_v1  ;;  %v4605_v11 = vld [vmem:[%s6609_s26 + $0x24] sm:$0xff]  ;;  %3253 = vmatprep.subr.bf16.mxu0 %v8872_v44  ;;  %5043 = vmatprep.subr.bf16.mxu1 %v8872_v44 }
 0x21c   : > { %8937 = vst [vmem:[#allocation35_spill] sm:$0xff] %v7104_v47  ;;  %5641 = vrot.lane.b32.xlu1 %v7089_v13, %s6226_s18 }
 0x21d   : > { %5636 = vrot.lane.b32.xlu0 %v7096_v22, %s6226_s18 }
 0x21e   : > { %v7121_v47 = vpop.permute.xlu1 %5361 }
 0x21f   : > { %8939 = vst [vmem:[#allocation37_spill] sm:$0xff] %v7121_v47  ;;  %v7123_v4 = vpop.permute.xlu0 %5356  ;;  %v4656_v47 = vld [vmem:[%s6609_s26 + $0x32] sm:$0xff] }
 0x220   : > { %8940 = vst [vmem:[#allocation38_spill] sm:$0xff] %v7123_v4  ;;  %5651 = vrot.lane.b32.xlu1 %v7109_v15, %s6226_s18  ;;  %v5665_v4 = vpack.i.bf16 %v4606_v16, %v4605_v11  ;;  %v5675_v11 = vpack.i.bf16 %v4613_v6, %v7158_v59  ;;  %v4707_v16 = vld [vmem:[%s6609_s26 + $0x40] sm:$0xff] }
 0x221   : > { %5646 = vrot.lane.b32.xlu0 %v7117_v7, %s6226_s18  ;;  %v5670_v7 = vpack.i.bf16 %v4608_v52, %v4607_v3  ;;  %v5680_v3 = vpack.i.bf16 %v4657_v43, %v4656_v47  ;;  %v6071_v43 = vld [vmem:[%s8826_s2 + $0x30] sm:$0xff]  }
 0x222   : > { %v7138_v13 = vpop.permute.xlu1 %5371 }
 0x223   : > { %8942 = vst [vmem:[#allocation40_spill] sm:$0xff] %v7138_v13  ;;  %v7142_v21 = vpop.permute.xlu0 %5366  ;;  %v6069_v13 = vld [vmem:[%s8826_s2 + $0x20] sm:$0xff]  }
 0x224   : > { %8943 = vst [vmem:[#allocation41_spill] sm:$0xff] %v7142_v21  ;;  %5661 = vrot.lane.b32.xlu1 %v7128_v1, %s6226_s18  ;;  %3254 = vmatpush1.bf16.msra.mxu0 %v6069_v13 }
 0x225   : > { %5656 = vrot.lane.b32.xlu0 %v6938_v35, %s6226_s18  ;;  %5056 = vmatpush1.bf16.msra.mxu1 %v6069_v13  ;;  %v6070_v35 = vld [vmem:[%s8826_s2 + $0x28] sm:$0xff]  }
 0x226   : > { %v7155_v21 = vpop.permute.xlu1 %5381  ;;  %3255 = vmatprep.subr.bf16.mxu0 %v8872_v44  ;;  %5044 = vmatprep.subr.bf16.mxu1 %v8872_v44 }
 0x227   : > { %8944 = vst [vmem:[#allocation42_spill] sm:$0xff] %v7155_v21  ;;  %v7161_v1 = vpop.permute.xlu0 %5376  ;;  %v5148_v21 = vunpack.i.l.bf16 %v6924_v28 }
 0x228   : > { %8945 = vst [vmem:[#allocation43_spill] sm:$0xff] %v7161_v1  ;;  %5671 = vrot.lane.b32.xlu1 %v5670_v7, %s6227_s13  ;;  %3256 = vmatpush1.bf16.msra.mxu0 %v6070_v35  ;;  %v4732_v1 = vld [vmem:[%s6609_s26 + $0x81] sm:$0xff] }
 0x229   : > { %5666 = vrot.lane.b32.xlu0 %v5665_v4, %s6227_s13  ;;  %5057 = vmatpush1.bf16.msra.mxu1 %v6070_v35  ;;  %v6072_v4 = vld [vmem:[%s8826_s2 + $0x38] sm:$0xff]  }
 0x22a   : > { %v7171_v52 = vpop.permute.xlu1 %5391  ;;  %3257 = vmatprep.subr.bf16.mxu0 %v8872_v44  ;;  %5045 = vmatprep.subr.bf16.mxu1 %v8872_v44 }
 0x22b   : > { %8946 = vst [vmem:[#allocation44_spill] sm:$0xff] %v7171_v52  ;;  %v7173_v13 = vpop.permute.xlu0 %5386 }
 0x22c   : > { %8947 = vst [vmem:[#allocation45_spill] sm:$0xff] %v7173_v13  ;;  %5681 = vrot.lane.b32.xlu1 %v5680_v3, %s6213_s27  ;;  %3258 = vmatpush1.bf16.msra.mxu0 %v6071_v43  ;;  %v4708_v3 = vld [vmem:[%s6609_s26 + $0x48] sm:$0xff]  ;;  %v6073_v13 = vld [vmem:[%s8826_s2 + $0x40] sm:$0xff]  }
 0x22d   : > { %5676 = vrot.lane.b32.xlu0 %v5675_v11, %s6227_s13  ;;  %5058 = vmatpush1.bf16.msra.mxu1 %v6071_v43  ;;  %v7200_v11 = vld [vmem:[%s6609_s26 + $0x74] sm:$0xff] }
 0x22e   : > { %v7182_v6 = vpop.permute.xlu1 %5401  ;;  %3259 = vmatprep.subr.bf16.mxu0 %v8872_v44  ;;  %5046 = vmatprep.subr.bf16.mxu1 %v8872_v44 }
 0x22f   : > { %8948 = vst [vmem:[#allocation46_spill] sm:$0xff] %v7182_v6  ;;  %v7184_v47 = vpop.permute.xlu0 %5396 }
 0x230   : > { %8949 = vst [vmem:[#allocation47_spill] sm:$0xff] %v7184_v47  ;;  %5691 = vrot.lane.b32.xlu1 %v7070_v14, %s6214_s28  ;;  %v7203_v14 = vld [vmem:[%s6609_s26 + $0x7c] sm:$0xff]  ;;  %3260 = vmatpush1.bf16.msra.mxu0 %v6072_v4 }
 0x231   : > { %5686 = vrot.lane.b32.xlu0 %v7049_v2, %s6213_s27  ;;  %5059 = vmatpush1.bf16.msra.mxu1 %v6072_v4  ;;  %v7209_v2 = vpack.i.bf16 %v4708_v3, %v4707_v16  ;;  %v4724_v4 = vld [vmem:[%s6609_s26 + $0x41] sm:$0xff] }
 0x232   : > { %v7197_v35 = vpop.permute.xlu1 %5411  ;;  %3261 = vmatprep.subr.bf16.mxu0 %v8872_v44  ;;  %5047 = vmatprep.subr.bf16.mxu1 %v8872_v44  ;;  %v4716_v16 = vld [vmem:[%s6609_s26 + $0x88] sm:$0xff] }
 0x233   : > { %8950 = vst [vmem:[#allocation48_spill] sm:$0xff] %v7197_v35  ;;  %v7205_v43 = vpop.permute.xlu0 %5406  ;;  %8952 = vst [vmem:[#allocation50_spill] sm:$0xff] %v7209_v2  ;;  %v5705_v35 = vpack.i.bf16 %v7203_v14, %v7200_v11 }
 0x234   : > { %8951 = vst [vmem:[#allocation49_spill] sm:$0xff] %v7205_v43  ;;  %5701 = vrot.lane.b32.xlu1 %v5670_v7, %s6215_s29  ;;  %v4725_v43 = vld [vmem:[%s6609_s26 + $0x49] sm:$0xff]  ;;  %v4715_v7 = vld [vmem:[%s6609_s26 + $0x80] sm:$0xff]  ;;  %3262 = vmatpush1.bf16.msra.mxu0 %v6073_v13 }
 0x235   : > { %5696 = vrot.lane.b32.xlu0 %v7109_v15, %s6214_s28  ;;  %5060 = vmatpush1.bf16.msra.mxu1 %v6073_v13  ;;  %v5720_v15 = vpack.i.bf16 %v4725_v43, %v4724_v4  ;;  %v7235_v47 = vpack.i.bf16 %v4716_v16, %v4715_v7  ;;  %v4742_v13 = vld [vmem:[%s6609_s26 + $0x4a] sm:$0xff]  ;;  %v4749_v7 = vld [vmem:[%s6609_s26 + $0x82] sm:$0xff] }
 0x236   : > { %v7221_v52 = vpop.permute.xlu1 %5421  ;;  %3263 = vmatprep.subr.bf16.mxu0 %v8872_v44  ;;  %5048 = vmatprep.subr.bf16.mxu1 %v8872_v44  ;;  %v4733_v43 = vld [vmem:[%s6609_s26 + $0x89] sm:$0xff] }
 0x237   : > { %8953 = vst [vmem:[#allocation51_spill] sm:$0xff] %v7221_v52  ;;  %v7225_v3 = vpop.permute.xlu0 %5416  ;;  %v6074_v52 = vld [vmem:[%s8826_s2 + $0x48] sm:$0xff]   ;;  %8955 = vst [vmem:[#allocation53_spill] sm:$0xff] %v7235_v47 }
 0x238   : > { %8954 = vst [vmem:[#allocation52_spill] sm:$0xff] %v7225_v3  ;;  %5711 = vrot.lane.b32.xlu1 %v7209_v2, %s6216_s30  ;;  %v4741_v3 = vld [vmem:[%s6609_s26 + $0x42] sm:$0xff]  ;;  %3264 = vmatpush1.bf16.msra.mxu0 %v6074_v52  ;;  %v4750_v16 = vld [vmem:[%s6609_s26 + $0x8a] sm:$0xff] }
 0x239   : > { %5706 = vrot.lane.b32.xlu0 %v5705_v35, %s6215_s29  ;;  %5061 = vmatpush1.bf16.msra.mxu1 %v6074_v52  ;;  %v7247_v35 = vpack.i.bf16 %v4742_v13, %v4741_v3  ;;  %v6075_v2 = vld [vmem:[%s8826_s2 + $0x50] sm:$0xff]   ;;  %v5725_v52 = vpack.i.bf16 %v4733_v43, %v4732_v1  ;;  %v5163_v1 = vunpack.i.l.bf16 %v6932_v27 }
 0x23a   : > { %v7239_v6 = vpop.permute.xlu1 %5431  ;;  %3265 = vmatprep.subr.bf16.mxu0 %v8872_v44  ;;  %5049 = vmatprep.subr.bf16.mxu1 %v8872_v44  ;;  %v7259_v3 = vld [vmem:[%s6609_s26 + $0x6c] sm:$0xff]  ;;  %v5149_v44 = vunpack.i.h.bf16 %v6924_v28  ;;  %v7281_v28 = vpack.i.bf16 %v4750_v16, %v4749_v7  ;;  %v5164_v7 = vunpack.i.h.bf16 %v6932_v27  ;;  %v7306_v16 = vpack.i.bf16 %v7270_v54, %v7158_v59 }
 0x23b   : > { %8956 = vst [vmem:[#allocation54_spill] sm:$0xff] %v7239_v6  ;;  %v7243_v4 = vpop.permute.xlu0 %5426  ;;  %8958 = vst [vmem:[#allocation56_spill] sm:$0xff] %v7247_v35  ;;  %v4767_v13 = vld [vmem:[%s6609_s26 + $0x8b] sm:$0xff]  ;;  %v5159_v6 = vunpack.i.h.bf16 %v6922_v9  ;;  %v7319_v27 = vsel %vm28_vm0, %v6816_v38, %v5163_v1  ;;  %v5173_v59 = vunpack.i.l.bf16 %v6942_v41  ;;  %v5169_v38 = vunpack.i.h.bf16 %v6944_v48 }
 0x23c   : > { %8957 = vst [vmem:[#allocation55_spill] sm:$0xff] %v7243_v4  ;;  %5721 = vrot.lane.b32.xlu1 %v5720_v15, %s6217_s8  ;;  %v5158_v4 = vunpack.i.l.bf16 %v6922_v9  ;;  %8959 = vst [vmem:[#allocation57_spill] sm:$0xff] %v7259_v3  ;;  %v4766_v15 = vld [vmem:[%s6609_s26 + $0x83] sm:$0xff]  ;;  %3266 = vmatpush1.bf16.msra.mxu0 %v6075_v2  ;;  %v8962_v9 = vmov 0   ;;  %v5178_v1 = vunpack.i.l.bf16 %v6952_v56 }
 0x23d   : > { %5716 = vrot.lane.b32.xlu0 %v7235_v47, %s6216_s30  ;;  %v801_v47 = vld [vmem:[%s6609_s26 + $0x8] sm:$0xff]  ;;  %5062 = vmatpush1.bf16.msra.mxu1 %v6075_v2  ;;  %v7285_v5 = vpack.i.bf16 %v4767_v13, %v4766_v15  ;;  %v6076_v2 = vld [vmem:[%s8826_s2 + $0x58] sm:$0xff]   ;;  %v7310_v15 = vsel %vm28_vm0, %v6791_v30, %v5159_v6  ;;  %v2208_v13 = vsel %vm28_vm0, %v800_v34, %v5148_v21  ;;  %v5168_v34 = vunpack.i.l.bf16 %v6944_v48 }
 0x23e   : > { %v7267_v60 = vpop.permute.xlu1 %5441  ;;  %3267 = vmatprep.subr.bf16.mxu0 %v8962_v9  ;;  %5050 = vmatprep.subr.bf16.mxu1 %v8962_v9  ;;  %v5183_v21 = vunpack.i.l.bf16 %v6950_v39  ;;  %v5184_v6 = vunpack.i.h.bf16 %v6950_v39 }
 0x23f   : > { %8960 = vst [vmem:[#allocation58_spill] sm:$0xff] %v7267_v60  ;;  %v7274_v43 = vpop.permute.xlu0 %5436  ;;  %v5750_v60 = vpack.i.bf16 %v7200_v11, %v7259_v3  ;;  %v5153_v11 = vunpack.i.l.bf16 %v6934_v20  ;;  %v2209_v3 = vsel %vm28_vm0, %v801_v47, %v5149_v44  ;;  %v5174_v44 = vunpack.i.h.bf16 %v6942_v41 }
 0x240   : > { %8961 = vst [vmem:[#allocation59_spill] sm:$0xff] %v7274_v43  ;;  %5731 = vrot.lane.b32.xlu1 %v7247_v35, %s6218_s9  ;;  %v7299_v43 = vsel %vm28_vm0, %v6788_v29, %v5158_v4  ;;  %v5154_v29 = vunpack.i.h.bf16 %v6934_v20  ;;  %3268 = vmatpush1.bf16.msra.mxu0 %v6076_v2  ;;  %v7324_v35 = vpack.i.bf16 %v4631_v19, %v4630_v24  ;;  %v6077_v20 = vld [vmem:[%s8826_s2 + $0x60] ss:$0 sps:$4 sm:$0xff]   ;;  %v5179_v47 = vunpack.i.h.bf16 %v6952_v56 }
 0x241   : > { %5726 = vrot.lane.b32.xlu0 %v5725_v52, %s6217_s8  ;;  %5063 = vmatpush1.bf16.msra.mxu1 %v6076_v2  ;;  %v2215_v19 = vsel %vm28_vm0, %v6819_v40, %v5164_v7  ;;  %v2210_v24 = vsel %vm28_vm0, %v6794_v31, %v5153_v11  ;;  %v3243_v41 = vsel %vm3241_vm3, %v6077_v20, 0  ;;  %v2218_v31 = vsel %vm28_vm0, %v6839_v50, %v5173_v59  ;;  %v4700_v11 = vld [vmem:[%s6609_s26 + $0x84] sm:$0xff] }
 0x242   : > { %v7315_v4 = vpop.permute.xlu1 %5451  ;;  %8964 = vst [vmem:[#allocation61_spill] sm:$0xff] %v7324_v35  ;;  %3269 = vmatprep.subr.bf16.mxu0 %v8962_v9  ;;  %5051 = vmatprep.subr.bf16.mxu1 %v8962_v9  ;;  %v2211_v48 = vsel %vm28_vm0, %v6797_v32, %v5154_v29  ;;  %v5194_v9 = vunpack.i.h.bf16 %v6956_v46  ;;  %v5193_v2 = vunpack.i.l.bf16 %v6956_v46  ;;  %v5188_v32 = vunpack.i.l.bf16 %v6958_v23  ;;  %v4701_v29 = vld [vmem:[%s6609_s26 + $0x8c] sm:$0xff] }
 0x243   : > { %v7322_v52 = vpop.permute.xlu0 %5446  ;;  %v2219_v56 = vsel %vm28_vm0, %v6842_v51, %v5174_v44  ;;  %v7363_v7 = vsel %vm28_vm0, %v6810_v36, %v5168_v34  ;;  %v7367_v50 = vsel %vm28_vm0, %v6813_v37, %v5169_v38  ;;  %v5189_v46 = vunpack.i.h.bf16 %v6958_v23  ;;  %v4709_v37 = vld [vmem:[%s6609_s26 + $0x50] sm:$0xff]  ;;  %v4710_v44 = vld [vmem:[%s6609_s26 + $0x58] sm:$0xff] }
 0x244   : > { %8963 = vst [vmem:[#allocation60_spill] sm:$0xff] %v7322_v52  ;;  %5741 = vrot.lane.b32.xlu1 %v7096_v22, %s6219_s10  ;;  %3270 = vmatpush1.bf16.msra.mxu0 %v3243_v41  ;;  %8965 = vst [vmem:[#allocation62_spill] sm:$0xff] %v7363_v7  ;;  %v2222_v59 = vsel %vm28_vm0, %v6859_v61, %v5183_v21  ;;  %v5204_v51 = vunpack.i.h.bf16 %v6964_v53  ;;  %v5203_v20 = vunpack.i.l.bf16 %v6964_v53  ;;  %v5198_v36 = vunpack.i.l.bf16 %v6966_v57  ;;  %v8989_v52 = vld [vmem:[#allocation27_spill] sm:$0xff]  ;;  %v9012_v7 = vld [vmem:[#allocation52_spill] sm:$0xff] }
 0x245   : > { %5736 = vrot.lane.b32.xlu0 %v7281_v28, %s6218_s9  ;;  %5064 = vmatpush1.bf16.msra.mxu1 %v3243_v41  ;;  %8966 = vst [vmem:[#allocation63_spill] sm:$0xff] %v7367_v50  ;;  %v2223_v23 = vsel %vm28_vm0, %v6862_v63, %v5184_v6  ;;  %v2221_v61 = vsel %vm28_vm0, %v6836_v49, %v5179_v47  ;;  %v5199_v53 = vunpack.i.h.bf16 %v6966_v57  ;;  %v5214_v49 = vunpack.i.h.bf16 %v6972_v62 }
 0x246   : > { %v7350_v40 = vpop.permute.xlu1 %5461  ;;  %v2226_v34 = vsel %vm43_vm1, %v2210_v24, %v5193_v2  ;;  %v2227_v21 = vsel %vm43_vm1, %v2211_v48, %v5194_v9  ;;  %v7394_v41 = vsel %vm43_vm1, %v2208_v13, %v5188_v32  ;;  %v7398_v63 = vpack.i.bf16 %v4701_v29, %v4700_v11  ;;  %v7410_v13 = vld [vmem:[%s6609_s26 + $0x51] sm:$0xff]  ;;  %v7413_v48 = vld [vmem:[%s6609_s26 + $0x59] sm:$0xff] }
 0x247   : > { %v7357_v39 = vpop.permute.xlu0 %5456  ;;  %8967 = vst [vmem:[#allocation64_spill] sm:$0xff] %v7394_v41  ;;  %v5213_v57 = vunpack.i.l.bf16 %v6972_v62  ;;  %v7407_v24 = vpack.i.bf16 %v4710_v44, %v4709_v37  ;;  %v2230_v6 = vsel %vm43_vm1, %v7319_v27, %v5203_v20  ;;  %v2228_v47 = vsel %vm43_vm1, %v7299_v43, %v5198_v36  ;;  %v4744_v32 = vld [vmem:[%s6609_s26 + $0x5a] sm:$0xff] }
 0x248   : > { %5751 = vrot.lane.b32.xlu1 %v5750_v60, %s6227_s13  ;;  %v2220_v60 = vsel %vm28_vm0, %v6833_v45, %v5178_v1  ;;  %8969 = vst [vmem:[#allocation66_spill] sm:$0xff] %v7398_v63  ;;  %v7401_v45 = vsel %vm43_vm1, %v2209_v3, %v5189_v46  ;;  %v2231_v3 = vsel %vm43_vm1, %v2215_v19, %v5204_v51  ;;  %v5223_v62 = vunpack.i.l.bf16 %v6978_v8  ;;  %v4743_v19 = vld [vmem:[%s6609_s26 + $0x52] sm:$0xff] }
 0x249   : > { %5746 = vrot.lane.b32.xlu0 %v7285_v5, %s6219_s10  ;;  %8970 = vst [vmem:[#allocation67_spill] sm:$0xff] %v7401_v45  ;;  %8971 = vst [vmem:[#allocation68_spill] sm:$0xff] %v7407_v24  ;;  %v5224_v1 = vunpack.i.h.bf16 %v6978_v8  ;;  %v5219_v9 = vunpack.i.h.bf16 %v6980_v18  ;;  %v5218_v2 = vunpack.i.l.bf16 %v6980_v18  ;;  %v5234_v46 = vunpack.i.h.bf16 %v6984_v26  ;;  %v4777_v44 = vld [vmem:[%s6609_s26 + $0x54] sm:$0xff]  ;;  %v4754_v45 = vld [vmem:[%s6609_s26 + $0xaa] sm:$0xff] }
 0x24a   : > { %v7389_v38 = vpop.permute.xlu1 %5471  ;;  %v5233_v11 = vunpack.i.l.bf16 %v6984_v26  ;;  %v2235_v18 = vsel %vm43_vm1, %v2219_v56, %v5214_v49  ;;  %v5243_v20 = vunpack.i.l.bf16 %v6992_v25  ;;  %v2238_v26 = vsel %vm43_vm1, %v2222_v59, %v5223_v62 }
 0x24b   : > { %v7396_v30 = vpop.permute.xlu0 %5466  ;;  %v5244_v36 = vunpack.i.h.bf16 %v6992_v25  ;;  %v5238_v37 = vunpack.i.l.bf16 %v6994_v55  ;;  %v7452_v56 = vpack.i.bf16 %v4744_v32, %v4743_v19  ;;  %v2239_v49 = vsel %vm43_vm1, %v2223_v23, %v5224_v1  ;;  %v4786_v23 = vld [vmem:[%s6609_s26 + $0x9c] sm:$0xff] }
 0x24c   : > { %8968 = vst [vmem:[#allocation65_spill] sm:$0xff] %v7396_v30  ;;  %5761 = vrot.lane.b32.xlu1 %v6969_v10, %s6220_s11  ;;  %v2229_v10 = vsel %vm43_vm1, %v7310_v15, %v5199_v53  ;;  %v2234_v15 = vsel %vm43_vm1, %v2218_v31, %v5213_v57  ;;  %v8972_v31 = vpack.i.bf16 %v7291_v0, %v7288_v12  ;;  %v4778_v53 = vld [vmem:[%s6609_s26 + $0x5c] sm:$0xff]  ;;  %v5239_v25 = vunpack.i.h.bf16 %v6994_v55 }
 0x24d   : > { %5756 = vrot.lane.b32.xlu0 %v7306_v16, %s6220_s11  ;;  %v2236_v57 = vsel %vm43_vm1, %v2220_v60, %v5218_v2  ;;  %v2237_v59 = vsel %vm43_vm1, %v2221_v61, %v5219_v9  ;;  %v2243_v43 = vsel %vm2240_vm4, %v2226_v34, %v5233_v11  ;;  %v2244_v12 = vsel %vm2240_vm4, %v2227_v21, %v5234_v46  ;;  %v8976_v11 = vld [vmem:[#allocation14_spill] sm:$0xff] }
 0x24e   : > { %v7428_v27 = vpop.permute.xlu1 %5481  ;;  %v2247_v60 = vsel %vm2240_vm4, %v2230_v6, %v5243_v20  ;;  %v5253_v61 = vunpack.i.l.bf16 %v7000_v33  ;;  %v7474_v55 = vpack.i.bf16 %v4778_v53, %v4777_v44  ;;  %v2248_v21 = vsel %vm2240_vm4, %v2231_v3, %v5244_v36  ;;  %v8975_v6 = vld [vmem:[#allocation56_spill] sm:$0xff]  ;;  %v8980_v36 = vld [vmem:[#allocation18_spill] sm:$0xff] }
 0x24f   : > { %v7435_v29 = vpop.permute.xlu0 %5476  ;;  %v2245_v1 = vsel %vm2240_vm4, %v2228_v47, %v5238_v37  ;;  %v5254_v9 = vunpack.i.h.bf16 %v7000_v33  ;;  %v5263_v2 = vunpack.i.l.bf16 %v7006_v42  ;;  %v2246_v46 = vsel %vm2240_vm4, %v2229_v10, %v5239_v25  ;;  %v8978_v33 = vld [vmem:[#allocation15_spill] sm:$0xff]  ;;  %v8979_v25 = vld [vmem:[#allocation17_spill] sm:$0xff] }
 0x250   : > { %5771 = vrot.lane.b32.xlu1 %v7324_v35, %s6228_s17  ;;  %v5258_v20 = vunpack.i.l.bf16 %v8976_v11  ;;  %v5259_v47 = vunpack.i.h.bf16 %v8976_v11  ;;  %v5274_v37 = vunpack.i.h.bf16 %v8978_v33  ;;  %v5273_v0 = vunpack.i.l.bf16 %v8978_v33  ;;  %v8984_v35 = vld [vmem:[#allocation23_spill] sm:$0xff] }
 0x251   : > { %5766 = vrot.lane.b32.xlu0 %v8972_v31, %s6228_s17  ;;  %v4785_v31 = vld [vmem:[%s6609_s26 + $0x94] sm:$0xff]  ;;  %v2252_v11 = vsel %vm2240_vm4, %v2235_v18, %v5254_v9  ;;  %v2255_v33 = vsel %vm2240_vm4, %v2238_v26, %v5263_v2  ;;  %v5279_v19 = vunpack.i.h.bf16 %v8980_v36  ;;  %v5278_v51 = vunpack.i.l.bf16 %v8980_v36  ;;  %v4711_v26 = vld [vmem:[%s6609_s26 + $0x60] sm:$0xff]  ;;  %v4712_v9 = vld [vmem:[%s6609_s26 + $0x68] sm:$0xff] }
 0x252   : > { %v7460_v62 = vpop.permute.xlu1 %5491  ;;  %v7489_v53 = vpack.i.bf16 %v4786_v23, %v4785_v31  ;;  %v5284_v31 = vunpack.i.h.bf16 %v8979_v25  ;;  %v5283_v23 = vunpack.i.l.bf16 %v8979_v25  ;;  %v8981_v25 = vld [vmem:[#allocation20_spill] sm:$0xff]  ;;  %v2254_v2 = vsel %vm2240_vm4, %v2237_v59, %v5259_v47 }
 0x253   : > { %8973 = vst [vmem:[#allocation69_spill] sm:$0xff] %v7460_v62  ;;  %v7466_v32 = vpop.permute.xlu0 %5486  ;;  %v5294_v10 = vunpack.i.h.bf16 %v8981_v25  ;;  %v2260_v36 = vsel %vm2257_vm5, %v2243_v43, %v5273_v0  ;;  %v7533_v43 = vld [vmem:[%s6609_s26 + $0x69] sm:$0xff]  ;;  %v4719_v59 = vld [vmem:[%s6609_s26 + $0xa0] sm:$0xff]  ;;  %v2262_v0 = vsel %vm2257_vm5, %v2245_v1, %v5278_v51  ;;  %v7542_v47 = vpack.i.bf16 %v4712_v9, %v4711_v26 }
 0x254   : > { %8974 = vst [vmem:[#allocation70_spill] sm:$0xff] %v7466_v32  ;;  %5781 = vrot.lane.b32.xlu1 %v7281_v28, %s6213_s27  ;;  %v5264_v28 = vunpack.i.h.bf16 %v7006_v42  ;;  %v2251_v42 = vsel %vm2240_vm4, %v2234_v15, %v5253_v61  ;;  %v2253_v61 = vsel %vm2240_vm4, %v2236_v57, %v5258_v20  ;;  %v7524_v20 = vld [vmem:[%s6609_s26 + $0x61] sm:$0xff]  ;;  %v2265_v34 = vsel %vm2257_vm5, %v2248_v21, %v5284_v31 }
 0x255   : > { %5776 = vrot.lane.b32.xlu0 %v8975_v6, %s6213_s27  ;;  %v5298_v32 = vunpack.i.l.bf16 %v8984_v35  ;;  %v5299_v21 = vunpack.i.h.bf16 %v8984_v35  ;;  %v4746_v35 = vld [vmem:[%s6609_s26 + $0x6a] sm:$0xff]  ;;  %v7557_v1 = vld [vmem:[%s6609_s26 + $0xa1] sm:$0xff]  ;;  %v5318_v3 = vunpack.i.l.bf16 %v8989_v52  ;;  %v5419_v58 = vunpack.i.h.bf16 %v9012_v7 }
 0x256   : > { %v7487_v44 = vpop.permute.xlu1 %5501  ;;  %v2256_v15 = vsel %vm2240_vm4, %v2239_v49, %v5264_v28  ;;  %v8982_v49 = vld [vmem:[#allocation22_spill] sm:$0xff]  ;;  %8986 = vst [vmem:[#allocation14_spill] sm:$0xff] %v7557_v1 }
 0x257   : > { %v7495_v6 = vpop.permute.xlu0 %5496  ;;  %v5303_v28 = vunpack.i.l.bf16 %v8982_v49  ;;  %v5304_v8 = vunpack.i.h.bf16 %v8982_v49  ;;  %v8985_v49 = vld [vmem:[#allocation24_spill] sm:$0xff]  ;;  %v2271_v41 = vsel %vm2257_vm5, %v2254_v2, %v5299_v21 }
 0x258   : > { %5791 = vrot.lane.b32.xlu1 %v7285_v5, %s6214_s28  ;;  %v5293_v5 = vunpack.i.l.bf16 %v8981_v25  ;;  %v2264_v25 = vsel %vm2257_vm5, %v2247_v60, %v5283_v23  ;;  %v2263_v60 = vsel %vm2257_vm5, %v2246_v46, %v5279_v19  ;;  %v7549_v23 = vsel %vm2257_vm5, %v2252_v11, %v5294_v10 }
 0x259   : > { %5786 = vrot.lane.b32.xlu0 %v7096_v22, %s6214_s28  ;;  %v2261_v22 = vsel %vm2257_vm5, %v2244_v12, %v5274_v37  ;;  %v4720_v12 = vld [vmem:[%s6609_s26 + $0xa8] sm:$0xff]  ;;  %v5313_v51 = vunpack.i.l.bf16 %v8985_v49  ;;  %v2272_v46 = vsel %vm2257_vm5, %v2255_v33, %v5303_v28  ;;  %v2273_v9 = vsel %vm2257_vm5, %v2256_v15, %v5304_v8  ;;  %v8990_v33 = vld [vmem:[#allocation12_spill] sm:$0xff] }
 0x25a   : > { %v7513_v18 = vpop.permute.xlu1 %5511  ;;  %v4745_v37 = vld [vmem:[%s6609_s26 + $0x62] sm:$0xff]  ;;  %v7546_v31 = vsel %vm2257_vm5, %v2251_v42, %v5293_v5  ;;  %v8988_v42 = vld [vmem:[#allocation26_spill] sm:$0xff]  ;;  %v7568_v26 = vpack.i.bf16 %v4720_v12, %v4719_v59  ;;  %v5319_v59 = vunpack.i.h.bf16 %v8989_v52  ;;  %v8992_v12 = vld [vmem:[#allocation31_spill] sm:$0xff] }
 0x25b   : > { %v7521_v57 = vpop.permute.xlu0 %5506  ;;  %v5323_v5 = vunpack.i.l.bf16 %v8988_v42  ;;  %v5324_v30 = vunpack.i.h.bf16 %v8988_v42  ;;  %v4753_v28 = vld [vmem:[%s6609_s26 + $0xa2] sm:$0xff]  ;;  %v7582_v8 = vpack.i.bf16 %v4746_v35, %v4745_v37  ;;  %v7587_v15 = vsel %vm2274_vm6, %v2260_v36, %v5313_v51  ;;  %v4771_v51 = vld [vmem:[%s6609_s26 + $0xab] sm:$0xff] }
 0x25c   : > { %8983 = vst [vmem:[#allocation56_spill] sm:$0xff] %v7521_v57  ;;  %5801 = vrot.lane.b32.xlu1 %v7398_v63, %s6215_s29  ;;  %v5314_v57 = vunpack.i.h.bf16 %v8985_v49  ;;  %v2270_v49 = vsel %vm2257_vm5, %v2253_v61, %v5298_v32  ;;  %v5344_v42 = vunpack.i.h.bf16 %v8992_v12  ;;  %v5343_v2 = vunpack.i.l.bf16 %v8992_v12  ;;  %v4770_v36 = vld [vmem:[%s6609_s26 + $0xa3] sm:$0xff] }
 0x25d   : > { %5796 = vrot.lane.b32.xlu0 %v7306_v16, %s6215_s29  ;;  %v7560_v16 = vld [vmem:[%s6609_s26 + $0xa9] sm:$0xff]  ;;  %8991 = vst [vmem:[#allocation17_spill] sm:$0xff] %v7582_v8  ;;  %v2281_v52 = vsel %vm2274_vm6, %v2264_v25, %v5323_v5  ;;  %v7601_v32 = vpack.i.bf16 %v4754_v45, %v4753_v28  ;;  %v8998_v25 = vld [vmem:[#allocation19_spill] sm:$0xff]  ;;  %v2280_v5 = vsel %vm2274_vm6, %v2263_v60, %v5319_v59 }
 0x25e   : > { %v7553_v19 = vpop.permute.xlu1 %5521  ;;  %8987 = vst [vmem:[#allocation15_spill] sm:$0xff] %v7560_v16  ;;  %v7590_v61 = vsel %vm2274_vm6, %v2261_v22, %v5314_v57  ;;  %v2282_v22 = vsel %vm2274_vm6, %v2265_v34, %v5324_v30  ;;  %v2279_v57 = vsel %vm2274_vm6, %v2262_v0, %v5318_v3  ;;  %v9001_v30 = vpack.i.bf16 %v7413_v48, %v7410_v13 }
 0x25f   : > { %v7564_v10 = vpop.permute.xlu0 %5516  ;;  %8996 = vst [vmem:[#allocation22_spill] sm:$0xff] %v7601_v32  ;;  %v2290_v3 = vsel %vm2274_vm6, %v2273_v9, %v5344_v42  ;;  %v7624_v60 = vpack.i.bf16 %v4771_v51, %v4770_v36  ;;  %v9005_v36 = vld [vmem:[#allocation28_spill] sm:$0xff]  ;;  %v9013_v32 = vld [vmem:[#allocation39_spill] sm:$0xff] }
 0x260   : > { %5811 = vrot.lane.b32.xlu1 %v8990_v33, %s6216_s30  ;;  %v8994_v33 = vld [vmem:[#allocation32_spill] sm:$0xff] }
 0x261   : > { %5806 = vrot.lane.b32.xlu0 %v7407_v24, %s6216_s30  ;;  %v5339_v37 = vunpack.i.h.bf16 %v8994_v33  ;;  %v5338_v35 = vunpack.i.l.bf16 %v8994_v33  ;;  %v8997_v24 = vld [vmem:[#allocation37_spill] sm:$0xff]  ;;  %9002 = vst [vmem:[#allocation23_spill] sm:$0xff] %v7624_v60 }
 0x262   : > { %v7594_v21 = vpop.permute.xlu1 %5531  ;;  %v5364_v12 = vunpack.i.h.bf16 %v8997_v24  ;;  %v5363_v17 = vunpack.i.l.bf16 %v8997_v24  ;;  %v8999_v33 = vld [vmem:[#allocation29_spill] sm:$0xff]  ;;  %v2289_v24 = vsel %vm2274_vm6, %v2272_v46, %v5343_v2  ;;  %v9004_v2 = vld [vmem:[#allocation42_spill] sm:$0xff] }
 0x263   : > { %8993 = vst [vmem:[#allocation18_spill] sm:$0xff] %v7594_v21  ;;  %v7599_v11 = vpop.permute.xlu0 %5526  ;;  %v2287_v59 = vsel %vm2274_vm6, %v2270_v49, %v5338_v35  ;;  %v5384_v9 = vunpack.i.h.bf16 %v9004_v2  ;;  %v5383_v42 = vunpack.i.l.bf16 %v9004_v2  ;;  %v9014_v21 = vld [vmem:[#allocation44_spill] sm:$0xff] }
 0x264   : > { %8995 = vst [vmem:[#allocation20_spill] sm:$0xff] %v7599_v11  ;;  %5821 = vrot.lane.b32.xlu1 %v8998_v25, %s6217_s8  ;;  %v9000_v11 = vld [vmem:[#allocation38_spill] sm:$0xff]  ;;  %v2298_v48 = vsel %vm2291_vm7, %v2281_v52, %v5363_v17  ;;  %v2299_v46 = vsel %vm2291_vm7, %v2282_v22, %v5364_v12  ;;  %v9008_v12 = vld [vmem:[#allocation47_spill] sm:$0xff] }
 0x265   : > { %v5359_v45 = vunpack.i.h.bf16 %v9000_v11  ;;  %v5358_v28 = vunpack.i.l.bf16 %v9000_v11  ;;  %5816 = vrot.lane.b32.xlu0 %v9001_v30, %s6217_s8  ;;  %v2288_v11 = vsel %vm2274_vm6, %v2271_v41, %v5339_v37  ;;  %v9003_v25 = vld [vmem:[#allocation34_spill] sm:$0xff]  ;;  %v9006_v37 = vld [vmem:[#allocation43_spill] sm:$0xff]  ;;  %v5399_v30 = vunpack.i.h.bf16 %v9008_v12 }
 0x266   : > { %v7622_v0 = vpop.permute.xlu1 %5541  ;;  %v5379_v35 = vunpack.i.h.bf16 %v9006_v37  ;;  %v5378_v51 = vunpack.i.l.bf16 %v9006_v37  ;;  %v9007_v17 = vld [vmem:[#allocation46_spill] sm:$0xff]  ;;  %v5398_v2 = vunpack.i.l.bf16 %v9008_v12  ;;  %v2306_v60 = vsel %vm2291_vm7, %v2289_v24, %v5383_v42  ;;  %v9015_v24 = vld [vmem:[#allocation33_spill] sm:$0xff] }
 0x267   : > { %v7630_v13 = vpop.permute.xlu0 %5536  ;;  %v2296_v49 = vsel %vm2291_vm7, %v2279_v57, %v5358_v28  ;;  %v2297_v41 = vsel %vm2291_vm7, %v2280_v5, %v5359_v45  ;;  %v5404_v52 = vunpack.i.h.bf16 %v9007_v17  ;;  %v5403_v22 = vunpack.i.l.bf16 %v9007_v17  ;;  %v9009_v57 = vld [vmem:[#allocation40_spill] sm:$0xff]  ;;  %v9010_v28 = vld [vmem:[#allocation51_spill] sm:$0xff] }
 0x268   : > { %5831 = vrot.lane.b32.xlu1 %v9005_v36, %s6218_s9  ;;  %v5424_v37 = vunpack.i.h.bf16 %v9010_v28  ;;  %v5423_v63 = vunpack.i.l.bf16 %v9010_v28  ;;  %v2307_v17 = vsel %vm2291_vm7, %v2290_v3, %v5384_v9  ;;  %v5418_v12 = vunpack.i.l.bf16 %v9012_v7 }
 0x269   : > { %5826 = vrot.lane.b32.xlu0 %v7452_v56, %s6218_s9  ;;  %v2304_v5 = vsel %vm2291_vm7, %v2287_v59, %v5378_v51  ;;  %v2305_v45 = vsel %vm2291_vm7, %v2288_v11, %v5379_v35  ;;  %v7669_v3 = vsel %vm2308_vm8, %v2298_v48, %v5403_v22  ;;  %v7672_v7 = vsel %vm2308_vm8, %v2299_v46, %v5404_v52 }
 0x26a   : > { %v7648_v50 = vpop.permute.xlu1 %5551  ;;  %v7675_v9 = vsel %vm2308_vm8, %v2296_v49, %v5398_v2  ;;  %v7678_v59 = vsel %vm2308_vm8, %v2297_v41, %v5399_v30  ;;  %v2323_v42 = vsel %vm2308_vm8, %v2306_v60, %v5423_v63  ;;  %v2324_v35 = vsel %vm2308_vm8, %v2307_v17, %v5424_v37  ;;  %v9016_v63 = vld [vmem:[#allocation54_spill] sm:$0xff] }
 0x26b   : > { %v7654_v34 = vpop.permute.xlu0 %5546  ;;  %v5464_v51 = vunpack.i.h.bf16 %v7350_v40  ;;  %v5463_v48 = vunpack.i.l.bf16 %v7350_v40  ;;  %v2321_v46 = vsel %vm2308_vm8, %v2304_v5, %v5418_v12  ;;  %v2322_v49 = vsel %vm2308_vm8, %v2305_v45, %v5419_v58  ;;  %v9017_v2 = vld [vmem:[#allocation58_spill] sm:$0xff]  ;;  %v9019_v5 = vld [vmem:[#allocation59_spill] sm:$0xff] }
 0x26c   : > { %9011 = vst [vmem:[#allocation24_spill] sm:$0xff] %v7654_v34  ;;  %5841 = vrot.lane.b32.xlu1 %v9013_v32, %s6219_s10  ;;  %v5459_v52 = vunpack.i.h.bf16 %v7357_v39  ;;  %v5458_v41 = vunpack.i.l.bf16 %v7357_v39  ;;  %v5444_v40 = vunpack.i.h.bf16 %v9017_v2  ;;  %v5443_v37 = vunpack.i.l.bf16 %v9017_v2  ;;  %v9022_v34 = vld [vmem:[#allocation50_spill] sm:$0xff] }
 0x26d   : > { %5836 = vrot.lane.b32.xlu0 %v9015_v24, %s6219_s10  ;;  %v9018_v58 = vpack.i.bf16 %v7270_v54, %v7203_v14  ;;  %v5439_v45 = vunpack.i.h.bf16 %v9019_v5  ;;  %v5438_v39 = vunpack.i.l.bf16 %v9019_v5  ;;  %v5504_v17 = vunpack.i.h.bf16 %v7487_v44 }
 0x26e   : > { %v7680_v11 = vpop.permute.xlu1 %5561  ;;  %v5503_v12 = vunpack.i.l.bf16 %v7487_v44  ;;  %v2340_v30 = vsel %vm2325_vm9, %v2323_v42, %v5463_v48  ;;  %v2341_v1 = vsel %vm2325_vm9, %v2324_v35, %v5464_v51  ;;  %v5499_v2 = vunpack.i.h.bf16 %v7495_v6 }
 0x26f   : > { %v7686_v22 = vpop.permute.xlu0 %5556  ;;  %v5498_v28 = vunpack.i.l.bf16 %v7495_v6  ;;  %v2338_v14 = vsel %vm2325_vm9, %v2321_v46, %v5458_v41  ;;  %v5544_v5 = vunpack.i.h.bf16 %v7622_v0  ;;  %v5543_v44 = vunpack.i.l.bf16 %v7622_v0 }
 0x270   : > { %5851 = vrot.lane.b32.xlu1 %v7474_v55, %s6220_s11  ;;  %v5484_v42 = vunpack.i.h.bf16 %v7428_v27  ;;  %v5483_v35 = vunpack.i.l.bf16 %v7428_v27  ;;  %v5539_v51 = vunpack.i.h.bf16 %v7630_v13  ;;  %v5538_v6 = vunpack.i.l.bf16 %v7630_v13 }
 0x271   : > { %5846 = vrot.lane.b32.xlu0 %v9018_v58, %s6227_s13  ;;  %v2339_v58 = vsel %vm2325_vm9, %v2322_v49, %v5459_v52  ;;  %v5479_v48 = vunpack.i.h.bf16 %v7435_v29  ;;  %v5478_v46 = vunpack.i.l.bf16 %v7435_v29  ;;  %v2357_v0 = vsel %vm2342_vm10, %v2340_v30, %v5503_v12 }
 0x272   : > { %v7706_v60 = vpop.permute.xlu1 %5571  ;;  %v2358_v49 = vsel %vm2342_vm10, %v2341_v1, %v5504_v17  ;;  %v2355_v52 = vsel %vm2342_vm10, %v2338_v14, %v5498_v28  ;;  %v2356_v27 = vsel %vm2342_vm10, %v2339_v58, %v5499_v2  ;;  %v2374_v13 = vsel %vm211_vm2, %v2357_v0, %v5543_v44  ;;  %v9023_v17 = vld [vmem:[#allocation53_spill] sm:$0xff] }
 0x273   : > { %9020 = vst [vmem:[#allocation26_spill] sm:$0xff] %v7706_v60  ;;  %v7712_v54 = vpop.permute.xlu0 %5566  ;;  %v2375_v16 = vsel %vm211_vm2, %v2358_v49, %v5544_v5  ;;  %v2372_v29 = vsel %vm211_vm2, %v2355_v52, %v5538_v6  ;;  %v2373_v1 = vsel %vm211_vm2, %v2356_v27, %v5539_v51  ;;  %v5524_v12 = vunpack.i.h.bf16 %v7553_v19 }
 0x274   : > { %9021 = vst [vmem:[#allocation27_spill] sm:$0xff] %v7712_v54  ;;  %5861 = vrot.lane.b32.xlu1 %v9022_v34, %s6228_s17  ;;  %v5519_v58 = vunpack.i.h.bf16 %v7564_v10  ;;  %v5518_v5 = vunpack.i.l.bf16 %v7564_v10  ;;  %v5563_v51 = vunpack.i.l.bf16 %v7680_v11  ;;  %v5559_v10 = vunpack.i.h.bf16 %v7686_v22 }
 0x275   : > { %5856 = vrot.lane.b32.xlu0 %v7489_v53, %s6220_s11  ;;  %v9024_v27 = vunpack.i.l.bf16 %v8999_v33 }
 0x276   : > { %v5582_v34 = vpop.permute.xlu1 %5581 }
 0x277   : > { %v5584_v41 = vunpack.i.h.bf16 %v5582_v34  ;;  %v5583_v54 = vunpack.i.l.bf16 %v5582_v34  ;;  %v5577_v60 = vpop.permute.xlu0 %5576 }
 0x278   : > { %v5579_v62 = vunpack.i.h.bf16 %v5577_v60  ;;  %v5578_v8 = vunpack.i.l.bf16 %v5577_v60  ;;  %5871 = vrot.lane.b32.xlu1 %v7452_v56, %s6213_s27  ;;  %v5523_v60 = vunpack.i.l.bf16 %v7553_v19  ;;  %v2330_v19 = vsel %vm2325_vm9, %v7675_v9, %v5438_v39 }
 0x279   : > { %v7739_v28 = vsel %vm2376_vm11, %v2374_v13, %v5583_v54  ;;  %v7742_v30 = vsel %vm2376_vm11, %v2375_v16, %v5584_v41  ;;  %5866 = vrot.lane.b32.xlu0 %v9023_v17, %s6228_s17  ;;  %v2332_v54 = vsel %vm2325_vm9, %v7669_v3, %v5443_v37  ;;  %v2333_v16 = vsel %vm2325_vm9, %v7672_v7, %v5444_v40 }
 0x27a   : > { %v7749_v56 = vsel %vm2376_vm11, %v2372_v29, %v5578_v8  ;;  %v7752_v2 = vsel %vm2376_vm11, %v2373_v1, %v5579_v62  ;;  %v7754_v14 = vpop.permute.xlu1 %5591  ;;  %v2331_v62 = vsel %vm2325_vm9, %v7678_v59, %v5439_v45  ;;  %v5564_v8 = vunpack.i.h.bf16 %v7680_v11 }
 0x27b   : > { %v7762_v44 = vpop.permute.xlu0 %5586  ;;  %v2349_v3 = vsel %vm2342_vm10, %v2332_v54, %v5483_v35  ;;  %v2350_v7 = vsel %vm2342_vm10, %v2333_v16, %v5484_v42  ;;  %v5558_v40 = vunpack.i.l.bf16 %v7686_v22  ;;  %v2347_v11 = vsel %vm2342_vm10, %v2330_v19, %v5478_v46 }
 0x27c   : > { %5881 = vrot.lane.b32.xlu1 %v9015_v24, %s6214_s28  ;;  %v2366_v9 = vsel %vm211_vm2, %v2349_v3, %v5523_v60  ;;  %v2367_v59 = vsel %vm211_vm2, %v2350_v7, %v5524_v12  ;;  %v2348_v37 = vsel %vm2342_vm10, %v2331_v62, %v5479_v48  ;;  %v2364_v45 = vsel %vm211_vm2, %v2347_v11, %v5518_v5 }
 0x27d   : > { %5876 = vrot.lane.b32.xlu0 %v9005_v36, %s6213_s27  ;;  %v2365_v39 = vsel %vm211_vm2, %v2348_v37, %v5519_v58  ;;  %v2383_v22 = vsel %vm2376_vm11, %v2366_v9, %v5563_v51  ;;  %v2384_v36 = vsel %vm2376_vm11, %v2367_v59, %v5564_v8  ;;  %v2381_v46 = vsel %vm2376_vm11, %v2364_v45, %v5558_v40  ;;  %v9032_v8 = vld [vmem:[#allocation48_spill] sm:$0xff] }
 0x27e   : > { %v5602_v24 = vpop.permute.xlu1 %5601  ;;  %v2382_v48 = vsel %vm2376_vm11, %v2365_v39, %v5559_v10  ;;  %v2285_v41 = vsel %vm2274_vm6, %v7546_v31, %v9024_v27  ;;  %v9025_v13 = vunpack.i.h.bf16 %v8999_v33  ;;  %v9027_v31 = vunpack.i.h.bf16 %v9003_v25 }
 0x27f   : > { %v5604_v42 = vunpack.i.h.bf16 %v5602_v24  ;;  %v5603_v35 = vunpack.i.l.bf16 %v5602_v24  ;;  %v5597_v6 = vpop.permute.xlu0 %5596  ;;  %v9029_v16 = vunpack.i.h.bf16 %v9009_v57  ;;  %v9030_v19 = vunpack.i.l.bf16 %v9014_v21 }
 0x280   : > { %v5599_v0 = vunpack.i.h.bf16 %v5597_v6  ;;  %v5598_v49 = vunpack.i.l.bf16 %v5597_v6  ;;  %5891 = vrot.lane.b32.xlu1 %v7474_v55, %s6215_s29  ;;  %v2286_v29 = vsel %vm2274_vm6, %v7549_v23, %v9025_v13  ;;  %v2295_v33 = vsel %vm2291_vm7, %v7590_v61, %v9027_v31  ;;  %v9037_v31 = vld [vmem:[#allocation69_spill] sm:$0xff] }
 0x281   : > { %v7791_v34 = vsel %vm2393_vm12, %v2383_v22, %v5603_v35  ;;  %v7794_v52 = vsel %vm2393_vm12, %v2384_v36, %v5604_v42  ;;  %5886 = vrot.lane.b32.xlu0 %v9013_v32, %s6214_s28  ;;  %v9026_v32 = vunpack.i.l.bf16 %v9003_v25  ;;  %v9028_v23 = vunpack.i.l.bf16 %v9009_v57 }
 0x282   : > { %v7807_v1 = vsel %vm2393_vm12, %v2381_v46, %v5598_v49  ;;  %v7810_v17 = vsel %vm2393_vm12, %v2382_v48, %v5599_v0  ;;  %v7812_v12 = vpop.permute.xlu1 %5611  ;;  %v2303_v58 = vsel %vm2291_vm7, %v2286_v29, %v9029_v16  ;;  %v5414_v61 = vunpack.i.h.bf16 %v9032_v8 }
 0x283   : > { %v2294_v60 = vsel %vm2291_vm7, %v7587_v15, %v9026_v32  ;;  %v2302_v54 = vsel %vm2291_vm7, %v2285_v41, %v9028_v23  ;;  %v7828_v5 = vpop.permute.xlu0 %5606  ;;  %v9031_v15 = vunpack.i.h.bf16 %v9014_v21  ;;  %v5413_v51 = vunpack.i.l.bf16 %v9032_v8  ;;  %v9041_v8 = vld [vmem:[#allocation18_spill] sm:$0xff] }
 0x284   : > { %v2311_v62 = vsel %vm2308_vm8, %v2294_v60, %v9030_v19  ;;  %5901 = vrot.lane.b32.xlu1 %v7542_v47, %s6216_s30  ;;  %v9033_v57 = vunpack.i.l.bf16 %v9016_v63  ;;  %v9034_v7 = vunpack.i.h.bf16 %v9016_v63  ;;  %v5474_v40 = vunpack.i.h.bf16 %v7389_v38 }
 0x285   : > { %v2312_v25 = vsel %vm2308_vm8, %v2295_v33, %v9031_v15  ;;  %v5473_v21 = vunpack.i.l.bf16 %v7389_v38  ;;  %5896 = vrot.lane.b32.xlu0 %v7489_v53, %s6215_s29  ;;  %v5454_v9 = vunpack.i.h.bf16 %v7315_v4  ;;  %v5453_v59 = vunpack.i.l.bf16 %v7315_v4 }
 0x286   : > { %v2328_v3 = vsel %vm2325_vm9, %v2311_v62, %v9033_v57  ;;  %v2329_v10 = vsel %vm2325_vm9, %v2312_v25, %v9034_v7  ;;  %v5514_v11 = vunpack.i.h.bf16 %v7513_v18  ;;  %v5513_v37 = vunpack.i.l.bf16 %v7513_v18  ;;  %v5622_v24 = vpop.permute.xlu1 %5621 }
 0x287   : > { %v5554_v63 = vunpack.i.h.bf16 %v7648_v50  ;;  %v5553_v45 = vunpack.i.l.bf16 %v7648_v50  ;;  %v5624_v39 = vunpack.i.h.bf16 %v5622_v24  ;;  %v5623_v42 = vunpack.i.l.bf16 %v5622_v24  ;;  %v5617_v35 = vpop.permute.xlu0 %5616 }
 0x288   : > { %v5594_v38 = vunpack.i.h.bf16 %v7754_v14  ;;  %v5593_v6 = vunpack.i.l.bf16 %v7754_v14  ;;  %v5619_v22 = vunpack.i.h.bf16 %v5617_v35  ;;  %v5618_v36 = vunpack.i.l.bf16 %v5617_v35 }
 0x289   : > { %v9035_v4 = vpack.i.bf16 %v7533_v43, %v7524_v20  ;;  %v2345_v18 = vsel %vm2342_vm10, %v2328_v3, %v5473_v21  ;;  %v2346_v0 = vsel %vm2342_vm10, %v2329_v10, %v5474_v40  ;;  %v7866_v50 = vsel %vm2393_vm12, %v7739_v28, %v5623_v42  ;;  %5906 = vrot.lane.b32.xlu0 %v7568_v26, %s6216_s30  ;;  %v9042_v3 = vld [vmem:[#allocation26_spill] sm:$0xff] }
 0x28a   : > { %v7870_v49 = vsel %vm2393_vm12, %v7742_v30, %v5624_v39  ;;  %v2362_v14 = vsel %vm211_vm2, %v2345_v18, %v5513_v37  ;;  %v2363_v20 = vsel %vm211_vm2, %v2346_v0, %v5514_v11  ;;  %v7878_v43 = vsel %vm2393_vm12, %v7749_v56, %v5618_v36  ;;  %v5632_v28 = vpop.permute.xlu1 %5631 }
 0x28b   : > { %5911 = vrot.lane.b32.xlu1 %v9035_v4, %s6217_s8  ;;  %v7882_v46 = vsel %vm2393_vm12, %v7752_v2, %v5619_v22  ;;  %v2379_v48 = vsel %vm2376_vm11, %v2362_v14, %v5553_v45  ;;  %v2380_v30 = vsel %vm2376_vm11, %v2363_v20, %v5554_v63  ;;  %v5634_v27 = vunpack.i.h.bf16 %v5632_v28  ;;  %v7886_v13 = vpop.permute.xlu0 %5626  ;;  %v9036_v2 = vld [vmem:[#allocation17_spill] sm:$0xff]  ;;  %v9043_v63 = vld [vmem:[#allocation36_spill] sm:$0xff] }
 0x28c   : > { %v5633_v41 = vunpack.i.l.bf16 %v5632_v28  ;;  %v2319_v29 = vsel %vm2308_vm8, %v2302_v54, %v5413_v51  ;;  %v2320_v32 = vsel %vm2308_vm8, %v2303_v58, %v5414_v61  ;;  %v2396_v56 = vsel %vm2393_vm12, %v2379_v48, %v5593_v6  ;;  %v9038_v54 = vld [vmem:[#allocation15_spill] sm:$0xff]  ;;  %v9039_v58 = vld [vmem:[#allocation14_spill] sm:$0xff] }
 0x28d   : > { %v2397_v60 = vsel %vm2393_vm12, %v2380_v30, %v5594_v38  ;;  %v5494_v33 = vunpack.i.h.bf16 %v9037_v31  ;;  %v5493_v23 = vunpack.i.l.bf16 %v9037_v31  ;;  %v9040_v62 = vpack.i.bf16 %v9038_v54, %v9039_v58  ;;  %v9046_v38 = vld [vmem:[#allocation22_spill] sm:$0xff]  ;;  %v9054_v54 = vld [vmem:[#allocation23_spill] sm:$0xff] }
 0x28e   : > { %v7897_v16 = vsel %vm2410_vm13, %v2396_v56, %v5633_v41  ;;  %v7900_v19 = vsel %vm2410_vm13, %v2397_v60, %v5634_v27  ;;  %v2336_v15 = vsel %vm2325_vm9, %v2319_v29, %v5453_v59  ;;  %v2337_v25 = vsel %vm2325_vm9, %v2320_v32, %v5454_v9  ;;  %v5642_v57 = vpop.permute.xlu1 %5641  ;;  %v4788_v6 = vld [vmem:[%s6609_s26 + $0xac] sm:$0xff]  ;;  %v6078_v58 = vld [vmem:[%s6609_s26 + $0x64] sm:$0xff] }
 0x28f   : > { %5921 = vrot.lane.b32.xlu1 %v9036_v2, %s6218_s9  ;;  %5916 = vrot.lane.b32.xlu0 %v9040_v62, %s6217_s8  ;;  %v5534_v61 = vunpack.i.h.bf16 %v9041_v8  ;;  %v5533_v51 = vunpack.i.l.bf16 %v9041_v8  ;;  %v5574_v7 = vunpack.i.h.bf16 %v9042_v3  ;;  %v5573_v10 = vunpack.i.l.bf16 %v9042_v3  ;;  %v5637_v11 = vpop.permute.xlu0 %5636  ;;  %v9048_v48 = vld [vmem:[#allocation10_spill] sm:$0xff]  ;;  %v9053_v60 = vld [vmem:[#allocation63_spill] sm:$0xff]  ;;  %v9055_v62 = vld [vmem:[#allocation57_spill] sm:$0xff] }
 0x290   : > { %v5644_v40 = vunpack.i.h.bf16 %v5642_v57  ;;  %v5643_v21 = vunpack.i.l.bf16 %v5642_v57  ;;  %v5614_v37 = vunpack.i.h.bf16 %v7812_v12  ;;  %v5613_v59 = vunpack.i.l.bf16 %v7812_v12  ;;  %v4787_v12 = vld [vmem:[%s6609_s26 + $0xa4] sm:$0xff]  ;;  %v4635_v8 = vld [vmem:[%s6609_s26 + $0x98] sm:$0xff] }
 0x291   : > { %v5639_v24 = vunpack.i.h.bf16 %v5637_v11  ;;  %v5638_v9 = vunpack.i.l.bf16 %v5637_v11  ;;  %v2353_v45 = vsel %vm2342_vm10, %v2336_v15, %v5493_v23  ;;  %v2354_v39 = vsel %vm2342_vm10, %v2337_v25, %v5494_v33  ;;  %v9051_v29 = vld [vmem:[#allocation66_spill] sm:$0xff]  ;;  %v9058_v57 = vld [vmem:[#allocation64_spill] sm:$0xff] }
 0x292   : > { %v7920_v42 = vsel %vm2410_vm13, %v7791_v34, %v5643_v21  ;;  %v7924_v35 = vsel %vm2410_vm13, %v7794_v52, %v5644_v40  ;;  %v2370_v22 = vsel %vm211_vm2, %v2353_v45, %v5533_v51  ;;  %v2371_v36 = vsel %vm211_vm2, %v2354_v39, %v5534_v61  ;;  %v5652_v52 = vpop.permute.xlu1 %5651  ;;  %v4634_v25 = vld [vmem:[%s6609_s26 + $0x90] sm:$0xff]  ;;  %v9061_v21 = vld [vmem:[#allocation13_spill] sm:$0xff] }
 0x293   : > { %5931 = vrot.lane.b32.xlu1 %v9043_v63, %s6219_s10  ;;  %9044 = vst [vmem:[#allocation12_spill] sm:$0xff] %v7920_v42  ;;  %9045 = vst [vmem:[#allocation31_spill] sm:$0xff] %v7924_v35  ;;  %5926 = vrot.lane.b32.xlu0 %v9046_v38, %s6218_s9  ;;  %v7934_v4 = vsel %vm2410_vm13, %v7807_v1, %v5638_v9  ;;  %v7938_v34 = vsel %vm2410_vm13, %v7810_v17, %v5639_v24  ;;  %v5654_v14 = vunpack.i.h.bf16 %v5652_v52  ;;  %v7942_v28 = vpop.permute.xlu0 %5646  ;;  %v9050_v1 = vld [vmem:[#allocation62_spill] sm:$0xff]  ;;  %v9056_v61 = vld [vmem:[#allocation11_spill] sm:$0xff] }
 0x294   : > { %9047 = vst [vmem:[#allocation32_spill] sm:$0xff] %v7938_v34  ;;  %v2387_v18 = vsel %vm2376_vm11, %v2370_v22, %v5573_v10  ;;  %v2388_v0 = vsel %vm2376_vm11, %v2371_v36, %v5574_v7  ;;  %v5653_v20 = vunpack.i.l.bf16 %v5652_v52  ;;  %v9049_v30 = vunpack.i.l.bf16 %v9048_v48  ;;  %v9060_v10 = vld [vmem:[#allocation67_spill] sm:$0xff]  ;;  %v9064_v63 = vld [vmem:[#allocation16_spill] sm:$0xff]  ;;  %v9065_v36 = vld [vmem:[#allocation21_spill] sm:$0xff] }
 0x295   : > { %v2404_v17 = vsel %vm2393_vm12, %v2387_v18, %v5613_v59  ;;  %v2405_v41 = vsel %vm2393_vm12, %v2388_v0, %v5614_v37  ;;  %v7952_v32 = vpack.i.bf16 %v4788_v6, %v4787_v12  ;;  %v9052_v56 = vunpack.i.h.bf16 %v9048_v48  ;;  %v9066_v48 = vld [vmem:[#allocation25_spill] sm:$0xff]  ;;  %v9081_v42 = vld [vmem:[#allocation20_spill] sm:$0xff] }
 0x296   : > { %v2232_v27 = vsel %vm43_vm1, %v9050_v1, %v9049_v30  ;;  %v7959_v33 = vsel %vm2410_vm13, %v2404_v17, %v5653_v20  ;;  %v7962_v23 = vsel %vm2410_vm13, %v2405_v41, %v5654_v14  ;;  %v5945_v15 = vpack.i.bf16 %v9055_v62, %v6078_v58  ;;  %v5662_v9 = vpop.permute.xlu1 %5661 }
 0x297   : > { %5941 = vrot.lane.b32.xlu1 %v9051_v29, %s6227_s13  ;;  %v2233_v31 = vsel %vm43_vm1, %v9053_v60, %v9052_v56  ;;  %5936 = vrot.lane.b32.xlu0 %v9054_v54, %s6219_s10  ;;  %v9057_v51 = vunpack.i.l.bf16 %v9056_v61  ;;  %v9059_v7 = vunpack.i.h.bf16 %v9056_v61  ;;  %v9062_v11 = vunpack.i.l.bf16 %v9061_v21  ;;  %v5657_v22 = vpop.permute.xlu0 %5656  ;;  %v9071_v61 = vld [vmem:[#allocation41_spill] sm:$0xff] }
 0x298   : > { %v9063_v59 = vunpack.i.h.bf16 %v9061_v21  ;;  %v5269_v45 = vunpack.i.h.bf16 %v9064_v63  ;;  %v5268_v39 = vunpack.i.l.bf16 %v9064_v63  ;;  %v5664_v12 = vunpack.i.h.bf16 %v5662_v9  ;;  %v4680_v21 = vld [vmem:[%s6609_s26 + $0x6b] sm:$0xff] }
 0x299   : > { %v2241_v3 = vsel %vm2240_vm4, %v9058_v57, %v9057_v51  ;;  %v2242_v40 = vsel %vm2240_vm4, %v9060_v10, %v9059_v7  ;;  %v2249_v37 = vsel %vm2240_vm4, %v2232_v27, %v9062_v11  ;;  %v5663_v6 = vunpack.i.l.bf16 %v5662_v9  ;;  %v9072_v10 = vld [vmem:[#allocation68_spill] sm:$0xff] }
 0x29a   : > { %v2250_v24 = vsel %vm2240_vm4, %v2233_v31, %v9063_v59  ;;  %v5289_v52 = vunpack.i.h.bf16 %v9065_v36  ;;  %v5659_v18 = vunpack.i.h.bf16 %v5657_v22  ;;  %v5658_v0 = vunpack.i.l.bf16 %v5657_v22  ;;  %v5672_v56 = vpop.permute.xlu1 %5671  ;;  %v8048_v22 = vld [vmem:[%s6609_s26 + $0xb0] sm:$0xff] }
 0x29b   : > { %5951 = vrot.lane.b32.xlu1 %v7952_v32, %s6220_s11  ;;  %v5960_v14 = vpack.i.bf16 %v4635_v8, %v4634_v25  ;;  %v5288_v20 = vunpack.i.l.bf16 %v9065_v36  ;;  %v5309_v30 = vunpack.i.h.bf16 %v9066_v48  ;;  %v7993_v1 = vsel %vm2410_vm13, %v7866_v50, %v5663_v6  ;;  %5946 = vrot.lane.b32.xlu0 %v5945_v15, %s6220_s11  ;;  %v9069_v50 = vld [vmem:[#allocation30_spill] sm:$0xff]  ;;  %v8011_v62 = vpop.permute.xlu0 %5666  ;;  %v9070_v25 = vld [vmem:[#allocation35_spill] sm:$0xff] }
 0x29c   : > { %9067 = vst [vmem:[#allocation37_spill] sm:$0xff] %v7993_v1  ;;  %v7997_v27 = vsel %vm2410_vm13, %v7870_v49, %v5664_v12  ;;  %v5308_v17 = vunpack.i.l.bf16 %v9066_v48  ;;  %v8003_v41 = vsel %vm2410_vm13, %v7878_v43, %v5658_v0  ;;  %v8007_v29 = vsel %vm2410_vm13, %v7882_v46, %v5659_v18  ;;  %v9073_v12 = vld [vmem:[#allocation45_spill] sm:$0xff]  ;;  %v8051_v36 = vld [vmem:[%s6609_s26 + $0xb8] sm:$0xff] }
 0x29d   : > { %9068 = vst [vmem:[#allocation19_spill] sm:$0xff] %v7997_v27  ;;  %v5329_v60 = vunpack.i.h.bf16 %v9069_v50  ;;  %v5328_v49 = vunpack.i.l.bf16 %v9069_v50  ;;  %v5674_v31 = vunpack.i.h.bf16 %v5672_v56  ;;  %v5673_v58 = vunpack.i.l.bf16 %v5672_v56  ;;  %v8062_v48 = vld [vmem:[%s6609_s26 + $0xb9] sm:$0xff]  ;;  %v9074_v56 = vld [vmem:[#allocation49_spill] sm:$0xff] }
 0x29e   : > { %v2258_v15 = vsel %vm2257_vm5, %v2241_v3, %v5268_v39  ;;  %v2259_v43 = vsel %vm2257_vm5, %v2242_v40, %v5269_v45  ;;  %v5349_v46 = vunpack.i.h.bf16 %v9070_v25  ;;  %v5348_v8 = vunpack.i.l.bf16 %v9070_v25  ;;  %v4679_v40 = vld [vmem:[%s6609_s26 + $0x63] sm:$0xff]  ;;  %v8036_v63 = vpop.permute.xlu1 %5681 }
 0x29f   : > { %5961 = vrot.lane.b32.xlu1 %v5960_v14, %s6228_s17  ;;  %v5369_v51 = vunpack.i.h.bf16 %v9071_v61  ;;  %v5368_v57 = vunpack.i.l.bf16 %v9071_v61  ;;  %v8022_v7 = vsel %vm2427_vm14, %v7897_v16, %v5673_v58  ;;  %v8026_v3 = vsel %vm2427_vm14, %v7900_v19, %v5674_v31  ;;  %5956 = vrot.lane.b32.xlu0 %v9072_v10, %s6228_s17  ;;  %v8039_v19 = vld [vmem:[%s6609_s26 + $0x64] sm:$0xff]  ;;  %v8078_v58 = vld [vmem:[%s6609_s26 + $0xb2] sm:$0xff] }
 0x2a0   : > { %v2266_v11 = vsel %vm2257_vm5, %v2249_v37, %v5288_v20  ;;  %v2267_v59 = vsel %vm2257_vm5, %v2250_v24, %v5289_v52  ;;  %v2275_v9 = vsel %vm2274_vm6, %v2258_v15, %v5308_v17  ;;  %v2276_v16 = vsel %vm2274_vm6, %v2259_v43, %v5309_v30  ;;  %v8045_v24 = vpop.permute.xlu0 %5676  ;;  %v8059_v20 = vld [vmem:[%s6609_s26 + $0xb1] sm:$0xff]  ;;  %v8081_v15 = vld [vmem:[%s6609_s26 + $0xba] sm:$0xff] }
 0x2a1   : > { %v2283_v45 = vsel %vm2274_vm6, %v2266_v11, %v5328_v49  ;;  %v2284_v39 = vsel %vm2274_vm6, %v2267_v59, %v5329_v60  ;;  %v5389_v6 = vunpack.i.h.bf16 %v9073_v12  ;;  %v5388_v37 = vunpack.i.l.bf16 %v9073_v12  ;;  %v8070_v60 = vld [vmem:[%s6609_s26 + $0x71] sm:$0xff] }
 0x2a2   : > { %v2292_v52 = vsel %vm2291_vm7, %v2275_v9, %v5348_v8  ;;  %v2293_v18 = vsel %vm2291_vm7, %v2276_v16, %v5349_v46  ;;  %v5678_v0 = vunpack.i.l.bf16 %v8045_v24  ;;  %v5975_v14 = vpack.i.bf16 %v4680_v21, %v4679_v40  ;;  %v6079_v49 = vld [vmem:[%s6609_s26 + $0x6c] sm:$0xff]  ;;  %v8092_v61 = vpop.permute.xlu1 %5691  ;;  %v8103_v40 = vld [vmem:[%s6609_s26 + $0xbb] sm:$0xff] }
 0x2a3   : > { %5971 = vrot.lane.b32.xlu1 %v9046_v38, %s6213_s27  ;;  %v2300_v30 = vsel %vm2291_vm7, %v2283_v45, %v5368_v57  ;;  %v2301_v17 = vsel %vm2291_vm7, %v2284_v39, %v5369_v51  ;;  %v5408_v50 = vunpack.i.l.bf16 %v9074_v56  ;;  %5966 = vrot.lane.b32.xlu0 %v9036_v2, %s6213_s27  ;;  %v8073_v38 = vld [vmem:[%s6609_s26 + $0x79] sm:$0xff]  ;;  %v5985_v31 = vpack.i.bf16 %v6079_v49, %v8039_v19 }
 0x2a4   : > { %v8084_v43 = vld [vmem:[%s6609_s26 + $0x72] sm:$0xff]  ;;  %v5409_v25 = vunpack.i.h.bf16 %v9074_v56  ;;  %v8090_v8 = vsel %vm2427_vm14, %v7934_v4, %v5678_v0  ;;  %v6000_v51 = vpack.i.bf16 %v8051_v36, %v8048_v22  ;;  %v8097_v57 = vld [vmem:[%s6609_s26 + $0x7a] sm:$0xff]  ;;  %v2309_v21 = vsel %vm2308_vm8, %v2292_v52, %v5388_v37  ;;  %v8108_v59 = vpop.permute.xlu0 %5686  ;;  %v9078_v37 = vld [vmem:[#allocation65_spill] sm:$0xff] }
 0x2a5   : > { %v9075_v46 = vld [vmem:[#allocation55_spill] sm:$0xff]  ;;  %9076 = vst [vmem:[#allocation29_spill] sm:$0xff] %v8090_v8  ;;  %v2310_v11 = vsel %vm2308_vm8, %v2293_v18, %v5389_v6  ;;  %v8116_v19 = vld [vmem:[%s6609_s26 + $0x7b] sm:$0xff]  ;;  %v5468_v36 = vunpack.i.l.bf16 %v9078_v37  ;;  %v2317_v56 = vsel %vm2308_vm8, %v2300_v30, %v5408_v50  ;;  %v5469_v49 = vunpack.i.h.bf16 %v9078_v37  ;;  %v9079_v50 = vld [vmem:[#allocation70_spill] sm:$0xff] }
 0x2a6   : > { %v5428_v2 = vunpack.i.l.bf16 %v9075_v46  ;;  %v8100_v10 = vld [vmem:[%s6609_s26 + $0xb3] sm:$0xff]  ;;  %v5429_v4 = vunpack.i.h.bf16 %v9075_v46  ;;  %v8129_v52 = vld [vmem:[%s6609_s26 + $0xbc] sm:$0xff]  ;;  %v8146_v9 = vpop.permute.xlu1 %5701  ;;  %v5488_v37 = vunpack.i.l.bf16 %v9079_v50  ;;  %v5528_v27 = vunpack.i.l.bf16 %v9081_v42 }
 0x2a7   : > { %v8113_v16 = vld [vmem:[%s6609_s26 + $0x73] sm:$0xff]  ;;  %5981 = vrot.lane.b32.xlu1 %v9054_v54, %s6214_s28  ;;  %v8135_v0 = vld [vmem:[%s6609_s26 + $0x7c] sm:$0xff]  ;;  %5976 = vrot.lane.b32.xlu0 %v5975_v14, %s6214_s28  ;;  %v5628_v1 = vunpack.i.l.bf16 %v7886_v13 }
 0x2a8   : > { %v8119_v45 = vld [vmem:[%s6609_s26 + $0xb4] sm:$0xff]  ;;  %v2326_v6 = vsel %vm2325_vm9, %v2309_v21, %v5428_v2  ;;  %v2327_v14 = vsel %vm2325_vm9, %v2310_v11, %v5429_v4  ;;  %v8154_v46 = vpop.permute.xlu0 %5696  ;;  %v5489_v21 = vunpack.i.h.bf16 %v9079_v50  ;;  %v9084_v8 = vld [vmem:[#allocation61_spill] sm:$0xff] }
 0x2a9   : > { %v9077_v39 = vld [vmem:[#allocation60_spill] sm:$0xff]  ;;  %v2343_v30 = vsel %vm2342_vm10, %v2326_v6, %v5468_v36  ;;  %v2344_v54 = vsel %vm2342_vm10, %v2327_v14, %v5469_v49  ;;  %v9083_v36 = vld [vmem:[#allocation27_spill] sm:$0xff]  ;;  %v5589_v49 = vunpack.i.h.bf16 %v7762_v44  ;;  %v5588_v14 = vunpack.i.l.bf16 %v7762_v44 }
 0x2aa   : > { %v5449_v12 = vunpack.i.h.bf16 %v9077_v39  ;;  %v5448_v22 = vunpack.i.l.bf16 %v9077_v39  ;;  %v8132_v18 = vld [vmem:[%s6609_s26 + $0x74] sm:$0xff]  ;;  %v2318_v39 = vsel %vm2308_vm8, %v2301_v17, %v5409_v25  ;;  %v5568_v6 = vunpack.i.l.bf16 %v9083_v36  ;;  %v8175_v50 = vpop.permute.xlu1 %5711 }
 0x2ab   : > { %5991 = vrot.lane.b32.xlu1 %v7952_v32, %s6215_s29  ;;  %v9080_v11 = vld [vmem:[#allocation56_spill] sm:$0xff]  ;;  %5986 = vrot.lane.b32.xlu0 %v5985_v31, %s6215_s29  ;;  %v5609_v31 = vunpack.i.h.bf16 %v7828_v5  ;;  %v5629_v44 = vunpack.i.h.bf16 %v7886_v13 }
 0x2ac   : > { %v2334_v25 = vsel %vm2325_vm9, %v2317_v56, %v5448_v22  ;;  %v2335_v2 = vsel %vm2325_vm9, %v2318_v39, %v5449_v12  ;;  %v5509_v4 = vunpack.i.h.bf16 %v9080_v11  ;;  %v5508_v35 = vunpack.i.l.bf16 %v9080_v11  ;;  %v9082_v12 = vld [vmem:[#allocation24_spill] sm:$0xff]  ;;  %v8181_v17 = vpop.permute.xlu0 %5706 }
 0x2ad   : > { %v5529_v22 = vunpack.i.h.bf16 %v9081_v42  ;;  %v5549_v56 = vunpack.i.h.bf16 %v9082_v12  ;;  %v5548_v39 = vunpack.i.l.bf16 %v9082_v12  ;;  %v2351_v32 = vsel %vm2342_vm10, %v2334_v25, %v5488_v37 }
 0x2ae   : > { %v5569_v11 = vunpack.i.h.bf16 %v9083_v36  ;;  %v2352_v42 = vsel %vm2342_vm10, %v2335_v2, %v5489_v21  ;;  %v5608_v12 = vunpack.i.l.bf16 %v7828_v5  ;;  %v2360_v37 = vsel %vm211_vm2, %v2343_v30, %v5508_v35  ;;  %v8198_v34 = vpop.permute.xlu1 %5721 }
 0x2af   : > { %6001 = vrot.lane.b32.xlu1 %v6000_v51, %s6216_s30  ;;  %v2361_v25 = vsel %vm211_vm2, %v2344_v54, %v5509_v4  ;;  %v2368_v36 = vsel %vm211_vm2, %v2351_v32, %v5528_v27  ;;  %5996 = vrot.lane.b32.xlu0 %v9084_v8, %s6216_s30  ;;  %v2369_v2 = vsel %vm211_vm2, %v2352_v42, %v5529_v22  ;;  %v5648_v8 = vunpack.i.l.bf16 %v7942_v28  ;;  %v4640_v42 = vld [vmem:[%s6609_s26 + $0x39] sm:$0xff] }
 0x2b0   : > { %v2377_v21 = vsel %vm2376_vm11, %v2360_v37, %v5548_v39  ;;  %v2378_v5 = vsel %vm2376_vm11, %v2361_v25, %v5549_v56  ;;  %v2385_v51 = vsel %vm2376_vm11, %v2368_v36, %v5568_v6  ;;  %v2386_v35 = vsel %vm2376_vm11, %v2369_v2, %v5569_v11  ;;  %v8204_v54 = vpop.permute.xlu0 %5716  ;;  %v4639_v11 = vld [vmem:[%s6609_s26 + $0x31] sm:$0xff] }
 0x2b1   : > { %v2394_v27 = vsel %vm2393_vm12, %v2377_v21, %v5588_v14  ;;  %v2395_v13 = vsel %vm2393_vm12, %v2378_v5, %v5589_v49  ;;  %v2402_v30 = vsel %vm2393_vm12, %v2385_v51, %v5608_v12  ;;  %v8208_v4 = vsel %vm2393_vm12, %v2386_v35, %v5609_v31 }
 0x2b2   : > { %v8211_v22 = vsel %vm2410_vm13, %v2394_v27, %v5628_v1  ;;  %v5683_v56 = vunpack.i.l.bf16 %v8036_v63  ;;  %v9085_v39 = vpack.i.bf16 %v8062_v48, %v8059_v20  ;;  %v8219_v6 = vsel %vm2410_vm13, %v2395_v13, %v5629_v44  ;;  %v5732_v37 = vpop.permute.xlu1 %5731 }
 0x2b3   : > { %v5649_v32 = vunpack.i.h.bf16 %v7942_v28  ;;  %v5684_v49 = vunpack.i.h.bf16 %v8036_v63  ;;  %v5693_v14 = vunpack.i.l.bf16 %v8092_v61  ;;  %v9086_v1 = vpack.i.bf16 %v8073_v38, %v8070_v60 }
 0x2b4   : > { %6011 = vrot.lane.b32.xlu1 %v9085_v39, %s6217_s8  ;;  %v5694_v31 = vunpack.i.h.bf16 %v8092_v61  ;;  %v5689_v20 = vunpack.i.h.bf16 %v8108_v59  ;;  %v5688_v48 = vunpack.i.l.bf16 %v8108_v59  ;;  %v5703_v12 = vunpack.i.l.bf16 %v8146_v9  ;;  %v5727_v2 = vpop.permute.xlu0 %5726 }
 0x2b5   : > { %6006 = vrot.lane.b32.xlu0 %v9086_v1, %s6217_s8  ;;  %v8235_v25 = vsel %vm2410_vm13, %v2402_v30, %v5648_v8  ;;  %v5669_v63 = vunpack.i.h.bf16 %v8011_v62  ;;  %v5668_v36 = vunpack.i.l.bf16 %v8011_v62  ;;  %v5704_v44 = vunpack.i.h.bf16 %v8146_v9 }
 0x2b6   : > { %v2973_v21 = vsel %vm28_vm0, %v4639_v11, %v5683_v56  ;;  %v5679_v61 = vunpack.i.h.bf16 %v8045_v24  ;;  %v5699_v5 = vunpack.i.h.bf16 %v8154_v46  ;;  %v5698_v59 = vunpack.i.l.bf16 %v8154_v46  ;;  %v5742_v56 = vpop.permute.xlu1 %5741 }
 0x2b7   : > { %v9087_v51 = vpack.i.bf16 %v8081_v15, %v8078_v58  ;;  %v2974_v35 = vsel %vm28_vm0, %v4640_v42, %v5684_v49  ;;  %v2989_v27 = vsel %vm43_vm1, %v2973_v21, %v5693_v14  ;;  %v5714_v9 = vunpack.i.h.bf16 %v8175_v50 }
 0x2b8   : > { %v5713_v13 = vunpack.i.l.bf16 %v8175_v50  ;;  %v9088_v8 = vpack.i.bf16 %v8097_v57, %v8084_v43  ;;  %v2990_v46 = vsel %vm43_vm1, %v2974_v35, %v5694_v31  ;;  %v2982_v30 = vsel %vm28_vm0, %v8073_v38, %v5689_v20  ;;  %v5737_v57 = vpop.permute.xlu0 %5736 }
 0x2b9   : > { %6021 = vrot.lane.b32.xlu1 %v9087_v51, %s6218_s9  ;;  %v2981_v58 = vsel %vm28_vm0, %v8070_v60, %v5688_v48  ;;  %v3005_v15 = vsel %vm2240_vm4, %v2989_v27, %v5703_v12  ;;  %v3006_v39 = vsel %vm2240_vm4, %v2990_v46, %v5704_v44  ;;  %v5709_v50 = vunpack.i.h.bf16 %v8181_v17 }
 0x2ba   : > { %6016 = vrot.lane.b32.xlu0 %v9088_v8, %s6218_s9  ;;  %v5708_v11 = vunpack.i.l.bf16 %v8181_v17  ;;  %v5723_v43 = vunpack.i.l.bf16 %v8198_v34  ;;  %v2997_v49 = vsel %vm43_vm1, %v2981_v58, %v5698_v59  ;;  %v2998_v14 = vsel %vm43_vm1, %v2982_v30, %v5699_v5  ;;  %v8281_v5 = vpop.permute.xlu1 %5751 }
 0x2bb   : > { %v5724_v38 = vunpack.i.h.bf16 %v8198_v34  ;;  %v5718_v60 = vunpack.i.l.bf16 %v8204_v54  ;;  %v9089_v1 = vpack.i.bf16 %v8103_v40, %v8100_v10  ;;  %v3021_v42 = vsel %vm2257_vm5, %v3005_v15, %v5713_v13 }
 0x2bc   : > { %v3022_v17 = vsel %vm2257_vm5, %v3006_v39, %v5714_v9  ;;  %v5719_v31 = vunpack.i.h.bf16 %v8204_v54  ;;  %v5728_v20 = vunpack.i.l.bf16 %v5727_v2  ;;  %v9090_v48 = vpack.i.bf16 %v8116_v19, %v8113_v16  ;;  %v5747_v51 = vpop.permute.xlu0 %5746 }
 0x2bd   : > { %6031 = vrot.lane.b32.xlu1 %v9089_v1, %s6219_s10  ;;  %v5734_v34 = vunpack.i.h.bf16 %v5732_v37  ;;  %v5733_v12 = vunpack.i.l.bf16 %v5732_v37  ;;  %v5729_v44 = vunpack.i.h.bf16 %v5727_v2  ;;  %v5738_v21 = vunpack.i.l.bf16 %v5737_v57 }
 0x2be   : > { %6026 = vrot.lane.b32.xlu0 %v9090_v48, %s6219_s10  ;;  %v3013_v10 = vsel %vm2240_vm4, %v2997_v49, %v5708_v11  ;;  %v3014_v40 = vsel %vm2240_vm4, %v2998_v14, %v5709_v50  ;;  %v3037_v59 = vsel %vm2274_vm6, %v3021_v42, %v5723_v43  ;;  %v5739_v54 = vunpack.i.h.bf16 %v5737_v57  ;;  %v5762_v15 = vpop.permute.xlu1 %5761 }
 0x2bf   : > { %v3038_v35 = vsel %vm2274_vm6, %v3022_v17, %v5724_v38  ;;  %v3029_v16 = vsel %vm2257_vm5, %v3013_v10, %v5718_v60  ;;  %v5749_v19 = vunpack.i.h.bf16 %v5747_v51  ;;  %v5748_v27 = vunpack.i.l.bf16 %v5747_v51 }
 0x2c0   : > { %v3030_v37 = vsel %vm2257_vm5, %v3014_v40, %v5719_v31  ;;  %v3045_v2 = vsel %vm2274_vm6, %v3029_v16, %v5728_v20  ;;  %v5744_v9 = vunpack.i.h.bf16 %v5742_v56  ;;  %v5743_v13 = vunpack.i.l.bf16 %v5742_v56  ;;  %v5757_v43 = vpop.permute.xlu0 %5756 }
 0x2c1   : > { %6041 = vrot.lane.b32.xlu1 %v7489_v53, %s6227_s13  ;;  %v3053_v8 = vsel %vm2291_vm7, %v3037_v59, %v5733_v12  ;;  %v3054_v46 = vsel %vm2291_vm7, %v3038_v35, %v5734_v34  ;;  %v3046_v30 = vsel %vm2274_vm6, %v3030_v37, %v5729_v44  ;;  %v3061_v58 = vsel %vm2291_vm7, %v3045_v2, %v5738_v21  ;;  %v4649_v37 = vld [vmem:[%s6609_s26 + $0x81] sm:$0xff]  ;;  %v4650_v2 = vld [vmem:[%s6609_s26 + $0x89] sm:$0xff] }
 0x2c2   : > { %6036 = vrot.lane.b32.xlu0 %v7474_v55, %s6227_s13  ;;  %v3062_v53 = vsel %vm2291_vm7, %v3046_v30, %v5739_v54  ;;  %v5753_v39 = vunpack.i.l.bf16 %v8281_v5  ;;  %v5764_v50 = vunpack.i.h.bf16 %v5762_v15  ;;  %v5763_v11 = vunpack.i.l.bf16 %v5762_v15  ;;  %v4642_v30 = vld [vmem:[%s6609_s26 + $0x49] sm:$0xff] }
 0x2c3   : > { %v5759_v56 = vunpack.i.h.bf16 %v5757_v43  ;;  %v5758_v57 = vunpack.i.l.bf16 %v5757_v43  ;;  %v9091_v55 = vpack.i.bf16 %v8129_v52, %v8119_v45  ;;  %v3077_v49 = vsel %vm2308_vm8, %v3061_v58, %v5748_v27  ;;  %v5772_v52 = vpop.permute.xlu1 %5771 }
 0x2c4   : > { %v3078_v14 = vsel %vm2308_vm8, %v3062_v53, %v5749_v19  ;;  %v9092_v38 = vpack.i.bf16 %v8135_v0, %v8132_v18  ;;  %v3069_v60 = vsel %vm2308_vm8, %v3053_v8, %v5743_v13  ;;  %v3070_v1 = vsel %vm2308_vm8, %v3054_v46, %v5744_v9  ;;  %v5767_v12 = vpop.permute.xlu0 %5766  ;;  %v4641_v46 = vld [vmem:[%s6609_s26 + $0x41] sm:$0xff] }
 0x2c5   : > { %6051 = vrot.lane.b32.xlu1 %v9091_v55, %s6220_s11  ;;  %v3093_v42 = vsel %vm2325_vm9, %v3077_v49, %v5763_v11  ;;  %v3094_v17 = vsel %vm2325_vm9, %v3078_v14, %v5764_v50  ;;  %v2420_v45 = vsel %vm2410_vm13, %v8208_v4, %v5649_v32  ;;  %v3085_v31 = vsel %vm2325_vm9, %v3069_v60, %v5758_v57 }
 0x2c6   : > { %6046 = vrot.lane.b32.xlu0 %v9092_v38, %s6220_s11  ;;  %v3086_v20 = vsel %vm2325_vm9, %v3070_v1, %v5759_v56  ;;  %v3110_v18 = vpack.c.bf16 %v3094_v17, %v3093_v42  ;;  %v2428_v0 = vsel %vm2427_vm14, %v8211_v22, %v5668_v36  ;;  %v5774_v48 = vunpack.i.h.bf16 %v5772_v52 }
 0x2c7   : > { %v5773_v34 = vunpack.i.l.bf16 %v5772_v52  ;;  %v3102_v44 = vpack.c.bf16 %v3086_v20, %v3085_v31  ;;  %v2436_v28 = vsel %vm2427_vm14, %v8235_v25, %v5679_v61  ;;  %v2437_v4 = vsel %vm2427_vm14, %v2420_v45, %v5753_v39  ;;  %v5782_v36 = vpop.permute.xlu1 %5781 }
 0x2c8   : > { %v5769_v32 = vunpack.i.h.bf16 %v5767_v12  ;;  %v5768_v21 = vunpack.i.l.bf16 %v5767_v12  ;;  %4808 = vmatprep.mubr.msk.bf16.mxu1 %vm2342_vm10, %v3110_v18  ;;  %v2429_v22 = vsel %vm2427_vm14, %v8219_v6, %v5669_v63  ;;  %v2454_v25 = vsel %vm2444_vm15, %v2437_v4, %v5774_v48  ;;  %v5777_v62 = vpop.permute.xlu0 %5776 }
 0x2c9   : > { %6061 = vrot.lane.b32.xlu1 %v7568_v26, %s6228_s17  ;;  %4804 = vmatprep.mubr.msk.bf16.mxu0 %vm2342_vm10, %v3102_v44  ;;  %v2453_v24 = vsel %vm2444_vm15, %v2436_v28, %v5773_v34  ;;  %v5784_v16 = vunpack.i.h.bf16 %v5782_v36  ;;  %v5783_v19 = vunpack.i.l.bf16 %v5782_v36  ;;  %v5779_v9 = vunpack.i.h.bf16 %v5777_v62 }
 0x2ca   : > { %6056 = vrot.lane.b32.xlu0 %v7542_v47, %s6228_s17  ;;  %v2445_v61 = vsel %vm2444_vm15, %v2428_v0, %v5768_v21  ;;  %v2446_v26 = vsel %vm2444_vm15, %v2429_v22, %v5769_v32  ;;  %v3109_v10 = vpack.c.bf16 %v2454_v25, %v2453_v24  ;;  %v5778_v13 = vunpack.i.l.bf16 %v5777_v62 }
 0x2cb   : > { %v3101_v40 = vpack.c.bf16 %v2446_v26, %v2445_v61  ;;  %v5792_v47 = vpop.permute.xlu1 %5791  ;;  %v2984_v11 = vsel %vm28_vm0, %v4650_v2, %v5784_v16  ;;  %v2983_v43 = vsel %vm28_vm0, %v4649_v37, %v5783_v19  ;;  %v2976_v49 = vsel %vm28_vm0, %v4642_v30, %v5779_v9 }
 0x2cc   : > { %3310 = vmatmul.mubr.bf16.vlgmr.msra.gmra.mrb[0].mxu1 %v3109_v10  ;;  %v5787_v6 = vpop.permute.xlu0 %5786  ;;  %v5793_v8 = vunpack.i.l.bf16 %v5792_v47  ;;  %v5794_v58 = vunpack.i.h.bf16 %v5792_v47  ;;  %v2975_v14 = vsel %vm28_vm0, %v4641_v46, %v5778_v13 }
 0x2cd   : > { %3278 = vmatmul.mubr.bf16.vlgmr.msra.gmra.mrb[0].mxu0 %v3101_v40  ;;  %v5788_v15 = vunpack.i.l.bf16 %v5787_v6  ;;  %v5789_v53 = vunpack.i.h.bf16 %v5787_v6 }
 0x2ce   : > { %v2999_v38 = vsel %vm43_vm1, %v2983_v43, %v5793_v8  ;;  %v3000_v1 = vsel %vm43_vm1, %v2984_v11, %v5794_v58  ;;  %v5754_v8 = vunpack.i.h.bf16 %v8281_v5 }
 0x2cf   : > { %v5802_v63 = vpop.permute.xlu1 %5801  ;;  %v2991_v42 = vsel %vm43_vm1, %v2975_v14, %v5788_v15  ;;  %v2992_v52 = vsel %vm43_vm1, %v2976_v49, %v5789_v53 }
 0x2d0   : > { %v5797_v59 = vpop.permute.xlu0 %5796  ;;  %v5803_v39 = vunpack.i.l.bf16 %v5802_v63  ;;  %v5804_v56 = vunpack.i.h.bf16 %v5802_v63 }
 0x2d1   : > { %v5798_v57 = vunpack.i.l.bf16 %v5797_v59  ;;  %v5799_v60 = vunpack.i.h.bf16 %v5797_v59 }
 0x2d2   : > { %v3015_v31 = vsel %vm2240_vm4, %v2999_v38, %v5803_v39  ;;  %v3016_v48 = vsel %vm2240_vm4, %v3000_v1, %v5804_v56 }
 0x2d3   : > { %v8343_v54 = vpop.permute.xlu1 %5811  ;;  %v3007_v34 = vsel %vm2240_vm4, %v2991_v42, %v5798_v57  ;;  %v3008_v4 = vsel %vm2240_vm4, %v2992_v52, %v5799_v60 }
 0x2d4   : > { %v5807_v51 = vpop.permute.xlu0 %5806  ;;  %v5814_v32 = vunpack.i.h.bf16 %v8343_v54  ;;  %v5813_v24 = vunpack.i.l.bf16 %v8343_v54 }
 0x2d5   : > { %v5809_v17 = vunpack.i.h.bf16 %v5807_v51  ;;  %v5808_v45 = vunpack.i.l.bf16 %v5807_v51 }
 0x2d6   : > { %v3031_v37 = vsel %vm2257_vm5, %v3015_v31, %v5813_v24  ;;  %v3032_v46 = vsel %vm2257_vm5, %v3016_v48, %v5814_v32 }
 0x2d7   : > { %v8345_v35 = vpop.permute.xlu1 %5821  ;;  %v3023_v25 = vsel %vm2257_vm5, %v3007_v34, %v5808_v45  ;;  %v3024_v36 = vsel %vm2257_vm5, %v3008_v4, %v5809_v17 }
 0x2d8   : > { %v5817_v27 = vpop.permute.xlu0 %5816  ;;  %v5824_v61 = vunpack.i.h.bf16 %v8345_v35  ;;  %v5823_v26 = vunpack.i.l.bf16 %v8345_v35 }
 0x2d9   : > { %v5819_v20 = vunpack.i.h.bf16 %v5817_v27  ;;  %v5818_v18 = vunpack.i.l.bf16 %v5817_v27 }
 0x2da   : > { %v3047_v30 = vsel %vm2274_vm6, %v3031_v37, %v5823_v26  ;;  %v3048_v53 = vsel %vm2274_vm6, %v3032_v46, %v5824_v61 }
 0x2db   : > { %v5832_v50 = vpop.permute.xlu1 %5831  ;;  %v3039_v10 = vsel %vm2274_vm6, %v3023_v25, %v5818_v18  ;;  %v3040_v62 = vsel %vm2274_vm6, %v3024_v36, %v5819_v20  ;;  %v4643_v25 = vld [vmem:[%s6609_s26 + $0x51] sm:$0xff]  ;;  %v4644_v36 = vld [vmem:[%s6609_s26 + $0x59] sm:$0xff] }
 0x2dc   : > { %v5827_v55 = vpop.permute.xlu0 %5826  ;;  %v5833_v40 = vunpack.i.l.bf16 %v5832_v50  ;;  %v5834_v16 = vunpack.i.h.bf16 %v5832_v50 }
 0x2dd   : > { %v5829_v12 = vunpack.i.h.bf16 %v5827_v55  ;;  %v5828_v44 = vunpack.i.l.bf16 %v5827_v55 }
 0x2de   : > { %v3063_v39 = vsel %vm2291_vm7, %v3047_v30, %v5833_v40  ;;  %v3064_v56 = vsel %vm2291_vm7, %v3048_v53, %v5834_v16 }
 0x2df   : > { %v5842_v0 = vpop.permute.xlu1 %5841  ;;  %v3055_v6 = vsel %vm2291_vm7, %v3039_v10, %v5828_v44  ;;  %v3056_v63 = vsel %vm2291_vm7, %v3040_v62, %v5829_v12 }
 0x2e0   : > { %v5837_v28 = vpop.permute.xlu0 %5836  ;;  %v5843_v19 = vunpack.i.l.bf16 %v5842_v0  ;;  %v5844_v2 = vunpack.i.h.bf16 %v5842_v0  ;;  %v2438_v0 = vsel %vm2427_vm14, %v7959_v33, %v5754_v8 }
 0x2e1   : > { %v5839_v21 = vunpack.i.h.bf16 %v5837_v28  ;;  %v5838_v22 = vunpack.i.l.bf16 %v5837_v28 }
 0x2e2   : > { %v3079_v57 = vsel %vm2308_vm8, %v3063_v39, %v5843_v19  ;;  %v3080_v5 = vsel %vm2308_vm8, %v3064_v56, %v5844_v2 }
 0x2e3   : > { %v5852_v47 = vpop.permute.xlu1 %5851  ;;  %v3071_v27 = vsel %vm2308_vm8, %v3055_v6, %v5838_v22  ;;  %v3072_v35 = vsel %vm2308_vm8, %v3056_v63, %v5839_v21 }
 0x2e4   : > { %v5854_v59 = vunpack.i.h.bf16 %v5852_v47  ;;  %v5853_v54 = vunpack.i.l.bf16 %v5852_v47  ;;  %v8373_v51 = vpop.permute.xlu0 %5846 }
 0x2e5   : > { %v5848_v14 = vunpack.i.l.bf16 %v8373_v51  ;;  %v5849_v63 = vunpack.i.h.bf16 %v8373_v51 }
 0x2e6   : > { %v3087_v9 = vsel %vm2325_vm9, %v3071_v27, %v5853_v54  ;;  %v3088_v13 = vsel %vm2325_vm9, %v3072_v35, %v5854_v59  ;;  %v4651_v59 = vld [vmem:[%s6609_s26 + $0x91] sm:$0xff]  ;;  %v4652_v54 = vld [vmem:[%s6609_s26 + $0x99] sm:$0xff] }
 0x2e7   : > { %v3104_v58 = vpack.c.bf16 %v3088_v13, %v3087_v9  ;;  %v5862_v15 = vpop.permute.xlu1 %5861 }
 0x2e8   : > { %v5864_v50 = vunpack.i.h.bf16 %v5862_v15  ;;  %v5863_v11 = vunpack.i.l.bf16 %v5862_v15  ;;  %v5857_v43 = vpop.permute.xlu0 %5856 }
 0x2e9   : > { %v5859_v55 = vunpack.i.h.bf16 %v5857_v43  ;;  %v5858_v49 = vunpack.i.l.bf16 %v5857_v43  ;;  %4805 = vmatprep.mubr.msk.bf16.mxu0 %vm2342_vm10, %v3104_v58 }
 0x2ea   : > { %v2447_v38 = vsel %vm2444_vm15, %v8022_v7, %v5863_v11  ;;  %v2448_v60 = vsel %vm2444_vm15, %v8026_v3, %v5864_v50  ;;  %v2439_v7 = vsel %vm2427_vm14, %v7962_v23, %v5848_v14 }
 0x2eb   : > { %v3096_v1 = vsel %vm2325_vm9, %v3080_v5, %v5859_v55  ;;  %v3095_v42 = vsel %vm2325_vm9, %v3079_v57, %v5858_v49  ;;  %v5872_v17 = vpop.permute.xlu1 %5871  ;;  %v3103_v45 = vpack.c.bf16 %v2448_v60, %v2447_v38 }
 0x2ec   : > { %v3112_v52 = vpack.c.bf16 %v3096_v1, %v3095_v42  ;;  %v5867_v31 = vpop.permute.xlu0 %5866  ;;  %v5874_v22 = vunpack.i.h.bf16 %v5872_v17  ;;  %v5873_v24 = vunpack.i.l.bf16 %v5872_v17 }
 0x2ed   : > { %v5869_v20 = vunpack.i.h.bf16 %v5867_v31  ;;  %v5868_v18 = vunpack.i.l.bf16 %v5867_v31  ;;  %3286 = vmatmul.mubr.bf16.gmra.mrb[4].mxu0 %v3103_v45 }
 0x2ee   : > { %4809 = vmatprep.mubr.msk.bf16.mxu1 %vm2342_vm10, %v3112_v52  ;;  %v2978_v19 = vsel %vm28_vm0, %v4644_v36, %v5874_v22  ;;  %v2977_v27 = vsel %vm28_vm0, %v4643_v25, %v5873_v24 }
 0x2ef   : > { %v5882_v3 = vpop.permute.xlu1 %5881  ;;  %v2455_v48 = vsel %vm2444_vm15, %v2438_v0, %v5868_v18  ;;  %v2456_v34 = vsel %vm2444_vm15, %v2439_v7, %v5869_v20 }
 0x2f0   : > { %v5877_v12 = vpop.permute.xlu0 %5876  ;;  %v3111_v44 = vpack.c.bf16 %v2456_v34, %v2455_v48  ;;  %v5884_v61 = vunpack.i.h.bf16 %v5882_v3  ;;  %v5883_v26 = vunpack.i.l.bf16 %v5882_v3 }
 0x2f1   : > { %v5879_v10 = vunpack.i.h.bf16 %v5877_v12  ;;  %v5878_v62 = vunpack.i.l.bf16 %v5877_v12 }
 0x2f2   : > { %3318 = vmatmul.mubr.bf16.gmra.mrb[4].mxu1 %v3111_v44  ;;  %v2993_v2 = vsel %vm43_vm1, %v2977_v27, %v5883_v26  ;;  %v2994_v9 = vsel %vm43_vm1, %v2978_v19, %v5884_v61 }
 0x2f3   : > { %v5892_v28 = vpop.permute.xlu1 %5891  ;;  %v2986_v46 = vsel %vm28_vm0, %v4652_v54, %v5879_v10  ;;  %v2985_v30 = vsel %vm28_vm0, %v4651_v59, %v5878_v62 }
 0x2f4   : > { %v5887_v4 = vpop.permute.xlu0 %5886  ;;  %v5894_v40 = vunpack.i.h.bf16 %v5892_v28  ;;  %v5893_v47 = vunpack.i.l.bf16 %v5892_v28 }
 0x2f5   : > { %v5889_v35 = vunpack.i.h.bf16 %v5887_v4  ;;  %v5888_v37 = vunpack.i.l.bf16 %v5887_v4 }
 0x2f6   : > { %v3009_v58 = vsel %vm2240_vm4, %v2993_v2, %v5893_v47  ;;  %v3010_v15 = vsel %vm2240_vm4, %v2994_v9, %v5894_v40 }
 0x2f7   : > { %v5902_v32 = vpop.permute.xlu1 %5901  ;;  %v3001_v57 = vsel %vm43_vm1, %v2985_v30, %v5888_v37  ;;  %v3002_v55 = vsel %vm43_vm1, %v2986_v46, %v5889_v35 }
 0x2f8   : > { %v5897_v33 = vpop.permute.xlu0 %5896  ;;  %v5904_v13 = vunpack.i.h.bf16 %v5902_v32  ;;  %v5903_v8 = vunpack.i.l.bf16 %v5902_v32 }
 0x2f9   : > { %v5899_v39 = vunpack.i.h.bf16 %v5897_v33  ;;  %v5898_v50 = vunpack.i.l.bf16 %v5897_v33 }
 0x2fa   : > { %v3025_v14 = vsel %vm2257_vm5, %v3009_v58, %v5903_v8  ;;  %v3026_v38 = vsel %vm2257_vm5, %v3010_v15, %v5904_v13 }
 0x2fb   : > { %v3017_v20 = vsel %vm2240_vm4, %v3001_v57, %v5898_v50  ;;  %v3018_v18 = vsel %vm2240_vm4, %v3002_v55, %v5899_v39  ;;  %v9093_v50 = vld [vmem:[#allocation32_spill] sm:$0xff] }
 0x2fc   : > { %v5907_v23 = vpop.permute.xlu0 %5906 }
 0x2fd   : > { %v5912_v21 = vpop.permute.xlu1 %5911  ;;  %v5909_v49 = vunpack.i.h.bf16 %v5907_v23  ;;  %v5908_v5 = vunpack.i.l.bf16 %v5907_v23 }
 0x2fe   : > { %v5914_v11 = vunpack.i.h.bf16 %v5912_v21  ;;  %v5913_v43 = vunpack.i.l.bf16 %v5912_v21 }
 0x2ff   : > { %v3033_v48 = vsel %vm2257_vm5, %v3017_v20, %v5908_v5  ;;  %v3034_v34 = vsel %vm2257_vm5, %v3018_v18, %v5909_v49  ;;  %v4653_v20 = vld [vmem:[%s6609_s26 + $0xa1] sm:$0xff]  ;;  %v4654_v18 = vld [vmem:[%s6609_s26 + $0xa9] sm:$0xff] }
 0x300   : > { %v3041_v0 = vsel %vm2274_vm6, %v3025_v14, %v5913_v43  ;;  %v3042_v7 = vsel %vm2274_vm6, %v3026_v38, %v5914_v11  ;;  %v2433_v11 = vsel %vm2427_vm14, %v9093_v50, %v5849_v63 }
 0x301   : > { %v5922_v6 = vpop.permute.xlu1 %5921  ;;  %v5917_v16 = vpop.permute.xlu0 %5916 }
 0x302   : > { %v5919_v60 = vunpack.i.h.bf16 %v5917_v16  ;;  %v5918_v1 = vunpack.i.l.bf16 %v5917_v16  ;;  %v5924_v42 = vunpack.i.h.bf16 %v5922_v6  ;;  %v5923_v17 = vunpack.i.l.bf16 %v5922_v6 }
 0x304   : > { %v3049_v28 = vsel %vm2274_vm6, %v3033_v48, %v5918_v1  ;;  %v3050_v4 = vsel %vm2274_vm6, %v3034_v34, %v5919_v60  ;;  %v3057_v21 = vsel %vm2291_vm7, %v3041_v0, %v5923_v17  ;;  %v3058_v23 = vsel %vm2291_vm7, %v3042_v7, %v5924_v42  ;;  %v4645_v34 = vld [vmem:[%s6609_s26 + $0x61] sm:$0xff] }
 0x305   : > { %v5932_v53 = vpop.permute.xlu1 %5931  ;;  %v5927_v56 = vpop.permute.xlu0 %5926 }
 0x306   : > { %v5929_v45 = vunpack.i.h.bf16 %v5927_v56  ;;  %v5928_v52 = vunpack.i.l.bf16 %v5927_v56  ;;  %v5934_v32 = vunpack.i.h.bf16 %v5932_v53  ;;  %v5933_v33 = vunpack.i.l.bf16 %v5932_v53 }
 0x308   : > { %v3065_v22 = vsel %vm2291_vm7, %v3049_v28, %v5928_v52  ;;  %v3066_v24 = vsel %vm2291_vm7, %v3050_v4, %v5929_v45  ;;  %v3073_v54 = vsel %vm2308_vm8, %v3057_v21, %v5933_v33  ;;  %v3074_v16 = vsel %vm2308_vm8, %v3058_v23, %v5934_v32 }
 0x309   : > { %v5942_v31 = vpop.permute.xlu1 %5941  ;;  %v5937_v3 = vpop.permute.xlu0 %5936 }
 0x30a   : > { %v5939_v12 = vunpack.i.h.bf16 %v5937_v3  ;;  %v5938_v44 = vunpack.i.l.bf16 %v5937_v3  ;;  %v5944_v36 = vunpack.i.h.bf16 %v5942_v31  ;;  %v5943_v61 = vunpack.i.l.bf16 %v5942_v31 }
 0x30c   : > { %v3081_v40 = vsel %vm2308_vm8, %v3065_v22, %v5938_v44  ;;  %v3082_v47 = vsel %vm2308_vm8, %v3066_v24, %v5939_v12  ;;  %v2440_v58 = vsel %vm2427_vm14, %v8003_v41, %v5943_v61  ;;  %v2441_v15 = vsel %vm2427_vm14, %v8007_v29, %v5944_v36  ;;  %v9094_v41 = vld [vmem:[#allocation29_spill] sm:$0xff] }
 0x30d   : > { %v5952_v25 = vpop.permute.xlu1 %5951  ;;  %v5947_v62 = vpop.permute.xlu0 %5946  ;;  %v4646_v12 = vld [vmem:[%s6609_s26 + $0x69] sm:$0xff]  ;;  %s8511_s26 = scalar_lea.vmem [#allocation4], %s4382_s25  ;;  %s8560_s25 = smov (%p794_p2), 0  }
 0x30e   : > { %v5954_v26 = vunpack.i.h.bf16 %v5952_v25  ;;  %v5953_v10 = vunpack.i.l.bf16 %v5952_v25  ;;  %v5949_v6 = vunpack.i.h.bf16 %v5947_v62  ;;  %v5948_v59 = vunpack.i.l.bf16 %v5947_v62 }
 0x310   : > { %v3097_v19 = vsel %vm2325_vm9, %v3081_v40, %v5953_v10  ;;  %v3098_v27 = vsel %vm2325_vm9, %v3082_v47, %v5954_v26  ;;  %v3090_v37 = vsel %vm2325_vm9, %v3074_v16, %v5949_v6  ;;  %v3089_v2 = vsel %vm2325_vm9, %v3073_v54, %v5948_v59 }
 0x311   : > { %v3114_v35 = vpack.c.bf16 %v3098_v27, %v3097_v19  ;;  %v5962_v9 = vpop.permute.xlu1 %5961  ;;  %v3106_v13 = vpack.c.bf16 %v3090_v37, %v3089_v2  ;;  %v5957_v30 = vpop.permute.xlu0 %5956 }
 0x312   : > { %v5964_v8 = vunpack.i.h.bf16 %v5962_v9  ;;  %v5963_v46 = vunpack.i.l.bf16 %v5962_v9  ;;  %v5959_v53 = vunpack.i.h.bf16 %v5957_v30  ;;  %v5958_v39 = vunpack.i.l.bf16 %v5957_v30 }
 0x313   : > { %4810 = vmatprep.mubr.msk.bf16.mxu1 %vm2342_vm10, %v3114_v35  ;;  %4806 = vmatprep.mubr.msk.bf16.mxu0 %vm2342_vm10, %v3106_v13 }
 0x314   : > { %v2457_v43 = vsel %vm2444_vm15, %v2440_v58, %v5963_v46  ;;  %v2458_v56 = vsel %vm2444_vm15, %v2441_v15, %v5964_v8  ;;  %v2449_v55 = vsel %vm2444_vm15, %v9094_v41, %v5958_v39  ;;  %v2450_v29 = vsel %vm2444_vm15, %v2433_v11, %v5959_v53 }
 0x315   : > { %v5972_v57 = vpop.permute.xlu1 %5971  ;;  %v3113_v49 = vpack.c.bf16 %v2458_v56, %v2457_v43  ;;  %v5967_v5 = vpop.permute.xlu0 %5966  ;;  %v3105_v51 = vpack.c.bf16 %v2450_v29, %v2449_v55 }
 0x316   : > { %v5974_v52 = vunpack.i.h.bf16 %v5972_v57  ;;  %v5973_v31 = vunpack.i.l.bf16 %v5972_v57  ;;  %v5969_v0 = vunpack.i.h.bf16 %v5967_v5  ;;  %v5968_v7 = vunpack.i.l.bf16 %v5967_v5 }
 0x317   : > { %3326 = vmatmul.mubr.bf16.gmra.mrb[8].mxu1 %v3113_v49  ;;  %3294 = vmatmul.mubr.bf16.gmra.mrb[8].mxu0 %v3105_v51 }
 0x318   : > { %v2988_v24 = vsel %vm28_vm0, %v4654_v18, %v5974_v52  ;;  %v2987_v25 = vsel %vm28_vm0, %v4653_v20, %v5973_v31  ;;  %v2980_v36 = vsel %vm28_vm0, %v4646_v12, %v5969_v0  ;;  %v2979_v61 = vsel %vm28_vm0, %v4645_v34, %v5968_v7 }
 0x319   : > { %v5982_v63 = vpop.permute.xlu1 %5981  ;;  %v5977_v14 = vpop.permute.xlu0 %5976 }
 0x31a   : > { %v5984_v3 = vunpack.i.h.bf16 %v5982_v63  ;;  %v5983_v48 = vunpack.i.l.bf16 %v5982_v63  ;;  %v5979_v44 = vunpack.i.h.bf16 %v5977_v14  ;;  %v5978_v28 = vunpack.i.l.bf16 %v5977_v14 }
 0x31c   : > { %v3003_v26 = vsel %vm43_vm1, %v2987_v25, %v5983_v48  ;;  %v3004_v10 = vsel %vm43_vm1, %v2988_v24, %v5984_v3  ;;  %v2995_v62 = vsel %vm43_vm1, %v2979_v61, %v5978_v28  ;;  %v2996_v40 = vsel %vm43_vm1, %v2980_v36, %v5979_v44 }
 0x31d   : > { %v5992_v38 = vpop.permute.xlu1 %5991  ;;  %v5987_v60 = vpop.permute.xlu0 %5986 }
 0x31e   : > { %v5994_v4 = vunpack.i.h.bf16 %v5992_v38  ;;  %v5993_v32 = vunpack.i.l.bf16 %v5992_v38  ;;  %v5989_v21 = vunpack.i.h.bf16 %v5987_v60  ;;  %v5988_v23 = vunpack.i.l.bf16 %v5987_v60 }
 0x320   : > { %v3019_v47 = vsel %vm2240_vm4, %v3003_v26, %v5993_v32  ;;  %v3020_v6 = vsel %vm2240_vm4, %v3004_v10, %v5994_v4  ;;  %v3011_v54 = vsel %vm2240_vm4, %v2995_v62, %v5988_v23  ;;  %v3012_v16 = vsel %vm2240_vm4, %v2996_v40, %v5989_v21  ;;  %v9095_v26 = vld [vmem:[#allocation37_spill] sm:$0xff]  ;;  %v9096_v62 = vld [vmem:[#allocation19_spill] sm:$0xff] }
 0x321   : > { %v6002_v1 = vpop.permute.xlu1 %6001  ;;  %v5997_v42 = vpop.permute.xlu0 %5996 }
 0x322   : > { %v6004_v19 = vunpack.i.h.bf16 %v6002_v1  ;;  %v6003_v27 = vunpack.i.l.bf16 %v6002_v1  ;;  %v5999_v37 = vunpack.i.h.bf16 %v5997_v42  ;;  %v5998_v2 = vunpack.i.l.bf16 %v5997_v42 }
 0x324   : > { %v3035_v43 = vsel %vm2257_vm5, %v3019_v47, %v6003_v27  ;;  %v3036_v56 = vsel %vm2257_vm5, %v3020_v6, %v6004_v19  ;;  %v3027_v29 = vsel %vm2257_vm5, %v3011_v54, %v5998_v2  ;;  %v3028_v49 = vsel %vm2257_vm5, %v3012_v16, %v5999_v37  ;;  %v9098_v16 = vld [vmem:[#allocation31_spill] sm:$0xff] }
 0x326   : > { %v6012_v17 = vpop.permute.xlu1 %6011 }
 0x327   : > { %v6007_v45 = vpop.permute.xlu0 %6006  ;;  %v6014_v9 = vunpack.i.h.bf16 %v6012_v17  ;;  %v6013_v13 = vunpack.i.l.bf16 %v6012_v17 }
 0x328   : > { %v6009_v8 = vunpack.i.h.bf16 %v6007_v45  ;;  %v6008_v46 = vunpack.i.l.bf16 %v6007_v45 }
 0x329   : > { %v3051_v5 = vsel %vm2274_vm6, %v3035_v43, %v6013_v13  ;;  %v3052_v51 = vsel %vm2274_vm6, %v3036_v56, %v6014_v9 }
 0x32a   : > { %v3043_v63 = vsel %vm2274_vm6, %v3027_v29, %v6008_v46  ;;  %v3044_v14 = vsel %vm2274_vm6, %v3028_v49, %v6009_v8 }
 0x32b   : > { %v6022_v33 = vpop.permute.xlu1 %6021 }
 0x32c   : > { %v6017_v22 = vpop.permute.xlu0 %6016  ;;  %v6024_v30 = vunpack.i.h.bf16 %v6022_v33  ;;  %v6023_v58 = vunpack.i.l.bf16 %v6022_v33 }
 0x32d   : > { %v6019_v15 = vunpack.i.h.bf16 %v6017_v22  ;;  %v6018_v53 = vunpack.i.l.bf16 %v6017_v22 }
 0x32e   : > { %v3067_v38 = vsel %vm2291_vm7, %v3051_v5, %v6023_v58  ;;  %v3068_v60 = vsel %vm2291_vm7, %v3052_v51, %v6024_v30  ;;  %v9099_v30 = vld [vmem:[#allocation9_spill] sm:$0xff] }
 0x32f   : > { %v6032_v59 = vpop.permute.xlu1 %6031  ;;  %v3059_v1 = vsel %vm2291_vm7, %v3043_v63, %v6018_v53  ;;  %v3060_v42 = vsel %vm2291_vm7, %v3044_v14, %v6019_v15 }
 0x330   : > { %v6027_v35 = vpop.permute.xlu0 %6026  ;;  %v6034_v39 = vunpack.i.h.bf16 %v6032_v59  ;;  %v6033_v50 = vunpack.i.l.bf16 %v6032_v59  ;;  %v9097_v59 = vld [vmem:[#allocation12_spill] sm:$0xff] }
 0x331   : > { %v6029_v57 = vunpack.i.h.bf16 %v6027_v35  ;;  %v6028_v41 = vunpack.i.l.bf16 %v6027_v35 }
 0x332   : > { %v3083_v17 = vsel %vm2308_vm8, %v3067_v38, %v6033_v50  ;;  %v3084_v45 = vsel %vm2308_vm8, %v3068_v60, %v6034_v39 }
 0x333   : > { %v6042_v11 = vpop.permute.xlu1 %6041  ;;  %v3075_v31 = vsel %vm2308_vm8, %v3059_v1, %v6028_v41  ;;  %v3076_v20 = vsel %vm2308_vm8, %v3060_v42, %v6029_v57 }
 0x334   : > { %v6037_v55 = vpop.permute.xlu0 %6036  ;;  %v6044_v3 = vunpack.i.h.bf16 %v6042_v11  ;;  %v6043_v48 = vunpack.i.l.bf16 %v6042_v11 }
 0x335   : > { %v6039_v44 = vunpack.i.h.bf16 %v6037_v55  ;;  %v6038_v28 = vunpack.i.l.bf16 %v6037_v55 }
 0x336   : > { %v2442_v10 = vsel %vm2427_vm14, %v9095_v26, %v6043_v48  ;;  %v2443_v40 = vsel %vm2427_vm14, %v9096_v62, %v6044_v3 }
 0x337   : > { %v6052_v52 = vpop.permute.xlu1 %6051  ;;  %v2434_v54 = vsel %vm2427_vm14, %v9097_v59, %v6038_v28  ;;  %v2435_v19 = vsel %vm2427_vm14, %v9098_v16, %v6039_v44 }
 0x338   : > { %v6054_v18 = vunpack.i.h.bf16 %v6052_v52  ;;  %v6053_v0 = vunpack.i.l.bf16 %v6052_v52  ;;  %v6047_v7 = vpop.permute.xlu0 %6046 }
 0x339   : > { %v6049_v34 = vunpack.i.h.bf16 %v6047_v7  ;;  %v6048_v12 = vunpack.i.l.bf16 %v6047_v7 }
 0x33a   : > { %v3099_v4 = vsel %vm2325_vm9, %v3083_v17, %v6053_v0  ;;  %v3100_v32 = vsel %vm2325_vm9, %v3084_v45, %v6054_v18 }
 0x33b   : > { %v3116_v33 = vpack.c.bf16 %v3100_v32, %v3099_v4  ;;  %v3091_v21 = vsel %vm2325_vm9, %v3075_v31, %v6048_v12  ;;  %v3092_v23 = vsel %vm2325_vm9, %v3076_v20, %v6049_v34  ;;  %v6062_v22 = vpop.permute.xlu1 %6061 }
 0x33c   : > { %v3108_v24 = vpack.c.bf16 %v3092_v23, %v3091_v21  ;;  %v6064_v25 = vunpack.i.h.bf16 %v6062_v22  ;;  %v6063_v36 = vunpack.i.l.bf16 %v6062_v22  ;;  %v6057_v61 = vpop.permute.xlu0 %6056 }
 0x33d   : > { %v6059_v47 = vunpack.i.h.bf16 %v6057_v61  ;;  %v6058_v6 = vunpack.i.l.bf16 %v6057_v61  ;;  %4811 = vmatprep.mubr.msk.bf16.mxu1 %vm2342_vm10, %v3116_v33 }
 0x33e   : > { %4807 = vmatprep.mubr.msk.bf16.mxu0 %vm2342_vm10, %v3108_v24  ;;  %v2459_v27 = vsel %vm2444_vm15, %v2442_v10, %v6063_v36  ;;  %v2460_v35 = vsel %vm2444_vm15, %v2443_v40, %v6064_v25 }
 0x33f   : > { %v2451_v37 = vsel %vm2444_vm15, %v2434_v54, %v6058_v6  ;;  %v2452_v2 = vsel %vm2444_vm15, %v2435_v19, %v6059_v47  ;;  %v3115_v9 = vpack.c.bf16 %v2460_v35, %v2459_v27 }
 0x340   : > { %v3107_v13 = vpack.c.bf16 %v2452_v2, %v2451_v37 }
 0x341   : > { %3334 = vmatmul.mubr.bf16.gmra.mrb[12].mxu1 %v3115_v9 }
 0x342   : > { %3302 = vmatmul.mubr.bf16.gmra.mrb[12].mxu0 %v3107_v13 }
 0x39f   : > { %v3311_v8 = vpop.f32.mrb[0].mxu1 }
 0x3a0   : > { %v3279_v46 = vpop.f32.mrb[0].mxu0  ;;  %v3354_v58 = vadd.f32 %v9099_v30, %v3311_v8  ;;  %v3313_v15 = vpop.f32.mrb[1].mxu1 }
 0x3a1   : > { %v3346_v53 = vadd.f32 %v9099_v30, %v3279_v46  ;;  %v3281_v39 = vpop.f32.mrb[1].mxu0  ;;  %v3314_v50 = vpop.f32.mrb[2].mxu1 }
 0x3a2   : > { %v3370_v11 = vmax.f32 %v3354_v58, 0.0  ;;  %v3282_v43 = vpop.f32.mrb[2].mxu0  ;;  %v3355_v56 = vadd.f32 %v9099_v30, %v3314_v50  ;;  %v3316_v57 = vpop.f32.mrb[3].mxu1 }
 0x3a3   : > { %v3362_v41 = vmax.f32 %v3346_v53, 0.0  ;;  %v3347_v55 = vadd.f32 %v9099_v30, %v3282_v43  ;;  %v3284_v29 = vpop.f32.mrb[3].mxu0 }
 0x3a4   : > { %3387 = vst.msk [vmem:[%s8511_s26 + $0x40] sm:$0xff] %vm43_vm1, %v3370_v11  ;;  %v3371_v49 = vmax.f32 %v3355_v56, 0.0 }
 0x3a5   : > { %3379 = vst.msk [vmem:[%s8511_s26] sm:$0xff] %vm43_vm1, %v3362_v41  ;;  %v3363_v5 = vmax.f32 %v3347_v55, 0.0 }
 0x3a6   : > { %3388 = vst.msk [vmem:[%s8511_s26 + $0x48] sm:$0xff] %vm43_vm1, %v3371_v49 }
 0x3a7   : > { %3380 = vst.msk [vmem:[%s8511_s26 + $0x8] sm:$0xff] %vm43_vm1, %v3363_v5 }
 0x3c0   : > { %v3287_v51 = vpop.f32.mrb[4].mxu0 }
 0x3c1   : > { %v3348_v63 = vadd.f32 %v9099_v30, %v3287_v51  ;;  %v3289_v14 = vpop.f32.mrb[5].mxu0 }
 0x3c2   : > { %v3290_v38 = vpop.f32.mrb[6].mxu0 }
 0x3c3   : > { %v3364_v60 = vmax.f32 %v3348_v63, 0.0  ;;  %v3349_v1 = vadd.f32 %v9099_v30, %v3290_v38  ;;  %v3292_v42 = vpop.f32.mrb[7].mxu0 }
 0x3c5   : > { %3381 = vst.msk [vmem:[%s8511_s26 + $0x10] sm:$0xff] %vm43_vm1, %v3364_v60  ;;  %v3365_v17 = vmax.f32 %v3349_v1, 0.0  ;;  %v3319_v45 = vpop.f32.mrb[4].mxu1 }
 0x3c6   : > { %v3356_v52 = vadd.f32 %v9099_v30, %v3319_v45  ;;  %v3321_v31 = vpop.f32.mrb[5].mxu1 }
 0x3c7   : > { %3382 = vst.msk [vmem:[%s8511_s26 + $0x18] sm:$0xff] %vm43_vm1, %v3365_v17  ;;  %v3322_v20 = vpop.f32.mrb[6].mxu1 }
 0x3c8   : > { %v3372_v18 = vmax.f32 %v3356_v52, 0.0  ;;  %v3357_v0 = vadd.f32 %v9099_v30, %v3322_v20  ;;  %v3324_v7 = vpop.f32.mrb[7].mxu1 }
 0x3ca   : > { %3389 = vst.msk [vmem:[%s8511_s26 + $0x50] sm:$0xff] %vm43_vm1, %v3372_v18  ;;  %v3373_v3 = vmax.f32 %v3357_v0, 0.0 }
 0x3cc   : > { %3390 = vst.msk [vmem:[%s8511_s26 + $0x58] sm:$0xff] %vm43_vm1, %v3373_v3 }
 0x3ea   : > { %v3327_v48 = vpop.f32.mrb[8].mxu1  ;;  %v3295_v34 = vpop.f32.mrb[8].mxu0 }
 0x3eb   : > { %v3358_v12 = vadd.f32 %v9099_v30, %v3327_v48  ;;  %v3329_v44 = vpop.f32.mrb[9].mxu1  ;;  %v3350_v28 = vadd.f32 %v9099_v30, %v3295_v34  ;;  %v3297_v4 = vpop.f32.mrb[9].mxu0 }
 0x3ec   : > { %v3330_v32 = vpop.f32.mrb[10].mxu1  ;;  %v3298_v21 = vpop.f32.mrb[10].mxu0 }
 0x3ed   : > { %v3374_v33 = vmax.f32 %v3358_v12, 0.0  ;;  %v3359_v23 = vadd.f32 %v9099_v30, %v3330_v32  ;;  %v3332_v22 = vpop.f32.mrb[11].mxu1  ;;  %v3366_v24 = vmax.f32 %v3350_v28, 0.0  ;;  %v3351_v25 = vadd.f32 %v9099_v30, %v3298_v21  ;;  %v3300_v36 = vpop.f32.mrb[11].mxu0 }
 0x3ef   : > { %3391 = vst.msk [vmem:[%s8511_s26 + $0x60] sm:$0xff] %vm43_vm1, %v3374_v33  ;;  %v3375_v61 = vmax.f32 %v3359_v23, 0.0  ;;  %3383 = vst.msk [vmem:[%s8511_s26 + $0x20] sm:$0xff] %vm43_vm1, %v3366_v24  ;;  %v3367_v26 = vmax.f32 %v3351_v25, 0.0 }
 0x3f1   : > { %3392 = vst.msk [vmem:[%s8511_s26 + $0x68] sm:$0xff] %vm43_vm1, %v3375_v61  ;;  %3384 = vst.msk [vmem:[%s8511_s26 + $0x28] sm:$0xff] %vm43_vm1, %v3367_v26 }
 0x414   : > { %v3335_v10 = vpop.f32.mrb[12].mxu1 }
 0x415   : > { %v3303_v62 = vpop.f32.mrb[12].mxu0  ;;  %v3360_v40 = vadd.f32 %v9099_v30, %v3335_v10  ;;  %v3337_v47 = vpop.f32.mrb[13].mxu1 }
 0x416   : > { %v3352_v6 = vadd.f32 %v9099_v30, %v3303_v62  ;;  %v3305_v59 = vpop.f32.mrb[13].mxu0  ;;  %v3338_v54 = vpop.f32.mrb[14].mxu1  ;;  %796 = sbr.rel (!%p794_p2) target bundleno = 336 (0x150), region = 230 }
 0x417   : > { %v3376_v16 = vmax.f32 %v3360_v40, 0.0  ;;  %v3306_v19 = vpop.f32.mrb[14].mxu0  ;;  %v3361_v27 = vadd.f32 %v9099_v30, %v3338_v54  ;;  %v3340_v35 = vpop.f32.mrb[15].mxu1 }
 0x418   : > { %v3368_v37 = vmax.f32 %v3352_v6, 0.0  ;;  %v3353_v2 = vadd.f32 %v9099_v30, %v3306_v19  ;;  %v3308_v9 = vpop.f32.mrb[15].mxu0 }
 0x419   : > { %3393 = vst.msk [vmem:[%s8511_s26 + $0x70] sm:$0xff] %vm43_vm1, %v3376_v16  ;;  %v3377_v13 = vmax.f32 %v3361_v27, 0.0 }
 0x41a   : > { %3385 = vst.msk [vmem:[%s8511_s26 + $0x30] sm:$0xff] %vm43_vm1, %v3368_v37  ;;  %v3369_v8 = vmax.f32 %v3353_v2, 0.0 }
 0x41b   : > { %3394 = vst.msk [vmem:[%s8511_s26 + $0x78] sm:$0xff] %vm43_vm1, %v3377_v13 }
 0x41c   : > { %3386 = vst.msk [vmem:[%s8511_s26 + $0x38] sm:$0xff] %vm43_vm1, %v3369_v8 }
 0x41d LB: > { %s4813_s27 = sshll.u32 %s6210_s25, 6  ;;  %s3400_s25 = sadd.s32 1, %s6210_s25   ;;  %s6210_s25 = sphi %s8560_s25, %s3400_s25  }
 0x41e   : > { %s8566_s28 = scalar_lea.vmem [#allocation4], %s4813_s27  ;;  %p3397_p3 = scmp.ge.s32.totalorder %s3400_s25, 8  }
 0x41f   :  { %vm3474_vm0 = vcmask (%p3397_p3), 126976   ;;  %v6115_v40 = vld [vmem:[%s8827_s3 + $0x40] sm:$0xff] (%p3397_p3)   ;;  %v6117_v19 = vld [vmem:[%s8827_s3 + $0x48] sm:$0xff] (%p3397_p3)   ;;  %v6229_v37 = vmov (%p3397_p3), 0   ;;  %s6230_s10 = smov (%p3397_p3), 16   ;;  %s6231_s11 = smov (%p3397_p3), 48  }
 0x420   :  { %v6116_v6 = vld [vmem:[%s8827_s3] sm:$0xff] (%p3397_p3)   ;;  %4907 = vmatprep.subr.bf16.mxu0 (%p3397_p3), %v6115_v40  ;;  %3915 = vmatprep.subr.bf16.mxu1 (%p3397_p3), %v6229_v37  ;;  %s6232_s13 = smov (%p3397_p3), 32   ;;  %s6233_s18 = smov (%p3397_p3), 64  }
 0x421   :  { %4908 = vmatpush3.bf16.msra.mxu0 (%p3397_p3), %v6116_v6  ;;  %s6234_s21 = smov (%p3397_p3), 80   ;;  %s6235_s0 = smov (%p3397_p3), 96  }
 0x422   :  { %4909 = vmatprep.subr.bf16.mxu0 (%p3397_p3), %v6117_v19  ;;  %s6236_s26 = smov (%p3397_p3), 112   ;;  %s6238_s12 = smov (%p3397_p3), [#allocation6]  }
 0x423   : > { %v3403_v46 = vld [vmem:[%s8566_s28] sm:$0xff]  ;;  %v4824_v58 = vld [vmem:[%s8566_s28 + $0x10] sm:$0xff]  ;;  %v3404_v39 = vld [vmem:[%s8566_s28 + $0x8] sm:$0xff]  ;;  %s4184_s14 = sshll.u32 (%p3397_p3), %s6238_s12, 4  ;;  %s4185_s14 = int_to_ptr.vmem [resolvable:$true] %s4184_s14 }
 0x424   : > { %v4815_v30 = vld [vmem:[%s8566_s28 + $0x1] sm:$0xff]  ;;  %v4833_v53 = vld [vmem:[%s8566_s28 + $0x11] sm:$0xff]  ;;  %v4816_v50 = vld [vmem:[%s8566_s28 + $0x9] sm:$0xff]  ;;  %p6161_p5 = scmp.lt.s32.totalorder (%p3397_p3), %s4185_s14, %s4185_s14 }
 0x425   : > { %v3421_v15 = vmax.f32 %v3403_v46, %v4815_v30  ;;  %v3422_v11 = vmax.f32 %v3404_v39, %v4816_v50  ;;  %v4825_v43 = vld [vmem:[%s8566_s28 + $0x18] sm:$0xff]  ;;  %v3423_v57 = vmax.f32 %v4824_v58, %v4833_v53  ;;  %v4826_v41 = vld [vmem:[%s8566_s28 + $0x20] sm:$0xff]  ;;  %v4827_v5 = vld [vmem:[%s8566_s28 + $0x28] sm:$0xff] }
 0x426   : > { %v4834_v56 = vld [vmem:[%s8566_s28 + $0x19] sm:$0xff]  ;;  %v4835_v29 = vld [vmem:[%s8566_s28 + $0x21] sm:$0xff]  ;;  %v4836_v51 = vld [vmem:[%s8566_s28 + $0x29] sm:$0xff] }
 0x427   : > { %v3439_v55 = vmax.f32 %v3421_v15, %v4824_v58  ;;  %v3424_v49 = vmax.f32 %v4825_v43, %v4834_v56  ;;  %v3440_v63 = vmax.f32 %v3422_v11, %v4825_v43  ;;  %v3441_v14 = vmax.f32 %v3423_v57, %v4826_v41  ;;  %v4828_v60 = vld [vmem:[%s8566_s28 + $0x30] sm:$0xff]  ;;  %v4829_v17 = vld [vmem:[%s8566_s28 + $0x38] sm:$0xff]  ;;  %v4830_v18 = vld [vmem:[%s8566_s28 + $0x40] sm:$0xff] }
 0x428   : > { %v3425_v38 = vmax.f32 %v4826_v41, %v4835_v29  ;;  %v4837_v1 = vld [vmem:[%s8566_s28 + $0x31] sm:$0xff]  ;;  %v3426_v42 = vmax.f32 %v4827_v5, %v4836_v51  ;;  %v4838_v31 = vld [vmem:[%s8566_s28 + $0x39] sm:$0xff]  ;;  %v4839_v34 = vld [vmem:[%s8566_s28 + $0x41] sm:$0xff] }
 0x429   : > { %v3457_v45 = vmax.f32 %v3439_v55, %v4833_v53  ;;  %v3442_v52 = vmax.f32 %v3424_v49, %v4827_v5  ;;  %v3427_v20 = vmax.f32 %v4828_v60, %v4837_v1  ;;  %v3458_v0 = vmax.f32 %v3440_v63, %v4834_v56  ;;  %v4831_v12 = vld [vmem:[%s8566_s28 + $0x48] sm:$0xff]  ;;  %v6119_v63 = vld [vmem:[%s8827_s3 + $0x80] sm:$0xff] (%p3397_p3)  }
 0x42a   : > { %v3459_v7 = vmax.f32 %v3441_v14, %v4835_v29  ;;  %v3443_v3 = vmax.f32 %v3425_v38, %v4828_v60  ;;  %v3444_v48 = vmax.f32 %v3426_v42, %v4829_v17  ;;  %v3428_v4 = vmax.f32 %v4829_v17, %v4838_v31  ;;  %v4840_v21 = vld [vmem:[%s8566_s28 + $0x49] sm:$0xff]  ;;  %3399 = sbr.rel (!%p3397_p3) target bundleno = 1053 (0x41d), region = 241  ;;  %3916 = vmatpush1.bf16.msra.mxu1 (%p3397_p3), %v6119_v63  ;;  %v6124_v17 = vld [vmem:[%s8827_s3 + $0x18] sm:$0xff] (%p3397_p3)  }
 0x42b   : > { %3465 = vst.msk [vmem:[%s8566_s28] sm:$0xff] %vm43_vm1, %v3457_v45  ;;  %v3460_v44 = vmax.f32 %v3442_v52, %v4836_v51  ;;  %v3445_v28 = vmax.f32 %v3427_v20, %v4830_v18  ;;  %3466 = vst.msk [vmem:[%s8566_s28 + $0x8] sm:$0xff] %vm43_vm1, %v3458_v0  ;;  %v6118_v49 = vld [vmem:[%s8827_s3 + $0x8] sm:$0xff] (%p3397_p3)   ;;  %v6120_v14 = vld [vmem:[%s8827_s3 + $0x50] sm:$0xff] (%p3397_p3)   ;;  %3917 = vmatprep.subr.bf16.mxu1 (%p3397_p3), %v6229_v37 }
 0x42c   : > { %3467 = vst.msk [vmem:[%s8566_s28 + $0x10] sm:$0xff] %vm43_vm1, %v3459_v7  ;;  %v3461_v32 = vmax.f32 %v3443_v3, %v4837_v1  ;;  %v3462_v33 = vmax.f32 %v3444_v48, %v4838_v31  ;;  %v3446_v22 = vmax.f32 %v3428_v4, %v4831_v12  ;;  %4910 = vmatpush3.bf16.msra.mxu0 (%p3397_p3), %v6118_v49  ;;  %v6121_v38 = vld [vmem:[%s8827_s3 + $0x10] sm:$0xff] (%p3397_p3)   ;;  %v6122_v60 = vld [vmem:[%s8827_s3 + $0x88] sm:$0xff] (%p3397_p3)   ;;  %v6123_v1 = vld [vmem:[%s8827_s3 + $0x58] sm:$0xff] (%p3397_p3)  }
 0x42d   : > { %3468 = vst.msk [vmem:[%s8566_s28 + $0x18] sm:$0xff] %vm43_vm1, %v3460_v44  ;;  %v3463_v23 = vmax.f32 %v3445_v28, %v4839_v34  ;;  %4911 = vmatprep.subr.bf16.mxu0 (%p3397_p3), %v6120_v14  ;;  %v6125_v52 = vld [vmem:[%s8827_s3 + $0x90] sm:$0xff] (%p3397_p3)   ;;  %v6126_v20 = vld [vmem:[%s8827_s3 + $0x60] sm:$0xff] (%p3397_p3)   ;;  %v6128_v7 = vld [vmem:[%s8827_s3 + $0x98] sm:$0xff] (%p3397_p3)  }
 0x42e   : > { %3469 = vst.msk [vmem:[%s8566_s28 + $0x20] sm:$0xff] %vm43_vm1, %v3461_v32  ;;  %3470 = vst.msk [vmem:[%s8566_s28 + $0x28] sm:$0xff] %vm43_vm1, %v3462_v33  ;;  %v3464_v24 = vmax.f32 %v3446_v22, %v4840_v21  ;;  %3918 = vmatpush1.bf16.msra.mxu1 (%p3397_p3), %v6122_v60  ;;  %v6127_v0 = vld [vmem:[%s8827_s3 + $0x20] sm:$0xff] (%p3397_p3)   ;;  %v6129_v3 = vld [vmem:[%s8827_s3 + $0x68] sm:$0xff] (%p3397_p3)  }
 0x42f   : > { %3471 = vst.msk [vmem:[%s8566_s28 + $0x30] sm:$0xff] %vm43_vm1, %v3463_v23  ;;  %3919 = vmatprep.subr.bf16.mxu1 (%p3397_p3), %v6229_v37  ;;  %v6130_v12 = vld [vmem:[%s8827_s3 + $0x28] sm:$0xff] (%p3397_p3)   ;;  %v6132_v44 = vld [vmem:[%s8827_s3 + $0x70] sm:$0xff] (%p3397_p3)   ;;  %v6131_v28 = vld [vmem:[%s8827_s3 + $0xa0] sm:$0xff] (%p3397_p3)  }
 0x430   : > { %3472 = vst.msk [vmem:[%s8566_s28 + $0x38] sm:$0xff] %vm43_vm1, %v3464_v24  ;;  %4912 = vmatpush3.bf16.msra.mxu0 (%p3397_p3), %v6121_v38  ;;  %v6133_v4 = vld [vmem:[%s8827_s3 + $0x30] sm:$0xff] (%p3397_p3)   ;;  %v6135_v32 = vld [vmem:[%s8827_s3 + $0x78] sm:$0xff] (%p3397_p3)   ;;  %v6134_v33 = vld [vmem:[%s8827_s3 + $0xa8] sm:$0xff] (%p3397_p3)  }
 0x431   :  { %4913 = vmatprep.subr.bf16.mxu0 %v6123_v1  ;;  %v6136_v21 = vld [vmem:[%s8827_s3 + $0x38] sm:$0xff]   ;;  %v6137_v22 = vld [vmem:[%s8827_s3 + $0xb0] sm:$0xff]  }
 0x432   :  { %3920 = vmatpush1.bf16.msra.mxu1 %v6125_v52 }
 0x433   :  { %3921 = vmatprep.subr.bf16.mxu1 %v6229_v37 }
 0x434   :  { %4914 = vmatpush3.bf16.msra.mxu0 %v6124_v17 }
 0x435   :  { %4915 = vmatprep.subr.bf16.mxu0 %v6126_v20 }
 0x436   :  { %3922 = vmatpush1.bf16.msra.mxu1 %v6128_v7 }
 0x437   :  { %v3473_v25 = vld [vmem:[#allocation4] ss:$2 sm:$0x1f]  ;;  %3923 = vmatprep.subr.bf16.mxu1 %v6229_v37 }
 0x438   :  { %3475 = vst.msk [vmem:[#allocation5] sm:$0x1f] %vm3474_vm0, %v3473_v25  ;;  %v3477_v36 = vld [vmem:[#allocation4 + $0x20] ss:$2 sm:$0x1f]  ;;  %4916 = vmatpush3.bf16.msra.mxu0 %v6127_v0 }
 0x439   :  { %v3489_v61 = vld [vmem:[#allocation4 + $0x100] ss:$2 sm:$0x1f]  ;;  %3478 = vst.msk [vmem:[#allocation5 + $0x5] sm:$0x1f] %vm3474_vm0, %v3477_v36  ;;  %4917 = vmatprep.subr.bf16.mxu0 %v6129_v3  ;;  %v9100_v36 = vmov 0.0  }
 0x43a   :  { %3490 = vst.msk [vmem:[#allocation5 + $0x19] sm:$0x1f] %vm3474_vm0, %v3489_v61  ;;  %v3492_v26 = vld [vmem:[#allocation4 + $0x120] ss:$2 sm:$0x1f]  ;;  %3924 = vmatpush1.bf16.msra.mxu1 %v6131_v28  ;;  %v6139_v61 = vld [vmem:[%s8827_s3 + $0xc0] sm:$0xff]  }
 0x43b   :  { %v3480_v10 = vld [vmem:[#allocation4 + $0x40] ss:$2 sm:$0x1f]  ;;  %3493 = vst.msk [vmem:[#allocation5 + $0x1e] sm:$0x1f] %vm3474_vm0, %v3492_v26  ;;  %3925 = vmatprep.subr.bf16.mxu1 %v6229_v37  ;;  %v6141_v3 = vld [vmem:[%s8828_s4 + $0x8] sm:$0xff]  }
 0x43c   :  { %3481 = vst.msk [vmem:[#allocation5 + $0xa] sm:$0x1f] %vm3474_vm0, %v3480_v10  ;;  %v3495_v62 = vld [vmem:[#allocation4 + $0x140] ss:$2 sm:$0x1f]  ;;  %4918 = vmatpush3.bf16.msra.mxu0 %v6130_v12 }
 0x43d   :  { %3496 = vst.msk [vmem:[#allocation5 + $0x23] sm:$0x1f] %vm3474_vm0, %v3495_v62  ;;  %v3483_v47 = vld [vmem:[#allocation4 + $0x60] ss:$2 sm:$0x1f]  ;;  %4919 = vmatprep.subr.bf16.mxu0 %v6132_v44 }
 0x43e   :  { %3484 = vst.msk [vmem:[#allocation5 + $0xf] sm:$0x1f] %vm3474_vm0, %v3483_v47  ;;  %v3498_v59 = vld [vmem:[#allocation4 + $0x160] ss:$2 sm:$0x1f]  ;;  %3926 = vmatpush1.bf16.msra.mxu1 %v6134_v33 }
 0x43f   :  { %3499 = vst.msk [vmem:[#allocation5 + $0x28] sm:$0x1f] %vm3474_vm0, %v3498_v59  ;;  %v3486_v54 = vld [vmem:[#allocation4 + $0x80] ss:$2 sm:$0x1f]  ;;  %3927 = vmatprep.subr.bf16.mxu1 %v6229_v37 }
 0x440   :  { %v3501_v16 = vld [vmem:[#allocation4 + $0x180] ss:$2 sm:$0x1f]  ;;  %3487 = vst.msk [vmem:[#allocation5 + $0x14] sm:$0x1f] %vm3474_vm0, %v3486_v54  ;;  %4920 = vmatpush3.bf16.msra.mxu0 %v6133_v4 }
 0x441   :  { %3502 = vst.msk [vmem:[#allocation5 + $0x2d] sm:$0x1f] %vm3474_vm0, %v3501_v16  ;;  %v3505_v27 = vld [vmem:[#allocation5 + $0x1] ss:$25 sm:$0x3]  ;;  %4921 = vmatprep.subr.bf16.mxu0 %v6135_v32  ;;  %v6138_v25 = vld [vmem:[%s8827_s3 + $0xb8] sm:$0xff]  }
 0x442   :  { %v3509_v35 = vld [vmem:[#allocation5 + $0x3] ss:$25 sm:$0x3]  ;;  %v3521_v2 = vld [vmem:[#allocation5 + $0x9] ss:$25 sm:$0x3]  ;;  %3928 = vmatpush1.bf16.msra.mxu1 %v6137_v22 }
 0x443   :  { %v3507_v9 = vld [vmem:[#allocation5 + $0x2] ss:$25 sm:$0x3]  ;;  %v6080_v13 = vpack.i.bf16 %v3505_v27, %v3521_v2  ;;  %v3511_v58 = vld [vmem:[#allocation5 + $0x4] ss:$25 sm:$0x3]  ;;  %3929 = vmatprep.subr.bf16.mxu1 %v6229_v37 }
 0x444   :  { %v3525_v8 = vld [vmem:[#allocation5 + $0xb] ss:$25 sm:$0x3]  ;;  %v3523_v46 = vld [vmem:[#allocation5 + $0xa] ss:$25 sm:$0x3]  ;;  %4922 = vmatpush3.bf16.msra.mxu0 %v6136_v21 }
 0x445   :  { %v6090_v30 = vpack.i.bf16 %v3509_v35, %v3525_v8  ;;  %v3527_v15 = vld [vmem:[#allocation5 + $0xc] ss:$25 sm:$0x3]  ;;  %6081 = vrot.lane.b32.xlu0 %v6080_v13, %s6230_s10  ;;  %v6085_v53 = vpack.i.bf16 %v3507_v9, %v3523_v46  ;;  %v3529_v11 = vld [vmem:[#allocation5 + $0xd] ss:$25 sm:$0x3]  ;;  %4989 = vmatprep.subr.bf16.mxu0 %v9100_v36 }
 0x446   :  { %v6095_v39 = vpack.i.bf16 %v3511_v58, %v3527_v15  ;;  %v3513_v50 = vld [vmem:[#allocation5 + $0x5] ss:$25 sm:$0x3]  ;;  %v3515_v43 = vld [vmem:[#allocation5 + $0x6] ss:$25 sm:$0x3]  ;;  %3930 = vmatpush1.bf16.msra.mxu1 %v6138_v25 }
 0x447   :  { %6091 = vrot.lane.b32.xlu1 %v6090_v30, %s6231_s11  ;;  %v3531_v56 = vld [vmem:[#allocation5 + $0xe] ss:$25 sm:$0x3]  ;;  %v6100_v57 = vpack.i.bf16 %v3513_v50, %v3529_v11  ;;  %v3533_v29 = vld [vmem:[#allocation5 + $0xf] ss:$25 sm:$0x3]  ;;  %3931 = vmatprep.subr.bf16.mxu1 %v6229_v37 }
 0x448   :  { %v6105_v41 = vpack.i.bf16 %v3515_v43, %v3531_v56  ;;  %v3517_v55 = vld [vmem:[#allocation5 + $0x7] ss:$25 sm:$0x3]  ;;  %v3537_v51 = vld [vmem:[#allocation5 + $0x11] ss:$25 sm:$0x3] }
 0x449   :  { %6086 = vrot.lane.b32.xlu0 %v6085_v53, %s6232_s13  ;;  %v6110_v5 = vpack.i.bf16 %v3517_v55, %v3533_v29  ;;  %v3539_v42 = vld [vmem:[#allocation5 + $0x12] ss:$25 sm:$0x3]  ;;  %v3541_v45 = vld [vmem:[#allocation5 + $0x13] ss:$25 sm:$0x3] }
 0x44a   :  { %v3543_v31 = vld [vmem:[#allocation5 + $0x14] ss:$25 sm:$0x3]  ;;  %v3545_v18 = vld [vmem:[#allocation5 + $0x15] ss:$25 sm:$0x3]  ;;  %3932 = vmatpush1.bf16.msra.mxu1 %v6139_v61 }
 0x44b   :  { %6096 = vrot.lane.b32.xlu1 %v6095_v39, %s6233_s18  ;;  %v3547_v48 = vld [vmem:[#allocation5 + $0x16] ss:$25 sm:$0x3]  ;;  %v3549_v34 = vld [vmem:[#allocation5 + $0x17] ss:$25 sm:$0x3]  ;;  %5009 = vmatprep.subr.bf16.mxu1 %v9100_v36 }
 0x44c   :  { %v3551_v23 = vld [vmem:[#allocation5 + $0x18] ss:$25 sm:$0x3]  ;;  %v3519_v47 = vld [vmem:[#allocation5 + $0x8] ss:$25 sm:$0x3] }
 0x44d   :  { %6101 = vrot.lane.b32.xlu0 %v6100_v57, %s6234_s21  ;;  %v3666_v24 = vpack.c.bf16 %v3551_v23, %v3551_v23  ;;  %v3503_v6 = vld [vmem:[#allocation5] ss:$25 sm:$0x3]  ;;  %v6142_v28 = vld [vmem:[%s8828_s4 + $0x10] sm:$0xff]   ;;  %v6143_v23 = vld [vmem:[%s8828_s4 + $0x18] sm:$0xff]  }
 0x44e   :  { %v6144_v22 = vld [vmem:[%s8828_s4 + $0x20] sm:$0xff]   ;;  %v6146_v25 = vld [vmem:[%s8828_s4 + $0x30] sm:$0xff]   ;;  %v6147_v61 = vld [vmem:[%s8828_s4 + $0x38] sm:$0xff]  }
 0x44f   :  { %6106 = vrot.lane.b32.xlu1 %v6105_v41, %s6235_s0  ;;  %4867 = vmatprep.mubr.msk.bf16.mxu1 %vm43_vm1, %v3666_v24  ;;  %v6145_v24 = vld [vmem:[%s8828_s4 + $0x28] sm:$0xff]  }
 0x451   :  { %6111 = vrot.lane.b32.xlu0 %v6110_v5, %s6236_s26 }
 0x453   :  { %3629 = vrot.lane.b32.xlu1 %v3537_v51, %s6230_s10  ;;  %v3535_v51 = vld [vmem:[#allocation5 + $0x10] ss:$25 sm:$0x3] }
 0x455   :  { %3633 = vrot.lane.b32.xlu0 %v3539_v42, %s6232_s13 }
 0x457   :  { %3637 = vrot.lane.b32.xlu1 %v3541_v45, %s6231_s11 }
 0x459   :  { %3641 = vrot.lane.b32.xlu0 %v3543_v31, %s6233_s18  ;;  %v6140_v31 = vld [vmem:[%s8828_s4] sm:$0xff]  }
 0x45b   :  { %3645 = vrot.lane.b32.xlu1 %v3545_v18, %s6234_s21 }
 0x45d   :  { %3649 = vrot.lane.b32.xlu0 %v3547_v48, %s6235_s0 }
 0x45f   :  { %3653 = vrot.lane.b32.xlu1 %v3549_v34, %s6236_s26 }
 0x4b7   :  { %v6082_v26 = vpop.permute.xlu0 %6081 }
 0x4b8   :  { %v6084_v62 = vunpack.i.h.bf16 %v6082_v26  ;;  %v6083_v40 = vunpack.i.l.bf16 %v6082_v26  ;;  %v6148_v26 = vld [vmem:[%s8829_s5] sm:$0xff]  }
 0x4b9   :  { %v6092_v10 = vpop.permute.xlu1 %6091 }
 0x4ba   :  { %v6094_v54 = vunpack.i.h.bf16 %v6092_v10  ;;  %v6093_v16 = vunpack.i.l.bf16 %v6092_v10  ;;  %v3608_v2 = vsel %vm43_vm1, %v3503_v6, %v6084_v62  ;;  %v3621_v9 = vsel %vm43_vm1, %v3519_v47, %v6083_v40  ;;  %v6149_v10 = vld [vmem:[%s8829_s5 + $0x8] sm:$0xff]   ;;  %v6150_v62 = vld [vmem:[%s8829_s5 + $0x10] sm:$0xff]   ;;  %v6151_v40 = vld [vmem:[%s8829_s5 + $0x18] sm:$0xff]  }
 0x4bb   :  { %v6087_v59 = vpop.permute.xlu0 %6086  ;;  %v6152_v47 = vld [vmem:[%s8829_s5 + $0x20] sm:$0xff]   ;;  %v6153_v6 = vld [vmem:[%s8829_s5 + $0x28] sm:$0xff]  }
 0x4bc   :  { %v6089_v19 = vunpack.i.h.bf16 %v6087_v59  ;;  %v6088_v27 = vunpack.i.l.bf16 %v6087_v59 }
 0x4bd   :  { %v6097_v35 = vpop.permute.xlu1 %6096 }
 0x4be   :  { %v6099_v37 = vunpack.i.h.bf16 %v6097_v35  ;;  %v6098_v13 = vunpack.i.l.bf16 %v6097_v35  ;;  %v3610_v8 = vsel %vm2257_vm5, %v3608_v2, %v6089_v19  ;;  %v3622_v46 = vsel %vm2257_vm5, %v3621_v9, %v6088_v27  ;;  %v4841_v35 = vld [vmem:[%s8830_s6 + $0x2] ss:$0 sm:$0xff] }
 0x4bf   :  { %v3612_v30 = vsel %vm2291_vm7, %v3610_v8, %v6094_v54  ;;  %v6102_v58 = vpop.permute.xlu0 %6101  ;;  %v3623_v15 = vsel %vm2291_vm7, %v3622_v46, %v6093_v16 }
 0x4c0   :  { %v3614_v53 = vsel %vm2325_vm9, %v3612_v30, %v6099_v37  ;;  %v6104_v39 = vunpack.i.h.bf16 %v6102_v58  ;;  %v6103_v50 = vunpack.i.l.bf16 %v6102_v58  ;;  %v3624_v43 = vsel %vm2325_vm9, %v3623_v15, %v6098_v13  ;;  %v6154_v15 = vld [vmem:[%s8829_s5 + $0x30] sm:$0xff]  }
 0x4c1   :  { %v6107_v11 = vpop.permute.xlu1 %6106 }
 0x4c2   :  { %v6109_v56 = vunpack.i.h.bf16 %v6107_v11  ;;  %v6108_v57 = vunpack.i.l.bf16 %v6107_v11  ;;  %v3616_v41 = vsel %vm211_vm2, %v3614_v53, %v6104_v39  ;;  %v3625_v55 = vsel %vm211_vm2, %v3624_v43, %v6103_v50  ;;  %v6155_v53 = vld [vmem:[%s8829_s5 + $0x38] sm:$0xff]   ;;  %v4868_v39 = vld [vmem:[%s8830_s6 + $0x3] ss:$0 sm:$0xff]  ;;  %s6156_s5 = scalar_lea.vmem %s4185_s14, 32 }
 0x4c3   :  { %v6112_v29 = vpop.permute.xlu0 %6111  ;;  %p6157_p4 = scmp.ne.s32.totalorder %s4185_s14, %s6156_s5  ;;  %p6162_p6 = scmp.lt.s32.totalorder %s6156_s5, %s6156_s5 }
 0x4c4   :  { %v6114_v49 = vunpack.i.h.bf16 %v6112_v29  ;;  %v6113_v5 = vunpack.i.l.bf16 %v6112_v29  ;;  %v3618_v14 = vsel %vm2393_vm12, %v3616_v41, %v6109_v56  ;;  %v3626_v38 = vsel %vm2393_vm12, %v3625_v55, %v6108_v57 }
 0x4c5   :  { %v3630_v63 = vpop.permute.xlu1 %3629  ;;  %p6163_p7 = por %p6162_p6, %p6161_p5 }
 0x4c6   :  { %v3620_v60 = vsel %vm2427_vm14, %v3618_v14, %v6114_v49  ;;  %v3627_v1 = vsel %vm2427_vm14, %v3626_v38, %v6113_v5  ;;  %v3656_v42 = vsel %vm43_vm1, %v3535_v51, %v3630_v63  ;;  %vm6237_vm1 = vmmov 0  }
 0x4c7   :  { %v3634_v17 = vpop.permute.xlu0 %3633  ;;  %v3664_v45 = vpack.c.bf16 %v3627_v1, %v3627_v1  ;;  %v3663_v52 = vpack.c.bf16 %v3620_v60, %v3620_v60  ;;  %p6164_p8 = pnand %p6163_p7, %p6157_p4 }
 0x4c8   :  { %v3657_v20 = vsel %vm2257_vm5, %v3656_v42, %v3634_v17 }
 0x4c9   :  { %v3638_v18 = vpop.permute.xlu1 %3637  ;;  %3907 = vmatprep.mubr.bf16.mxu0 %v3664_v45 }
 0x4ca   :  { %3908 = vmatmul.mubr.bf16.vlgmr.msra.gmra.mrb[0].mxu0 %v3663_v52  ;;  %v3658_v0 = vsel %vm2291_vm7, %v3657_v20, %v3638_v18 }
 0x4cb   :  { %v3642_v7 = vpop.permute.xlu0 %3641  ;;  %4990 = vmatpush3.bf16.msra.mxu0 %v6140_v31  ;;  %5005 = vmatprep.mubr.msk.bf16.mxu0 %vm6237_vm1, %v9100_v36 }
 0x4cc   :  { %v3659_v48 = vsel %vm2325_vm9, %v3658_v0, %v3642_v7  ;;  %4991 = vmatprep.subr.bf16.mxu0 %v9100_v36 }
 0x4cd   :  { %v3646_v34 = vpop.permute.xlu1 %3645 }
 0x4ce   :  { %v3660_v12 = vsel %vm211_vm2, %v3659_v48, %v3646_v34 }
 0x4cf   :  { %v3650_v44 = vpop.permute.xlu0 %3649  ;;  %4992 = vmatpush3.bf16.msra.mxu0 %v6141_v3 }
 0x4d0   :  { %v3661_v4 = vsel %vm2393_vm12, %v3660_v12, %v3650_v44  ;;  %4993 = vmatprep.subr.bf16.mxu0 %v9100_v36 }
 0x4d1   :  { %v3654_v32 = vpop.permute.xlu1 %3653 }
 0x4d2   :  { %v3662_v33 = vsel %vm2427_vm14, %v3661_v4, %v3654_v32 }
 0x4d3   :  { %v3665_v21 = vpack.c.bf16 %v3662_v33, %v3662_v33  ;;  %4994 = vmatpush3.bf16.msra.mxu0 %v6142_v28 }
 0x4d4   :  { %4995 = vmatprep.subr.bf16.mxu0 %v9100_v36 }
 0x4d5   :  { %3948 = vmatmul.mubr.bf16.vlgmr.msra.gmra.mrb[0].mxu1 %v3665_v21 }
 0x4d6   :  { %5025 = vmatprep.mubr.msk.bf16.mxu1 %vm6237_vm1, %v9100_v36  ;;  %5010 = vmatpush3.bf16.msra.mxu1 %v6148_v26 }
 0x4d7   :  { %4996 = vmatpush3.bf16.msra.mxu0 %v6143_v23  ;;  %5011 = vmatprep.subr.bf16.mxu1 %v9100_v36 }
 0x4d8   :  { %4997 = vmatprep.subr.bf16.mxu0 %v9100_v36 }
 0x4da   :  { %5012 = vmatpush3.bf16.msra.mxu1 %v6149_v10 }
 0x4db   :  { %4998 = vmatpush3.bf16.msra.mxu0 %v6144_v22  ;;  %5013 = vmatprep.subr.bf16.mxu1 %v9100_v36 }
 0x4dc   :  { %4999 = vmatprep.subr.bf16.mxu0 %v9100_v36 }
 0x4de   :  { %5014 = vmatpush3.bf16.msra.mxu1 %v6150_v62 }
 0x4df   :  { %5000 = vmatpush3.bf16.msra.mxu0 %v6145_v24  ;;  %5015 = vmatprep.subr.bf16.mxu1 %v9100_v36 }
 0x4e0   :  { %5001 = vmatprep.subr.bf16.mxu0 %v9100_v36 }
 0x4e2   :  { %5016 = vmatpush3.bf16.msra.mxu1 %v6151_v40 }
 0x4e3   :  { %5002 = vmatpush3.bf16.msra.mxu0 %v6146_v25  ;;  %5017 = vmatprep.subr.bf16.mxu1 %v9100_v36 }
 0x4e4   :  { %5003 = vmatprep.subr.bf16.mxu0 %v9100_v36 }
 0x4e6   :  { %5018 = vmatpush3.bf16.msra.mxu1 %v6152_v47 }
 0x4e7   :  { %5004 = vmatpush3.bf16.msra.mxu0 %v6147_v61  ;;  %5019 = vmatprep.subr.bf16.mxu1 %v9100_v36 }
 0x4ea   :  { %5020 = vmatpush3.bf16.msra.mxu1 %v6153_v6 }
 0x4eb   :  { %5021 = vmatprep.subr.bf16.mxu1 %v9100_v36 }
 0x4ee   :  { %5022 = vmatpush3.bf16.msra.mxu1 %v6154_v15 }
 0x4ef   :  { %5023 = vmatprep.subr.bf16.mxu1 %v9100_v36  ;;  %v4877_v36 = vld [vmem:[%s8830_s6 + $0x4] ss:$0 sm:$0xff] }
 0x4f2   :  { %5024 = vmatpush3.bf16.msra.mxu1 %v6155_v53 }
 0x59d   :  { %v4923_v59 = vpop.f32.mrb[0].mxu0 }
 0x59e   :  { %v4924_v54 = vpop.f32.mrb[1].mxu0 }
 0x59f   :  { %v4925_v16 = vadd.f32 %v4924_v54, %v4923_v59  ;;  %v4926_v19 = vpop.f32.mrb[2].mxu0 }
 0x5a0   :  { %v4927_v27 = vpop.f32.mrb[3].mxu0 }
 0x5a1   :  { %v3910_v2 = vadd.f32 %v4925_v16, %v4841_v35 }
 0x5a8   :  { %v3949_v9 = vpop.f32.mrb[0].mxu1 }
 0x5a9   :  { %v3950_v37 = vadd.f32 %v3949_v9, %v3910_v2  ;;  %v3951_v13 = vpop.f32.mrb[1].mxu1 }
 0x5aa   :  { %v3952_v8 = vpop.f32.mrb[2].mxu1 }
 0x5ab   :  { %v3955_v46 = vmax.f32 %v3950_v37, 0.0  ;;  %v3953_v30 = vpop.f32.mrb[3].mxu1 }
 0x5ad   :  { %v3956_v58 = vpack.c.bf16 %v3955_v46, %v3955_v46 }
 0x5af   :  { %5006 = vmatmul.mubr.bf16.vlgmr.msra.gmra.mrb[4].mxu0 %v3956_v58 }
 0x682   :  { %v4060_v50 = vpop.f32.mrb[4].mxu0 }
 0x683   :  { %v4061_v11 = vadd.f32 %v4868_v39, %v4060_v50  ;;  %v5007_v43 = vpop.f32.mrb[5].mxu0 }
 0x684   :  { %v4063_v56 = vpop.f32.mrb[6].mxu0 }
 0x685   :  { %v4066_v57 = vmax.f32 %v4061_v11, 0.0  ;;  %v5008_v41 = vpop.f32.mrb[7].mxu0 }
 0x687   :  { %v4067_v55 = vpack.c.bf16 %v4066_v57, %v4066_v57 }
 0x689   :  { %5026 = vmatmul.mubr.bf16.vlgmr.msra.gmra.mrb[4].mxu1 %v4067_v55 }
 0x75c   :  { %v4171_v29 = vpop.f32.mrb[4].mxu1 }
 0x75d   :  { %v4172_v49 = vadd.f32 %v4877_v36, %v4171_v29  ;;  %v5027_v5 = vpop.f32.mrb[5].mxu1 }
 0x75e   :  { %v4174_v51 = vpop.f32.mrb[6].mxu1 }
 0x75f   :  { %4177 = vst [vmem:[#allocation6] sm:$0x3] %v4172_v49  ;;  %v5028_v63 = vpop.f32.mrb[7].mxu1 }
 0x760   :  { %6167 = shalt.err (!%p6164_p8)
}
 0x761   :  { %s6168_s6 = scalar_lea.hbm %s8831_s7, 32 }
 0x762   :  { %p6169_p9 = scmp.ne.s32.totalorder %s8831_s7, %s6168_s6  ;;  %p6172_p10 = scmp.lt.u32.totalorder %s6168_s6, %s8831_s7 }
 0x764   :  { %p6174_p11 = pnand %p6172_p10, %p6169_p9 }
 0x766   :  { %6177 = shalt.err (!%p6174_p11)
}
 0x767   :  { %4187 = dma.vmem_to_hbm [thread:$0]  %s4185_s14, 32, %s8831_s7, [#allocation7]  }
 0x768   :  { %6194 = dma.done.wait [#allocation7], 32  }
 0x769   :  { %6195 = vsyncadd [#allocation7], 4294967264 }
 0x76a   :  { %4191 = vsyncpa [#allocation7], 1 }

</bundles_post_ra>
